<compile_context>
chip_gen: v7x
topology: tpu7x:2x2x1
jax: 0.10.0
libtpu: 0.0.40
codegen_flags: <defaults>
</compile_context>

<pallas_src>
import functools

import jax
import jax.numpy as jnp
from jax.experimental import pallas as pl
from jax.experimental.pallas import tpu as pltpu

EPS = 1e-5

# feature sizes
D_IN, D_H, D_LAT = 10, 7, 4

# ---- flat parameter slab layout (f32 word offsets) -------------------------
OFF_W1 = 0                        # (7, 10)  encoder Linear(10, 7), (out, in)
OFF_B1 = OFF_W1 + D_H * D_IN      # (7,)
OFF_W2 = OFF_B1 + D_H             # (4, 7)   encoder Linear(7, 4)
OFF_B2 = OFF_W2 + D_LAT * D_H     # (4,)
OFF_G_ENC = OFF_B2 + D_LAT        # (4,)     BatchNorm1d(4) gamma
OFF_BE_ENC = OFF_G_ENC + D_LAT    # (4,)     BatchNorm1d(4) beta
OFF_W3 = OFF_BE_ENC + D_LAT       # (7, 4)   decoder Linear(4, 7)
OFF_B3 = OFF_W3 + D_H * D_LAT     # (7,)
OFF_W4 = OFF_B3 + D_H             # (10, 7)  decoder Linear(7, 10)
OFF_B4 = OFF_W4 + D_IN * D_H      # (10,)
OFF_G_DEC = OFF_B4 + D_IN         # (10,)    BatchNorm1d(10) gamma
OFF_BE_DEC = OFF_G_DEC + D_IN     # (10,)    BatchNorm1d(10) beta
N_PARAMS = OFF_BE_DEC + D_IN      # 252
N_PARAMS_PADDED = 256


# ---- in-kernel helpers (operate on lists of lane-dense (1, Bp) rows) --------
def _dense_rows(x_rows, p_ref, w_off, b_off, n_out, n_in, relu):
    """y[j, :] = sum_k W[j, k] * x[k, :] + b[j]  -- VPU scalar-broadcast FMAs."""
    out = []
    for j in range(n_out):
        acc = p_ref[w_off + j * n_in] * x_rows[0]
        for k in range(1, n_in):
            acc = acc + p_ref[w_off + j * n_in + k] * x_rows[k]
        acc = acc + p_ref[b_off + j]
        if relu:
            acc = jnp.maximum(acc, 0.0)
        out.append(acc)
    return out


def _batchnorm_rows(x_rows, p_ref, g_off, be_off, mask, inv_n):
    """Training-mode BatchNorm1d over the batch (lane) axis, one channel/row."""
    out = []
    for c, xc in enumerate(x_rows):
        xm = xc if mask is None else jnp.where(mask, xc, 0.0)
        mean = jnp.sum(xm, axis=1, keepdims=True) * inv_n                # (1,1)
        var = jnp.sum(xm * xm, axis=1, keepdims=True) * inv_n - mean * mean
        scale = jax.lax.rsqrt(var + EPS) * p_ref[g_off + c]              # EUP
        out.append((xc - mean) * scale + p_ref[be_off + c])
    return out


def _purifier_kernel(p_ref, x_ref, enc_ref, dec_ref, *, b_actual, b_padded):
    # p_ref: (256,) f32 in SMEM (packed params); x_ref: (10, Bp) batch-on-lanes.
    inv_n = jnp.float32(1.0 / b_actual)
    if b_actual < b_padded:
        lane = jax.lax.broadcasted_iota(jnp.int32, (1, b_padded), 1)
        mask = lane < b_actual
    else:
        mask = None

    x_rows = [x_ref[k:k + 1, :] for k in range(D_IN)]

    # ---- encoder ----
    h1 = _dense_rows(x_rows, p_ref, OFF_W1, OFF_B1, D_H, D_IN, relu=True)
    enc_pre = _dense_rows(h1, p_ref, OFF_W2, OFF_B2, D_LAT, D_H, relu=False)
    enc = _batchnorm_rows(enc_pre, p_ref, OFF_G_ENC, OFF_BE_ENC, mask, inv_n)

    # ---- decoder ----
    h2 = _dense_rows(enc, p_ref, OFF_W3, OFF_B3, D_H, D_LAT, relu=True)
    dec_pre = _dense_rows(h2, p_ref, OFF_W4, OFF_B4, D_IN, D_H, relu=False)
    dec = _batchnorm_rows(dec_pre, p_ref, OFF_G_DEC, OFF_BE_DEC, mask, inv_n)

    enc_ref[...] = jnp.concatenate(enc, axis=0)      # (4, Bp)  lane-dense store
    dec_ref[...] = jnp.concatenate(dec, axis=0)      # (10, Bp) lane-dense store


# ---- wrapper ----------------------------------------------------------------
def pack_params(params):
    (w1, b1, w2, b2, g_enc, be_enc, w3, b3, w4, b4, g_dec, be_dec) = params
    flat = jnp.concatenate([
        w1.reshape(-1), b1, w2.reshape(-1), b2, g_enc, be_enc,
        w3.reshape(-1), b3, w4.reshape(-1), b4, g_dec, be_dec,
    ]).astype(jnp.float32)
    return jnp.pad(flat, (0, N_PARAMS_PADDED - N_PARAMS))


def purifier_forward(x, params):
    B = x.shape[0]
    Bp = ((B + 127) // 128) * 128            # pad batch to a lane multiple
    # layout plumbing (wrapper-side): batch on the lane axis, zero-padded.
    xt = jnp.zeros((D_IN, Bp), jnp.float32).at[:, :B].set(x.T)
    p_flat = pack_params(params)

    kernel = functools.partial(_purifier_kernel, b_actual=B, b_padded=Bp)
    enc_t, dec_t = pl.pallas_call(
        kernel,
        out_shape=(
            jax.ShapeDtypeStruct((D_LAT, Bp), jnp.float32),
            jax.ShapeDtypeStruct((D_IN, Bp), jnp.float32),
        ),
        in_specs=[
            pl.BlockSpec(memory_space=pltpu.MemorySpace.SMEM),   # packed params
            pl.BlockSpec(memory_space=pltpu.MemorySpace.VMEM),   # x (10, Bp)
        ],
        out_specs=(
            pl.BlockSpec(memory_space=pltpu.MemorySpace.VMEM),
            pl.BlockSpec(memory_space=pltpu.MemorySpace.VMEM),
        ),
    )(p_flat, xt)
    # back to PyTorch layout, dropping the pad columns.
    return enc_t[:, :B].T, dec_t[:, :B].T


# ---- parameter init + pure-JAX reference ------------------------------------
def init_params():
    """PyTorch-layout params: Linear weights (out, in), biases / BN params 1D."""
    key = jax.random.PRNGKey(42)
    ks = jax.random.split(key, 8)

    def linear(kw, kb, fan_in, fan_out):
        bound = 1.0 / jnp.sqrt(float(fan_in))
        w = jax.random.uniform(kw, (fan_out, fan_in), jnp.float32, -bound, bound)
        b = jax.random.uniform(kb, (fan_out,), jnp.float32, -bound, bound)
        return w, b

    w1, b1 = linear(ks[0], ks[1], 10, 7)
    w2, b2 = linear(ks[2], ks[3], 7, 4)
    w3, b3 = linear(ks[4], ks[5], 4, 7)
    w4, b4 = linear(ks[6], ks[7], 7, 10)

    g_enc = jnp.ones((4,), jnp.float32)
    be_enc = jnp.zeros((4,), jnp.float32)
    g_dec = jnp.ones((10,), jnp.float32)
    be_dec = jnp.zeros((10,), jnp.float32)

    return (w1, b1, w2, b2, g_enc, be_enc, w3, b3, w4, b4, g_dec, be_dec)


def _bn_ref(x, gamma, beta):
    mean = jnp.mean(x, axis=0, keepdims=True)
    var = jnp.mean((x - mean) ** 2, axis=0, keepdims=True)   # biased, training
    return (x - mean) * jax.lax.rsqrt(var + EPS) * gamma + beta


def purifier_ref(x, params):
    (w1, b1, w2, b2, g_enc, be_enc, w3, b3, w4, b4, g_dec, be_dec) = params
    h1 = jnp.maximum(x @ w1.T + b1, 0.0)
    enc = _bn_ref(h1 @ w2.T + b2, g_enc, be_enc)
    h2 = jnp.maximum(enc @ w3.T + b3, 0.0)
    dec = _bn_ref(h2 @ w4.T + b4, g_dec, be_dec)
    return enc, dec


if __name__ == "__main__":
    B = 8
    x = jax.random.normal(jax.random.PRNGKey(0), (B, D_IN), jnp.float32)
    params = init_params()

    encode, decode = purifier_forward(x, params)
    jax.block_until_ready((encode, decode))

    enc_ref, dec_ref = purifier_ref(x, params)
    assert encode.shape == (B, D_LAT) and decode.shape == (B, D_IN)
    assert jnp.allclose(encode, enc_ref, atol=1e-5, rtol=1e-5)
    assert jnp.allclose(decode, dec_ref, atol=1e-5, rtol=1e-5)

    print("KERNEL_OK")
</pallas_src>

<mosaic_0001>
module attributes {stable_mosaic.version = 11 : i64} {
  func.func @_purifier_kernel(%arg0: memref<256xf32, #tpu.memory_space<smem>>, %arg1: memref<10x128xf32, #tpu.memory_space<vmem>>, %arg2: memref<4x128xf32, #tpu.memory_space<vmem>>, %arg3: memref<10x128xf32, #tpu.memory_space<vmem>>) attributes {dimension_semantics = [], scalar_prefetch = 0 : i64, scratch_operands = 0 : i64, tpu.core_type = #tpu.core_type<tc>} {
    %0 = tpu.iota {dimensions = array<i32: 1>} : vector<1x128xi32>
    %c8_i32 = arith.constant 8 : i32
    %1 = vector.broadcast %c8_i32 : i32 to vector<1x128xi32>
    %2 = arith.cmpi slt, %0, %1 : vector<1x128xi32>
    %c0 = arith.constant 0 : index
    %c0_0 = arith.constant 0 : index
    %3 = vector.load %arg1[%c0, %c0_0] : memref<10x128xf32, #tpu.memory_space<vmem>>, vector<1x128xf32>
    %c1 = arith.constant 1 : index
    %c0_1 = arith.constant 0 : index
    %4 = vector.load %arg1[%c1, %c0_1] : memref<10x128xf32, #tpu.memory_space<vmem>>, vector<1x128xf32>
    %c2 = arith.constant 2 : index
    %c0_2 = arith.constant 0 : index
    %5 = vector.load %arg1[%c2, %c0_2] : memref<10x128xf32, #tpu.memory_space<vmem>>, vector<1x128xf32>
    %c3 = arith.constant 3 : index
    %c0_3 = arith.constant 0 : index
    %6 = vector.load %arg1[%c3, %c0_3] : memref<10x128xf32, #tpu.memory_space<vmem>>, vector<1x128xf32>
    %c4 = arith.constant 4 : index
    %c0_4 = arith.constant 0 : index
    %7 = vector.load %arg1[%c4, %c0_4] : memref<10x128xf32, #tpu.memory_space<vmem>>, vector<1x128xf32>
    %c5 = arith.constant 5 : index
    %c0_5 = arith.constant 0 : index
    %8 = vector.load %arg1[%c5, %c0_5] : memref<10x128xf32, #tpu.memory_space<vmem>>, vector<1x128xf32>
    %c6 = arith.constant 6 : index
    %c0_6 = arith.constant 0 : index
    %9 = vector.load %arg1[%c6, %c0_6] : memref<10x128xf32, #tpu.memory_space<vmem>>, vector<1x128xf32>
    %c7 = arith.constant 7 : index
    %c0_7 = arith.constant 0 : index
    %10 = vector.load %arg1[%c7, %c0_7] : memref<10x128xf32, #tpu.memory_space<vmem>>, vector<1x128xf32>
    %c8 = arith.constant 8 : index
    %c0_8 = arith.constant 0 : index
    %11 = vector.load %arg1[%c8, %c0_8] : memref<10x128xf32, #tpu.memory_space<vmem>>, vector<1x128xf32>
    %c9 = arith.constant 9 : index
    %c0_9 = arith.constant 0 : index
    %12 = vector.load %arg1[%c9, %c0_9] : memref<10x128xf32, #tpu.memory_space<vmem>>, vector<1x128xf32>
    %c0_10 = arith.constant 0 : index
    %13 = memref.load %arg0[%c0_10] : memref<256xf32, #tpu.memory_space<smem>>
    %14 = vector.broadcast %13 : f32 to vector<1x128xf32>
    %15 = arith.mulf %14, %3 : vector<1x128xf32>
    %c1_11 = arith.constant 1 : index
    %16 = memref.load %arg0[%c1_11] : memref<256xf32, #tpu.memory_space<smem>>
    %17 = vector.broadcast %16 : f32 to vector<1x128xf32>
    %18 = arith.mulf %17, %4 : vector<1x128xf32>
    %19 = arith.addf %15, %18 : vector<1x128xf32>
    %c2_12 = arith.constant 2 : index
    %20 = memref.load %arg0[%c2_12] : memref<256xf32, #tpu.memory_space<smem>>
    %21 = vector.broadcast %20 : f32 to vector<1x128xf32>
    %22 = arith.mulf %21, %5 : vector<1x128xf32>
    %23 = arith.addf %19, %22 : vector<1x128xf32>
    %c3_13 = arith.constant 3 : index
    %24 = memref.load %arg0[%c3_13] : memref<256xf32, #tpu.memory_space<smem>>
    %25 = vector.broadcast %24 : f32 to vector<1x128xf32>
    %26 = arith.mulf %25, %6 : vector<1x128xf32>
    %27 = arith.addf %23, %26 : vector<1x128xf32>
    %c4_14 = arith.constant 4 : index
    %28 = memref.load %arg0[%c4_14] : memref<256xf32, #tpu.memory_space<smem>>
    %29 = vector.broadcast %28 : f32 to vector<1x128xf32>
    %30 = arith.mulf %29, %7 : vector<1x128xf32>
    %31 = arith.addf %27, %30 : vector<1x128xf32>
    %c5_15 = arith.constant 5 : index
    %32 = memref.load %arg0[%c5_15] : memref<256xf32, #tpu.memory_space<smem>>
    %33 = vector.broadcast %32 : f32 to vector<1x128xf32>
    %34 = arith.mulf %33, %8 : vector<1x128xf32>
    %35 = arith.addf %31, %34 : vector<1x128xf32>
    %c6_16 = arith.constant 6 : index
    %36 = memref.load %arg0[%c6_16] : memref<256xf32, #tpu.memory_space<smem>>
    %37 = vector.broadcast %36 : f32 to vector<1x128xf32>
    %38 = arith.mulf %37, %9 : vector<1x128xf32>
    %39 = arith.addf %35, %38 : vector<1x128xf32>
    %c7_17 = arith.constant 7 : index
    %40 = memref.load %arg0[%c7_17] : memref<256xf32, #tpu.memory_space<smem>>
    %41 = vector.broadcast %40 : f32 to vector<1x128xf32>
    %42 = arith.mulf %41, %10 : vector<1x128xf32>
    %43 = arith.addf %39, %42 : vector<1x128xf32>
    %c8_18 = arith.constant 8 : index
    %44 = memref.load %arg0[%c8_18] : memref<256xf32, #tpu.memory_space<smem>>
    %45 = vector.broadcast %44 : f32 to vector<1x128xf32>
    %46 = arith.mulf %45, %11 : vector<1x128xf32>
    %47 = arith.addf %43, %46 : vector<1x128xf32>
    %c9_19 = arith.constant 9 : index
    %48 = memref.load %arg0[%c9_19] : memref<256xf32, #tpu.memory_space<smem>>
    %49 = vector.broadcast %48 : f32 to vector<1x128xf32>
    %50 = arith.mulf %49, %12 : vector<1x128xf32>
    %51 = arith.addf %47, %50 : vector<1x128xf32>
    %c70 = arith.constant 70 : index
    %52 = memref.load %arg0[%c70] : memref<256xf32, #tpu.memory_space<smem>>
    %53 = vector.broadcast %52 : f32 to vector<1x128xf32>
    %54 = arith.addf %51, %53 : vector<1x128xf32>
    %cst = arith.constant 0.000000e+00 : f32
    %55 = vector.broadcast %cst : f32 to vector<1x128xf32>
    %56 = arith.maximumf %54, %55 : vector<1x128xf32>
    %c10 = arith.constant 10 : index
    %57 = memref.load %arg0[%c10] : memref<256xf32, #tpu.memory_space<smem>>
    %58 = vector.broadcast %57 : f32 to vector<1x128xf32>
    %59 = arith.mulf %58, %3 : vector<1x128xf32>
    %c11 = arith.constant 11 : index
    %60 = memref.load %arg0[%c11] : memref<256xf32, #tpu.memory_space<smem>>
    %61 = vector.broadcast %60 : f32 to vector<1x128xf32>
    %62 = arith.mulf %61, %4 : vector<1x128xf32>
    %63 = arith.addf %59, %62 : vector<1x128xf32>
    %c12 = arith.constant 12 : index
    %64 = memref.load %arg0[%c12] : memref<256xf32, #tpu.memory_space<smem>>
    %65 = vector.broadcast %64 : f32 to vector<1x128xf32>
    %66 = arith.mulf %65, %5 : vector<1x128xf32>
    %67 = arith.addf %63, %66 : vector<1x128xf32>
    %c13 = arith.constant 13 : index
    %68 = memref.load %arg0[%c13] : memref<256xf32, #tpu.memory_space<smem>>
    %69 = vector.broadcast %68 : f32 to vector<1x128xf32>
    %70 = arith.mulf %69, %6 : vector<1x128xf32>
    %71 = arith.addf %67, %70 : vector<1x128xf32>
    %c14 = arith.constant 14 : index
    %72 = memref.load %arg0[%c14] : memref<256xf32, #tpu.memory_space<smem>>
    %73 = vector.broadcast %72 : f32 to vector<1x128xf32>
    %74 = arith.mulf %73, %7 : vector<1x128xf32>
    %75 = arith.addf %71, %74 : vector<1x128xf32>
    %c15 = arith.constant 15 : index
    %76 = memref.load %arg0[%c15] : memref<256xf32, #tpu.memory_space<smem>>
    %77 = vector.broadcast %76 : f32 to vector<1x128xf32>
    %78 = arith.mulf %77, %8 : vector<1x128xf32>
    %79 = arith.addf %75, %78 : vector<1x128xf32>
    %c16 = arith.constant 16 : index
    %80 = memref.load %arg0[%c16] : memref<256xf32, #tpu.memory_space<smem>>
    %81 = vector.broadcast %80 : f32 to vector<1x128xf32>
    %82 = arith.mulf %81, %9 : vector<1x128xf32>
    %83 = arith.addf %79, %82 : vector<1x128xf32>
    %c17 = arith.constant 17 : index
    %84 = memref.load %arg0[%c17] : memref<256xf32, #tpu.memory_space<smem>>
    %85 = vector.broadcast %84 : f32 to vector<1x128xf32>
    %86 = arith.mulf %85, %10 : vector<1x128xf32>
    %87 = arith.addf %83, %86 : vector<1x128xf32>
    %c18 = arith.constant 18 : index
    %88 = memref.load %arg0[%c18] : memref<256xf32, #tpu.memory_space<smem>>
    %89 = vector.broadcast %88 : f32 to vector<1x128xf32>
    %90 = arith.mulf %89, %11 : vector<1x128xf32>
    %91 = arith.addf %87, %90 : vector<1x128xf32>
    %c19 = arith.constant 19 : index
    %92 = memref.load %arg0[%c19] : memref<256xf32, #tpu.memory_space<smem>>
    %93 = vector.broadcast %92 : f32 to vector<1x128xf32>
    %94 = arith.mulf %93, %12 : vector<1x128xf32>
    %95 = arith.addf %91, %94 : vector<1x128xf32>
    %c71 = arith.constant 71 : index
    %96 = memref.load %arg0[%c71] : memref<256xf32, #tpu.memory_space<smem>>
    %97 = vector.broadcast %96 : f32 to vector<1x128xf32>
    %98 = arith.addf %95, %97 : vector<1x128xf32>
    %cst_20 = arith.constant 0.000000e+00 : f32
    %99 = vector.broadcast %cst_20 : f32 to vector<1x128xf32>
    %100 = arith.maximumf %98, %99 : vector<1x128xf32>
    %c20 = arith.constant 20 : index
    %101 = memref.load %arg0[%c20] : memref<256xf32, #tpu.memory_space<smem>>
    %102 = vector.broadcast %101 : f32 to vector<1x128xf32>
    %103 = arith.mulf %102, %3 : vector<1x128xf32>
    %c21 = arith.constant 21 : index
    %104 = memref.load %arg0[%c21] : memref<256xf32, #tpu.memory_space<smem>>
    %105 = vector.broadcast %104 : f32 to vector<1x128xf32>
    %106 = arith.mulf %105, %4 : vector<1x128xf32>
    %107 = arith.addf %103, %106 : vector<1x128xf32>
    %c22 = arith.constant 22 : index
    %108 = memref.load %arg0[%c22] : memref<256xf32, #tpu.memory_space<smem>>
    %109 = vector.broadcast %108 : f32 to vector<1x128xf32>
    %110 = arith.mulf %109, %5 : vector<1x128xf32>
    %111 = arith.addf %107, %110 : vector<1x128xf32>
    %c23 = arith.constant 23 : index
    %112 = memref.load %arg0[%c23] : memref<256xf32, #tpu.memory_space<smem>>
    %113 = vector.broadcast %112 : f32 to vector<1x128xf32>
    %114 = arith.mulf %113, %6 : vector<1x128xf32>
    %115 = arith.addf %111, %114 : vector<1x128xf32>
    %c24 = arith.constant 24 : index
    %116 = memref.load %arg0[%c24] : memref<256xf32, #tpu.memory_space<smem>>
    %117 = vector.broadcast %116 : f32 to vector<1x128xf32>
    %118 = arith.mulf %117, %7 : vector<1x128xf32>
    %119 = arith.addf %115, %118 : vector<1x128xf32>
    %c25 = arith.constant 25 : index
    %120 = memref.load %arg0[%c25] : memref<256xf32, #tpu.memory_space<smem>>
    %121 = vector.broadcast %120 : f32 to vector<1x128xf32>
    %122 = arith.mulf %121, %8 : vector<1x128xf32>
    %123 = arith.addf %119, %122 : vector<1x128xf32>
    %c26 = arith.constant 26 : index
    %124 = memref.load %arg0[%c26] : memref<256xf32, #tpu.memory_space<smem>>
    %125 = vector.broadcast %124 : f32 to vector<1x128xf32>
    %126 = arith.mulf %125, %9 : vector<1x128xf32>
    %127 = arith.addf %123, %126 : vector<1x128xf32>
    %c27 = arith.constant 27 : index
    %128 = memref.load %arg0[%c27] : memref<256xf32, #tpu.memory_space<smem>>
    %129 = vector.broadcast %128 : f32 to vector<1x128xf32>
    %130 = arith.mulf %129, %10 : vector<1x128xf32>
    %131 = arith.addf %127, %130 : vector<1x128xf32>
    %c28 = arith.constant 28 : index
    %132 = memref.load %arg0[%c28] : memref<256xf32, #tpu.memory_space<smem>>
    %133 = vector.broadcast %132 : f32 to vector<1x128xf32>
    %134 = arith.mulf %133, %11 : vector<1x128xf32>
    %135 = arith.addf %131, %134 : vector<1x128xf32>
    %c29 = arith.constant 29 : index
    %136 = memref.load %arg0[%c29] : memref<256xf32, #tpu.memory_space<smem>>
    %137 = vector.broadcast %136 : f32 to vector<1x128xf32>
    %138 = arith.mulf %137, %12 : vector<1x128xf32>
    %139 = arith.addf %135, %138 : vector<1x128xf32>
    %c72 = arith.constant 72 : index
    %140 = memref.load %arg0[%c72] : memref<256xf32, #tpu.memory_space<smem>>
    %141 = vector.broadcast %140 : f32 to vector<1x128xf32>
    %142 = arith.addf %139, %141 : vector<1x128xf32>
    %cst_21 = arith.constant 0.000000e+00 : f32
    %143 = vector.broadcast %cst_21 : f32 to vector<1x128xf32>
    %144 = arith.maximumf %142, %143 : vector<1x128xf32>
    %c30 = arith.constant 30 : index
    %145 = memref.load %arg0[%c30] : memref<256xf32, #tpu.memory_space<smem>>
    %146 = vector.broadcast %145 : f32 to vector<1x128xf32>
    %147 = arith.mulf %146, %3 : vector<1x128xf32>
    %c31 = arith.constant 31 : index
    %148 = memref.load %arg0[%c31] : memref<256xf32, #tpu.memory_space<smem>>
    %149 = vector.broadcast %148 : f32 to vector<1x128xf32>
    %150 = arith.mulf %149, %4 : vector<1x128xf32>
    %151 = arith.addf %147, %150 : vector<1x128xf32>
    %c32 = arith.constant 32 : index
    %152 = memref.load %arg0[%c32] : memref<256xf32, #tpu.memory_space<smem>>
    %153 = vector.broadcast %152 : f32 to vector<1x128xf32>
    %154 = arith.mulf %153, %5 : vector<1x128xf32>
    %155 = arith.addf %151, %154 : vector<1x128xf32>
    %c33 = arith.constant 33 : index
    %156 = memref.load %arg0[%c33] : memref<256xf32, #tpu.memory_space<smem>>
    %157 = vector.broadcast %156 : f32 to vector<1x128xf32>
    %158 = arith.mulf %157, %6 : vector<1x128xf32>
    %159 = arith.addf %155, %158 : vector<1x128xf32>
    %c34 = arith.constant 34 : index
    %160 = memref.load %arg0[%c34] : memref<256xf32, #tpu.memory_space<smem>>
    %161 = vector.broadcast %160 : f32 to vector<1x128xf32>
    %162 = arith.mulf %161, %7 : vector<1x128xf32>
    %163 = arith.addf %159, %162 : vector<1x128xf32>
    %c35 = arith.constant 35 : index
    %164 = memref.load %arg0[%c35] : memref<256xf32, #tpu.memory_space<smem>>
    %165 = vector.broadcast %164 : f32 to vector<1x128xf32>
    %166 = arith.mulf %165, %8 : vector<1x128xf32>
    %167 = arith.addf %163, %166 : vector<1x128xf32>
    %c36 = arith.constant 36 : index
    %168 = memref.load %arg0[%c36] : memref<256xf32, #tpu.memory_space<smem>>
    %169 = vector.broadcast %168 : f32 to vector<1x128xf32>
    %170 = arith.mulf %169, %9 : vector<1x128xf32>
    %171 = arith.addf %167, %170 : vector<1x128xf32>
    %c37 = arith.constant 37 : index
    %172 = memref.load %arg0[%c37] : memref<256xf32, #tpu.memory_space<smem>>
    %173 = vector.broadcast %172 : f32 to vector<1x128xf32>
    %174 = arith.mulf %173, %10 : vector<1x128xf32>
    %175 = arith.addf %171, %174 : vector<1x128xf32>
    %c38 = arith.constant 38 : index
    %176 = memref.load %arg0[%c38] : memref<256xf32, #tpu.memory_space<smem>>
    %177 = vector.broadcast %176 : f32 to vector<1x128xf32>
    %178 = arith.mulf %177, %11 : vector<1x128xf32>
    %179 = arith.addf %175, %178 : vector<1x128xf32>
    %c39 = arith.constant 39 : index
    %180 = memref.load %arg0[%c39] : memref<256xf32, #tpu.memory_space<smem>>
    %181 = vector.broadcast %180 : f32 to vector<1x128xf32>
    %182 = arith.mulf %181, %12 : vector<1x128xf32>
    %183 = arith.addf %179, %182 : vector<1x128xf32>
    %c73 = arith.constant 73 : index
    %184 = memref.load %arg0[%c73] : memref<256xf32, #tpu.memory_space<smem>>
    %185 = vector.broadcast %184 : f32 to vector<1x128xf32>
    %186 = arith.addf %183, %185 : vector<1x128xf32>
    %cst_22 = arith.constant 0.000000e+00 : f32
    %187 = vector.broadcast %cst_22 : f32 to vector<1x128xf32>
    %188 = arith.maximumf %186, %187 : vector<1x128xf32>
    %c40 = arith.constant 40 : index
    %189 = memref.load %arg0[%c40] : memref<256xf32, #tpu.memory_space<smem>>
    %190 = vector.broadcast %189 : f32 to vector<1x128xf32>
    %191 = arith.mulf %190, %3 : vector<1x128xf32>
    %c41 = arith.constant 41 : index
    %192 = memref.load %arg0[%c41] : memref<256xf32, #tpu.memory_space<smem>>
    %193 = vector.broadcast %192 : f32 to vector<1x128xf32>
    %194 = arith.mulf %193, %4 : vector<1x128xf32>
    %195 = arith.addf %191, %194 : vector<1x128xf32>
    %c42 = arith.constant 42 : index
    %196 = memref.load %arg0[%c42] : memref<256xf32, #tpu.memory_space<smem>>
    %197 = vector.broadcast %196 : f32 to vector<1x128xf32>
    %198 = arith.mulf %197, %5 : vector<1x128xf32>
    %199 = arith.addf %195, %198 : vector<1x128xf32>
    %c43 = arith.constant 43 : index
    %200 = memref.load %arg0[%c43] : memref<256xf32, #tpu.memory_space<smem>>
    %201 = vector.broadcast %200 : f32 to vector<1x128xf32>
    %202 = arith.mulf %201, %6 : vector<1x128xf32>
    %203 = arith.addf %199, %202 : vector<1x128xf32>
    %c44 = arith.constant 44 : index
    %204 = memref.load %arg0[%c44] : memref<256xf32, #tpu.memory_space<smem>>
    %205 = vector.broadcast %204 : f32 to vector<1x128xf32>
    %206 = arith.mulf %205, %7 : vector<1x128xf32>
    %207 = arith.addf %203, %206 : vector<1x128xf32>
    %c45 = arith.constant 45 : index
    %208 = memref.load %arg0[%c45] : memref<256xf32, #tpu.memory_space<smem>>
    %209 = vector.broadcast %208 : f32 to vector<1x128xf32>
    %210 = arith.mulf %209, %8 : vector<1x128xf32>
    %211 = arith.addf %207, %210 : vector<1x128xf32>
    %c46 = arith.constant 46 : index
    %212 = memref.load %arg0[%c46] : memref<256xf32, #tpu.memory_space<smem>>
    %213 = vector.broadcast %212 : f32 to vector<1x128xf32>
    %214 = arith.mulf %213, %9 : vector<1x128xf32>
    %215 = arith.addf %211, %214 : vector<1x128xf32>
    %c47 = arith.constant 47 : index
    %216 = memref.load %arg0[%c47] : memref<256xf32, #tpu.memory_space<smem>>
    %217 = vector.broadcast %216 : f32 to vector<1x128xf32>
    %218 = arith.mulf %217, %10 : vector<1x128xf32>
    %219 = arith.addf %215, %218 : vector<1x128xf32>
    %c48 = arith.constant 48 : index
    %220 = memref.load %arg0[%c48] : memref<256xf32, #tpu.memory_space<smem>>
    %221 = vector.broadcast %220 : f32 to vector<1x128xf32>
    %222 = arith.mulf %221, %11 : vector<1x128xf32>
    %223 = arith.addf %219, %222 : vector<1x128xf32>
    %c49 = arith.constant 49 : index
    %224 = memref.load %arg0[%c49] : memref<256xf32, #tpu.memory_space<smem>>
    %225 = vector.broadcast %224 : f32 to vector<1x128xf32>
    %226 = arith.mulf %225, %12 : vector<1x128xf32>
    %227 = arith.addf %223, %226 : vector<1x128xf32>
    %c74 = arith.constant 74 : index
    %228 = memref.load %arg0[%c74] : memref<256xf32, #tpu.memory_space<smem>>
    %229 = vector.broadcast %228 : f32 to vector<1x128xf32>
    %230 = arith.addf %227, %229 : vector<1x128xf32>
    %cst_23 = arith.constant 0.000000e+00 : f32
    %231 = vector.broadcast %cst_23 : f32 to vector<1x128xf32>
    %232 = arith.maximumf %230, %231 : vector<1x128xf32>
    %c50 = arith.constant 50 : index
    %233 = memref.load %arg0[%c50] : memref<256xf32, #tpu.memory_space<smem>>
    %234 = vector.broadcast %233 : f32 to vector<1x128xf32>
    %235 = arith.mulf %234, %3 : vector<1x128xf32>
    %c51 = arith.constant 51 : index
    %236 = memref.load %arg0[%c51] : memref<256xf32, #tpu.memory_space<smem>>
    %237 = vector.broadcast %236 : f32 to vector<1x128xf32>
    %238 = arith.mulf %237, %4 : vector<1x128xf32>
    %239 = arith.addf %235, %238 : vector<1x128xf32>
    %c52 = arith.constant 52 : index
    %240 = memref.load %arg0[%c52] : memref<256xf32, #tpu.memory_space<smem>>
    %241 = vector.broadcast %240 : f32 to vector<1x128xf32>
    %242 = arith.mulf %241, %5 : vector<1x128xf32>
    %243 = arith.addf %239, %242 : vector<1x128xf32>
    %c53 = arith.constant 53 : index
    %244 = memref.load %arg0[%c53] : memref<256xf32, #tpu.memory_space<smem>>
    %245 = vector.broadcast %244 : f32 to vector<1x128xf32>
    %246 = arith.mulf %245, %6 : vector<1x128xf32>
    %247 = arith.addf %243, %246 : vector<1x128xf32>
    %c54 = arith.constant 54 : index
    %248 = memref.load %arg0[%c54] : memref<256xf32, #tpu.memory_space<smem>>
    %249 = vector.broadcast %248 : f32 to vector<1x128xf32>
    %250 = arith.mulf %249, %7 : vector<1x128xf32>
    %251 = arith.addf %247, %250 : vector<1x128xf32>
    %c55 = arith.constant 55 : index
    %252 = memref.load %arg0[%c55] : memref<256xf32, #tpu.memory_space<smem>>
    %253 = vector.broadcast %252 : f32 to vector<1x128xf32>
    %254 = arith.mulf %253, %8 : vector<1x128xf32>
    %255 = arith.addf %251, %254 : vector<1x128xf32>
    %c56 = arith.constant 56 : index
    %256 = memref.load %arg0[%c56] : memref<256xf32, #tpu.memory_space<smem>>
    %257 = vector.broadcast %256 : f32 to vector<1x128xf32>
    %258 = arith.mulf %257, %9 : vector<1x128xf32>
    %259 = arith.addf %255, %258 : vector<1x128xf32>
    %c57 = arith.constant 57 : index
    %260 = memref.load %arg0[%c57] : memref<256xf32, #tpu.memory_space<smem>>
    %261 = vector.broadcast %260 : f32 to vector<1x128xf32>
    %262 = arith.mulf %261, %10 : vector<1x128xf32>
    %263 = arith.addf %259, %262 : vector<1x128xf32>
    %c58 = arith.constant 58 : index
    %264 = memref.load %arg0[%c58] : memref<256xf32, #tpu.memory_space<smem>>
    %265 = vector.broadcast %264 : f32 to vector<1x128xf32>
    %266 = arith.mulf %265, %11 : vector<1x128xf32>
    %267 = arith.addf %263, %266 : vector<1x128xf32>
    %c59 = arith.constant 59 : index
    %268 = memref.load %arg0[%c59] : memref<256xf32, #tpu.memory_space<smem>>
    %269 = vector.broadcast %268 : f32 to vector<1x128xf32>
    %270 = arith.mulf %269, %12 : vector<1x128xf32>
    %271 = arith.addf %267, %270 : vector<1x128xf32>
    %c75 = arith.constant 75 : index
    %272 = memref.load %arg0[%c75] : memref<256xf32, #tpu.memory_space<smem>>
    %273 = vector.broadcast %272 : f32 to vector<1x128xf32>
    %274 = arith.addf %271, %273 : vector<1x128xf32>
    %cst_24 = arith.constant 0.000000e+00 : f32
    %275 = vector.broadcast %cst_24 : f32 to vector<1x128xf32>
    %276 = arith.maximumf %274, %275 : vector<1x128xf32>
    %c60 = arith.constant 60 : index
    %277 = memref.load %arg0[%c60] : memref<256xf32, #tpu.memory_space<smem>>
    %278 = vector.broadcast %277 : f32 to vector<1x128xf32>
    %279 = arith.mulf %278, %3 : vector<1x128xf32>
    %c61 = arith.constant 61 : index
    %280 = memref.load %arg0[%c61] : memref<256xf32, #tpu.memory_space<smem>>
    %281 = vector.broadcast %280 : f32 to vector<1x128xf32>
    %282 = arith.mulf %281, %4 : vector<1x128xf32>
    %283 = arith.addf %279, %282 : vector<1x128xf32>
    %c62 = arith.constant 62 : index
    %284 = memref.load %arg0[%c62] : memref<256xf32, #tpu.memory_space<smem>>
    %285 = vector.broadcast %284 : f32 to vector<1x128xf32>
    %286 = arith.mulf %285, %5 : vector<1x128xf32>
    %287 = arith.addf %283, %286 : vector<1x128xf32>
    %c63 = arith.constant 63 : index
    %288 = memref.load %arg0[%c63] : memref<256xf32, #tpu.memory_space<smem>>
    %289 = vector.broadcast %288 : f32 to vector<1x128xf32>
    %290 = arith.mulf %289, %6 : vector<1x128xf32>
    %291 = arith.addf %287, %290 : vector<1x128xf32>
    %c64 = arith.constant 64 : index
    %292 = memref.load %arg0[%c64] : memref<256xf32, #tpu.memory_space<smem>>
    %293 = vector.broadcast %292 : f32 to vector<1x128xf32>
    %294 = arith.mulf %293, %7 : vector<1x128xf32>
    %295 = arith.addf %291, %294 : vector<1x128xf32>
    %c65 = arith.constant 65 : index
    %296 = memref.load %arg0[%c65] : memref<256xf32, #tpu.memory_space<smem>>
    %297 = vector.broadcast %296 : f32 to vector<1x128xf32>
    %298 = arith.mulf %297, %8 : vector<1x128xf32>
    %299 = arith.addf %295, %298 : vector<1x128xf32>
    %c66 = arith.constant 66 : index
    %300 = memref.load %arg0[%c66] : memref<256xf32, #tpu.memory_space<smem>>
    %301 = vector.broadcast %300 : f32 to vector<1x128xf32>
    %302 = arith.mulf %301, %9 : vector<1x128xf32>
    %303 = arith.addf %299, %302 : vector<1x128xf32>
    %c67 = arith.constant 67 : index
    %304 = memref.load %arg0[%c67] : memref<256xf32, #tpu.memory_space<smem>>
    %305 = vector.broadcast %304 : f32 to vector<1x128xf32>
    %306 = arith.mulf %305, %10 : vector<1x128xf32>
    %307 = arith.addf %303, %306 : vector<1x128xf32>
    %c68 = arith.constant 68 : index
    %308 = memref.load %arg0[%c68] : memref<256xf32, #tpu.memory_space<smem>>
    %309 = vector.broadcast %308 : f32 to vector<1x128xf32>
    %310 = arith.mulf %309, %11 : vector<1x128xf32>
    %311 = arith.addf %307, %310 : vector<1x128xf32>
    %c69 = arith.constant 69 : index
    %312 = memref.load %arg0[%c69] : memref<256xf32, #tpu.memory_space<smem>>
    %313 = vector.broadcast %312 : f32 to vector<1x128xf32>
    %314 = arith.mulf %313, %12 : vector<1x128xf32>
    %315 = arith.addf %311, %314 : vector<1x128xf32>
    %c76 = arith.constant 76 : index
    %316 = memref.load %arg0[%c76] : memref<256xf32, #tpu.memory_space<smem>>
    %317 = vector.broadcast %316 : f32 to vector<1x128xf32>
    %318 = arith.addf %315, %317 : vector<1x128xf32>
    %cst_25 = arith.constant 0.000000e+00 : f32
    %319 = vector.broadcast %cst_25 : f32 to vector<1x128xf32>
    %320 = arith.maximumf %318, %319 : vector<1x128xf32>
    %c77 = arith.constant 77 : index
    %321 = memref.load %arg0[%c77] : memref<256xf32, #tpu.memory_space<smem>>
    %322 = vector.broadcast %321 : f32 to vector<1x128xf32>
    %323 = arith.mulf %322, %56 : vector<1x128xf32>
    %c78 = arith.constant 78 : index
    %324 = memref.load %arg0[%c78] : memref<256xf32, #tpu.memory_space<smem>>
    %325 = vector.broadcast %324 : f32 to vector<1x128xf32>
    %326 = arith.mulf %325, %100 : vector<1x128xf32>
    %327 = arith.addf %323, %326 : vector<1x128xf32>
    %c79 = arith.constant 79 : index
    %328 = memref.load %arg0[%c79] : memref<256xf32, #tpu.memory_space<smem>>
    %329 = vector.broadcast %328 : f32 to vector<1x128xf32>
    %330 = arith.mulf %329, %144 : vector<1x128xf32>
    %331 = arith.addf %327, %330 : vector<1x128xf32>
    %c80 = arith.constant 80 : index
    %332 = memref.load %arg0[%c80] : memref<256xf32, #tpu.memory_space<smem>>
    %333 = vector.broadcast %332 : f32 to vector<1x128xf32>
    %334 = arith.mulf %333, %188 : vector<1x128xf32>
    %335 = arith.addf %331, %334 : vector<1x128xf32>
    %c81 = arith.constant 81 : index
    %336 = memref.load %arg0[%c81] : memref<256xf32, #tpu.memory_space<smem>>
    %337 = vector.broadcast %336 : f32 to vector<1x128xf32>
    %338 = arith.mulf %337, %232 : vector<1x128xf32>
    %339 = arith.addf %335, %338 : vector<1x128xf32>
    %c82 = arith.constant 82 : index
    %340 = memref.load %arg0[%c82] : memref<256xf32, #tpu.memory_space<smem>>
    %341 = vector.broadcast %340 : f32 to vector<1x128xf32>
    %342 = arith.mulf %341, %276 : vector<1x128xf32>
    %343 = arith.addf %339, %342 : vector<1x128xf32>
    %c83 = arith.constant 83 : index
    %344 = memref.load %arg0[%c83] : memref<256xf32, #tpu.memory_space<smem>>
    %345 = vector.broadcast %344 : f32 to vector<1x128xf32>
    %346 = arith.mulf %345, %320 : vector<1x128xf32>
    %347 = arith.addf %343, %346 : vector<1x128xf32>
    %c105 = arith.constant 105 : index
    %348 = memref.load %arg0[%c105] : memref<256xf32, #tpu.memory_space<smem>>
    %349 = vector.broadcast %348 : f32 to vector<1x128xf32>
    %350 = arith.addf %347, %349 : vector<1x128xf32>
    %c84 = arith.constant 84 : index
    %351 = memref.load %arg0[%c84] : memref<256xf32, #tpu.memory_space<smem>>
    %352 = vector.broadcast %351 : f32 to vector<1x128xf32>
    %353 = arith.mulf %352, %56 : vector<1x128xf32>
    %c85 = arith.constant 85 : index
    %354 = memref.load %arg0[%c85] : memref<256xf32, #tpu.memory_space<smem>>
    %355 = vector.broadcast %354 : f32 to vector<1x128xf32>
    %356 = arith.mulf %355, %100 : vector<1x128xf32>
    %357 = arith.addf %353, %356 : vector<1x128xf32>
    %c86 = arith.constant 86 : index
    %358 = memref.load %arg0[%c86] : memref<256xf32, #tpu.memory_space<smem>>
    %359 = vector.broadcast %358 : f32 to vector<1x128xf32>
    %360 = arith.mulf %359, %144 : vector<1x128xf32>
    %361 = arith.addf %357, %360 : vector<1x128xf32>
    %c87 = arith.constant 87 : index
    %362 = memref.load %arg0[%c87] : memref<256xf32, #tpu.memory_space<smem>>
    %363 = vector.broadcast %362 : f32 to vector<1x128xf32>
    %364 = arith.mulf %363, %188 : vector<1x128xf32>
    %365 = arith.addf %361, %364 : vector<1x128xf32>
    %c88 = arith.constant 88 : index
    %366 = memref.load %arg0[%c88] : memref<256xf32, #tpu.memory_space<smem>>
    %367 = vector.broadcast %366 : f32 to vector<1x128xf32>
    %368 = arith.mulf %367, %232 : vector<1x128xf32>
    %369 = arith.addf %365, %368 : vector<1x128xf32>
    %c89 = arith.constant 89 : index
    %370 = memref.load %arg0[%c89] : memref<256xf32, #tpu.memory_space<smem>>
    %371 = vector.broadcast %370 : f32 to vector<1x128xf32>
    %372 = arith.mulf %371, %276 : vector<1x128xf32>
    %373 = arith.addf %369, %372 : vector<1x128xf32>
    %c90 = arith.constant 90 : index
    %374 = memref.load %arg0[%c90] : memref<256xf32, #tpu.memory_space<smem>>
    %375 = vector.broadcast %374 : f32 to vector<1x128xf32>
    %376 = arith.mulf %375, %320 : vector<1x128xf32>
    %377 = arith.addf %373, %376 : vector<1x128xf32>
    %c106 = arith.constant 106 : index
    %378 = memref.load %arg0[%c106] : memref<256xf32, #tpu.memory_space<smem>>
    %379 = vector.broadcast %378 : f32 to vector<1x128xf32>
    %380 = arith.addf %377, %379 : vector<1x128xf32>
    %c91 = arith.constant 91 : index
    %381 = memref.load %arg0[%c91] : memref<256xf32, #tpu.memory_space<smem>>
    %382 = vector.broadcast %381 : f32 to vector<1x128xf32>
    %383 = arith.mulf %382, %56 : vector<1x128xf32>
    %c92 = arith.constant 92 : index
    %384 = memref.load %arg0[%c92] : memref<256xf32, #tpu.memory_space<smem>>
    %385 = vector.broadcast %384 : f32 to vector<1x128xf32>
    %386 = arith.mulf %385, %100 : vector<1x128xf32>
    %387 = arith.addf %383, %386 : vector<1x128xf32>
    %c93 = arith.constant 93 : index
    %388 = memref.load %arg0[%c93] : memref<256xf32, #tpu.memory_space<smem>>
    %389 = vector.broadcast %388 : f32 to vector<1x128xf32>
    %390 = arith.mulf %389, %144 : vector<1x128xf32>
    %391 = arith.addf %387, %390 : vector<1x128xf32>
    %c94 = arith.constant 94 : index
    %392 = memref.load %arg0[%c94] : memref<256xf32, #tpu.memory_space<smem>>
    %393 = vector.broadcast %392 : f32 to vector<1x128xf32>
    %394 = arith.mulf %393, %188 : vector<1x128xf32>
    %395 = arith.addf %391, %394 : vector<1x128xf32>
    %c95 = arith.constant 95 : index
    %396 = memref.load %arg0[%c95] : memref<256xf32, #tpu.memory_space<smem>>
    %397 = vector.broadcast %396 : f32 to vector<1x128xf32>
    %398 = arith.mulf %397, %232 : vector<1x128xf32>
    %399 = arith.addf %395, %398 : vector<1x128xf32>
    %c96 = arith.constant 96 : index
    %400 = memref.load %arg0[%c96] : memref<256xf32, #tpu.memory_space<smem>>
    %401 = vector.broadcast %400 : f32 to vector<1x128xf32>
    %402 = arith.mulf %401, %276 : vector<1x128xf32>
    %403 = arith.addf %399, %402 : vector<1x128xf32>
    %c97 = arith.constant 97 : index
    %404 = memref.load %arg0[%c97] : memref<256xf32, #tpu.memory_space<smem>>
    %405 = vector.broadcast %404 : f32 to vector<1x128xf32>
    %406 = arith.mulf %405, %320 : vector<1x128xf32>
    %407 = arith.addf %403, %406 : vector<1x128xf32>
    %c107 = arith.constant 107 : index
    %408 = memref.load %arg0[%c107] : memref<256xf32, #tpu.memory_space<smem>>
    %409 = vector.broadcast %408 : f32 to vector<1x128xf32>
    %410 = arith.addf %407, %409 : vector<1x128xf32>
    %c98 = arith.constant 98 : index
    %411 = memref.load %arg0[%c98] : memref<256xf32, #tpu.memory_space<smem>>
    %412 = vector.broadcast %411 : f32 to vector<1x128xf32>
    %413 = arith.mulf %412, %56 : vector<1x128xf32>
    %c99 = arith.constant 99 : index
    %414 = memref.load %arg0[%c99] : memref<256xf32, #tpu.memory_space<smem>>
    %415 = vector.broadcast %414 : f32 to vector<1x128xf32>
    %416 = arith.mulf %415, %100 : vector<1x128xf32>
    %417 = arith.addf %413, %416 : vector<1x128xf32>
    %c100 = arith.constant 100 : index
    %418 = memref.load %arg0[%c100] : memref<256xf32, #tpu.memory_space<smem>>
    %419 = vector.broadcast %418 : f32 to vector<1x128xf32>
    %420 = arith.mulf %419, %144 : vector<1x128xf32>
    %421 = arith.addf %417, %420 : vector<1x128xf32>
    %c101 = arith.constant 101 : index
    %422 = memref.load %arg0[%c101] : memref<256xf32, #tpu.memory_space<smem>>
    %423 = vector.broadcast %422 : f32 to vector<1x128xf32>
    %424 = arith.mulf %423, %188 : vector<1x128xf32>
    %425 = arith.addf %421, %424 : vector<1x128xf32>
    %c102 = arith.constant 102 : index
    %426 = memref.load %arg0[%c102] : memref<256xf32, #tpu.memory_space<smem>>
    %427 = vector.broadcast %426 : f32 to vector<1x128xf32>
    %428 = arith.mulf %427, %232 : vector<1x128xf32>
    %429 = arith.addf %425, %428 : vector<1x128xf32>
    %c103 = arith.constant 103 : index
    %430 = memref.load %arg0[%c103] : memref<256xf32, #tpu.memory_space<smem>>
    %431 = vector.broadcast %430 : f32 to vector<1x128xf32>
    %432 = arith.mulf %431, %276 : vector<1x128xf32>
    %433 = arith.addf %429, %432 : vector<1x128xf32>
    %c104 = arith.constant 104 : index
    %434 = memref.load %arg0[%c104] : memref<256xf32, #tpu.memory_space<smem>>
    %435 = vector.broadcast %434 : f32 to vector<1x128xf32>
    %436 = arith.mulf %435, %320 : vector<1x128xf32>
    %437 = arith.addf %433, %436 : vector<1x128xf32>
    %c108 = arith.constant 108 : index
    %438 = memref.load %arg0[%c108] : memref<256xf32, #tpu.memory_space<smem>>
    %439 = vector.broadcast %438 : f32 to vector<1x128xf32>
    %440 = arith.addf %437, %439 : vector<1x128xf32>
    %cst_26 = arith.constant 0.000000e+00 : f32
    %441 = vector.broadcast %cst_26 : f32 to vector<1x128xf32>
    %442 = arith.select %2, %350, %441 : vector<1x128xi1>, vector<1x128xf32>
    %cst_27 = arith.constant dense<0.000000e+00> : vector<1xf32>
    %443 = vector.multi_reduction <add>, %442, %cst_27 [1] : vector<1x128xf32> to vector<1xf32>
    %444 = vector.shape_cast %443 : vector<1xf32> to vector<1x1xf32>
    %cst_28 = arith.constant 1.250000e-01 : f32
    %445 = vector.broadcast %cst_28 : f32 to vector<1x1xf32>
    %446 = arith.mulf %444, %445 : vector<1x1xf32>
    %447 = arith.mulf %442, %442 : vector<1x128xf32>
    %cst_29 = arith.constant dense<0.000000e+00> : vector<1xf32>
    %448 = vector.multi_reduction <add>, %447, %cst_29 [1] : vector<1x128xf32> to vector<1xf32>
    %449 = vector.shape_cast %448 : vector<1xf32> to vector<1x1xf32>
    %cst_30 = arith.constant 1.250000e-01 : f32
    %450 = vector.broadcast %cst_30 : f32 to vector<1x1xf32>
    %451 = arith.mulf %449, %450 : vector<1x1xf32>
    %452 = arith.mulf %446, %446 : vector<1x1xf32>
    %453 = arith.subf %451, %452 : vector<1x1xf32>
    %cst_31 = arith.constant 9.99999974E-6 : f32
    %454 = vector.broadcast %cst_31 : f32 to vector<1x1xf32>
    %455 = arith.addf %453, %454 : vector<1x1xf32>
    %456 = math.rsqrt %455 : vector<1x1xf32>
    %c109 = arith.constant 109 : index
    %457 = memref.load %arg0[%c109] : memref<256xf32, #tpu.memory_space<smem>>
    %458 = vector.broadcast %457 : f32 to vector<1x1xf32>
    %459 = arith.mulf %456, %458 : vector<1x1xf32>
    %460 = vector.broadcast %446 : vector<1x1xf32> to vector<1x128xf32>
    %461 = arith.subf %350, %460 : vector<1x128xf32>
    %462 = vector.broadcast %459 : vector<1x1xf32> to vector<1x128xf32>
    %463 = arith.mulf %461, %462 : vector<1x128xf32>
    %c113 = arith.constant 113 : index
    %464 = memref.load %arg0[%c113] : memref<256xf32, #tpu.memory_space<smem>>
    %465 = vector.broadcast %464 : f32 to vector<1x128xf32>
    %466 = arith.addf %463, %465 : vector<1x128xf32>
    %cst_32 = arith.constant 0.000000e+00 : f32
    %467 = vector.broadcast %cst_32 : f32 to vector<1x128xf32>
    %468 = arith.select %2, %380, %467 : vector<1x128xi1>, vector<1x128xf32>
    %cst_33 = arith.constant dense<0.000000e+00> : vector<1xf32>
    %469 = vector.multi_reduction <add>, %468, %cst_33 [1] : vector<1x128xf32> to vector<1xf32>
    %470 = vector.shape_cast %469 : vector<1xf32> to vector<1x1xf32>
    %cst_34 = arith.constant 1.250000e-01 : f32
    %471 = vector.broadcast %cst_34 : f32 to vector<1x1xf32>
    %472 = arith.mulf %470, %471 : vector<1x1xf32>
    %473 = arith.mulf %468, %468 : vector<1x128xf32>
    %cst_35 = arith.constant dense<0.000000e+00> : vector<1xf32>
    %474 = vector.multi_reduction <add>, %473, %cst_35 [1] : vector<1x128xf32> to vector<1xf32>
    %475 = vector.shape_cast %474 : vector<1xf32> to vector<1x1xf32>
    %cst_36 = arith.constant 1.250000e-01 : f32
    %476 = vector.broadcast %cst_36 : f32 to vector<1x1xf32>
    %477 = arith.mulf %475, %476 : vector<1x1xf32>
    %478 = arith.mulf %472, %472 : vector<1x1xf32>
    %479 = arith.subf %477, %478 : vector<1x1xf32>
    %cst_37 = arith.constant 9.99999974E-6 : f32
    %480 = vector.broadcast %cst_37 : f32 to vector<1x1xf32>
    %481 = arith.addf %479, %480 : vector<1x1xf32>
    %482 = math.rsqrt %481 : vector<1x1xf32>
    %c110 = arith.constant 110 : index
    %483 = memref.load %arg0[%c110] : memref<256xf32, #tpu.memory_space<smem>>
    %484 = vector.broadcast %483 : f32 to vector<1x1xf32>
    %485 = arith.mulf %482, %484 : vector<1x1xf32>
    %486 = vector.broadcast %472 : vector<1x1xf32> to vector<1x128xf32>
    %487 = arith.subf %380, %486 : vector<1x128xf32>
    %488 = vector.broadcast %485 : vector<1x1xf32> to vector<1x128xf32>
    %489 = arith.mulf %487, %488 : vector<1x128xf32>
    %c114 = arith.constant 114 : index
    %490 = memref.load %arg0[%c114] : memref<256xf32, #tpu.memory_space<smem>>
    %491 = vector.broadcast %490 : f32 to vector<1x128xf32>
    %492 = arith.addf %489, %491 : vector<1x128xf32>
    %cst_38 = arith.constant 0.000000e+00 : f32
    %493 = vector.broadcast %cst_38 : f32 to vector<1x128xf32>
    %494 = arith.select %2, %410, %493 : vector<1x128xi1>, vector<1x128xf32>
    %cst_39 = arith.constant dense<0.000000e+00> : vector<1xf32>
    %495 = vector.multi_reduction <add>, %494, %cst_39 [1] : vector<1x128xf32> to vector<1xf32>
    %496 = vector.shape_cast %495 : vector<1xf32> to vector<1x1xf32>
    %cst_40 = arith.constant 1.250000e-01 : f32
    %497 = vector.broadcast %cst_40 : f32 to vector<1x1xf32>
    %498 = arith.mulf %496, %497 : vector<1x1xf32>
    %499 = arith.mulf %494, %494 : vector<1x128xf32>
    %cst_41 = arith.constant dense<0.000000e+00> : vector<1xf32>
    %500 = vector.multi_reduction <add>, %499, %cst_41 [1] : vector<1x128xf32> to vector<1xf32>
    %501 = vector.shape_cast %500 : vector<1xf32> to vector<1x1xf32>
    %cst_42 = arith.constant 1.250000e-01 : f32
    %502 = vector.broadcast %cst_42 : f32 to vector<1x1xf32>
    %503 = arith.mulf %501, %502 : vector<1x1xf32>
    %504 = arith.mulf %498, %498 : vector<1x1xf32>
    %505 = arith.subf %503, %504 : vector<1x1xf32>
    %cst_43 = arith.constant 9.99999974E-6 : f32
    %506 = vector.broadcast %cst_43 : f32 to vector<1x1xf32>
    %507 = arith.addf %505, %506 : vector<1x1xf32>
    %508 = math.rsqrt %507 : vector<1x1xf32>
    %c111 = arith.constant 111 : index
    %509 = memref.load %arg0[%c111] : memref<256xf32, #tpu.memory_space<smem>>
    %510 = vector.broadcast %509 : f32 to vector<1x1xf32>
    %511 = arith.mulf %508, %510 : vector<1x1xf32>
    %512 = vector.broadcast %498 : vector<1x1xf32> to vector<1x128xf32>
    %513 = arith.subf %410, %512 : vector<1x128xf32>
    %514 = vector.broadcast %511 : vector<1x1xf32> to vector<1x128xf32>
    %515 = arith.mulf %513, %514 : vector<1x128xf32>
    %c115 = arith.constant 115 : index
    %516 = memref.load %arg0[%c115] : memref<256xf32, #tpu.memory_space<smem>>
    %517 = vector.broadcast %516 : f32 to vector<1x128xf32>
    %518 = arith.addf %515, %517 : vector<1x128xf32>
    %cst_44 = arith.constant 0.000000e+00 : f32
    %519 = vector.broadcast %cst_44 : f32 to vector<1x128xf32>
    %520 = arith.select %2, %440, %519 : vector<1x128xi1>, vector<1x128xf32>
    %cst_45 = arith.constant dense<0.000000e+00> : vector<1xf32>
    %521 = vector.multi_reduction <add>, %520, %cst_45 [1] : vector<1x128xf32> to vector<1xf32>
    %522 = vector.shape_cast %521 : vector<1xf32> to vector<1x1xf32>
    %cst_46 = arith.constant 1.250000e-01 : f32
    %523 = vector.broadcast %cst_46 : f32 to vector<1x1xf32>
    %524 = arith.mulf %522, %523 : vector<1x1xf32>
    %525 = arith.mulf %520, %520 : vector<1x128xf32>
    %cst_47 = arith.constant dense<0.000000e+00> : vector<1xf32>
    %526 = vector.multi_reduction <add>, %525, %cst_47 [1] : vector<1x128xf32> to vector<1xf32>
    %527 = vector.shape_cast %526 : vector<1xf32> to vector<1x1xf32>
    %cst_48 = arith.constant 1.250000e-01 : f32
    %528 = vector.broadcast %cst_48 : f32 to vector<1x1xf32>
    %529 = arith.mulf %527, %528 : vector<1x1xf32>
    %530 = arith.mulf %524, %524 : vector<1x1xf32>
    %531 = arith.subf %529, %530 : vector<1x1xf32>
    %cst_49 = arith.constant 9.99999974E-6 : f32
    %532 = vector.broadcast %cst_49 : f32 to vector<1x1xf32>
    %533 = arith.addf %531, %532 : vector<1x1xf32>
    %534 = math.rsqrt %533 : vector<1x1xf32>
    %c112 = arith.constant 112 : index
    %535 = memref.load %arg0[%c112] : memref<256xf32, #tpu.memory_space<smem>>
    %536 = vector.broadcast %535 : f32 to vector<1x1xf32>
    %537 = arith.mulf %534, %536 : vector<1x1xf32>
    %538 = vector.broadcast %524 : vector<1x1xf32> to vector<1x128xf32>
    %539 = arith.subf %440, %538 : vector<1x128xf32>
    %540 = vector.broadcast %537 : vector<1x1xf32> to vector<1x128xf32>
    %541 = arith.mulf %539, %540 : vector<1x128xf32>
    %c116 = arith.constant 116 : index
    %542 = memref.load %arg0[%c116] : memref<256xf32, #tpu.memory_space<smem>>
    %543 = vector.broadcast %542 : f32 to vector<1x128xf32>
    %544 = arith.addf %541, %543 : vector<1x128xf32>
    %c117 = arith.constant 117 : index
    %545 = memref.load %arg0[%c117] : memref<256xf32, #tpu.memory_space<smem>>
    %546 = vector.broadcast %545 : f32 to vector<1x128xf32>
    %547 = arith.mulf %546, %466 : vector<1x128xf32>
    %c118 = arith.constant 118 : index
    %548 = memref.load %arg0[%c118] : memref<256xf32, #tpu.memory_space<smem>>
    %549 = vector.broadcast %548 : f32 to vector<1x128xf32>
    %550 = arith.mulf %549, %492 : vector<1x128xf32>
    %551 = arith.addf %547, %550 : vector<1x128xf32>
    %c119 = arith.constant 119 : index
    %552 = memref.load %arg0[%c119] : memref<256xf32, #tpu.memory_space<smem>>
    %553 = vector.broadcast %552 : f32 to vector<1x128xf32>
    %554 = arith.mulf %553, %518 : vector<1x128xf32>
    %555 = arith.addf %551, %554 : vector<1x128xf32>
    %c120 = arith.constant 120 : index
    %556 = memref.load %arg0[%c120] : memref<256xf32, #tpu.memory_space<smem>>
    %557 = vector.broadcast %556 : f32 to vector<1x128xf32>
    %558 = arith.mulf %557, %544 : vector<1x128xf32>
    %559 = arith.addf %555, %558 : vector<1x128xf32>
    %c145 = arith.constant 145 : index
    %560 = memref.load %arg0[%c145] : memref<256xf32, #tpu.memory_space<smem>>
    %561 = vector.broadcast %560 : f32 to vector<1x128xf32>
    %562 = arith.addf %559, %561 : vector<1x128xf32>
    %cst_50 = arith.constant 0.000000e+00 : f32
    %563 = vector.broadcast %cst_50 : f32 to vector<1x128xf32>
    %564 = arith.maximumf %562, %563 : vector<1x128xf32>
    %c121 = arith.constant 121 : index
    %565 = memref.load %arg0[%c121] : memref<256xf32, #tpu.memory_space<smem>>
    %566 = vector.broadcast %565 : f32 to vector<1x128xf32>
    %567 = arith.mulf %566, %466 : vector<1x128xf32>
    %c122 = arith.constant 122 : index
    %568 = memref.load %arg0[%c122] : memref<256xf32, #tpu.memory_space<smem>>
    %569 = vector.broadcast %568 : f32 to vector<1x128xf32>
    %570 = arith.mulf %569, %492 : vector<1x128xf32>
    %571 = arith.addf %567, %570 : vector<1x128xf32>
    %c123 = arith.constant 123 : index
    %572 = memref.load %arg0[%c123] : memref<256xf32, #tpu.memory_space<smem>>
    %573 = vector.broadcast %572 : f32 to vector<1x128xf32>
    %574 = arith.mulf %573, %518 : vector<1x128xf32>
    %575 = arith.addf %571, %574 : vector<1x128xf32>
    %c124 = arith.constant 124 : index
    %576 = memref.load %arg0[%c124] : memref<256xf32, #tpu.memory_space<smem>>
    %577 = vector.broadcast %576 : f32 to vector<1x128xf32>
    %578 = arith.mulf %577, %544 : vector<1x128xf32>
    %579 = arith.addf %575, %578 : vector<1x128xf32>
    %c146 = arith.constant 146 : index
    %580 = memref.load %arg0[%c146] : memref<256xf32, #tpu.memory_space<smem>>
    %581 = vector.broadcast %580 : f32 to vector<1x128xf32>
    %582 = arith.addf %579, %581 : vector<1x128xf32>
    %cst_51 = arith.constant 0.000000e+00 : f32
    %583 = vector.broadcast %cst_51 : f32 to vector<1x128xf32>
    %584 = arith.maximumf %582, %583 : vector<1x128xf32>
    %c125 = arith.constant 125 : index
    %585 = memref.load %arg0[%c125] : memref<256xf32, #tpu.memory_space<smem>>
    %586 = vector.broadcast %585 : f32 to vector<1x128xf32>
    %587 = arith.mulf %586, %466 : vector<1x128xf32>
    %c126 = arith.constant 126 : index
    %588 = memref.load %arg0[%c126] : memref<256xf32, #tpu.memory_space<smem>>
    %589 = vector.broadcast %588 : f32 to vector<1x128xf32>
    %590 = arith.mulf %589, %492 : vector<1x128xf32>
    %591 = arith.addf %587, %590 : vector<1x128xf32>
    %c127 = arith.constant 127 : index
    %592 = memref.load %arg0[%c127] : memref<256xf32, #tpu.memory_space<smem>>
    %593 = vector.broadcast %592 : f32 to vector<1x128xf32>
    %594 = arith.mulf %593, %518 : vector<1x128xf32>
    %595 = arith.addf %591, %594 : vector<1x128xf32>
    %c128 = arith.constant 128 : index
    %596 = memref.load %arg0[%c128] : memref<256xf32, #tpu.memory_space<smem>>
    %597 = vector.broadcast %596 : f32 to vector<1x128xf32>
    %598 = arith.mulf %597, %544 : vector<1x128xf32>
    %599 = arith.addf %595, %598 : vector<1x128xf32>
    %c147 = arith.constant 147 : index
    %600 = memref.load %arg0[%c147] : memref<256xf32, #tpu.memory_space<smem>>
    %601 = vector.broadcast %600 : f32 to vector<1x128xf32>
    %602 = arith.addf %599, %601 : vector<1x128xf32>
    %cst_52 = arith.constant 0.000000e+00 : f32
    %603 = vector.broadcast %cst_52 : f32 to vector<1x128xf32>
    %604 = arith.maximumf %602, %603 : vector<1x128xf32>
    %c129 = arith.constant 129 : index
    %605 = memref.load %arg0[%c129] : memref<256xf32, #tpu.memory_space<smem>>
    %606 = vector.broadcast %605 : f32 to vector<1x128xf32>
    %607 = arith.mulf %606, %466 : vector<1x128xf32>
    %c130 = arith.constant 130 : index
    %608 = memref.load %arg0[%c130] : memref<256xf32, #tpu.memory_space<smem>>
    %609 = vector.broadcast %608 : f32 to vector<1x128xf32>
    %610 = arith.mulf %609, %492 : vector<1x128xf32>
    %611 = arith.addf %607, %610 : vector<1x128xf32>
    %c131 = arith.constant 131 : index
    %612 = memref.load %arg0[%c131] : memref<256xf32, #tpu.memory_space<smem>>
    %613 = vector.broadcast %612 : f32 to vector<1x128xf32>
    %614 = arith.mulf %613, %518 : vector<1x128xf32>
    %615 = arith.addf %611, %614 : vector<1x128xf32>
    %c132 = arith.constant 132 : index
    %616 = memref.load %arg0[%c132] : memref<256xf32, #tpu.memory_space<smem>>
    %617 = vector.broadcast %616 : f32 to vector<1x128xf32>
    %618 = arith.mulf %617, %544 : vector<1x128xf32>
    %619 = arith.addf %615, %618 : vector<1x128xf32>
    %c148 = arith.constant 148 : index
    %620 = memref.load %arg0[%c148] : memref<256xf32, #tpu.memory_space<smem>>
    %621 = vector.broadcast %620 : f32 to vector<1x128xf32>
    %622 = arith.addf %619, %621 : vector<1x128xf32>
    %cst_53 = arith.constant 0.000000e+00 : f32
    %623 = vector.broadcast %cst_53 : f32 to vector<1x128xf32>
    %624 = arith.maximumf %622, %623 : vector<1x128xf32>
    %c133 = arith.constant 133 : index
    %625 = memref.load %arg0[%c133] : memref<256xf32, #tpu.memory_space<smem>>
    %626 = vector.broadcast %625 : f32 to vector<1x128xf32>
    %627 = arith.mulf %626, %466 : vector<1x128xf32>
    %c134 = arith.constant 134 : index
    %628 = memref.load %arg0[%c134] : memref<256xf32, #tpu.memory_space<smem>>
    %629 = vector.broadcast %628 : f32 to vector<1x128xf32>
    %630 = arith.mulf %629, %492 : vector<1x128xf32>
    %631 = arith.addf %627, %630 : vector<1x128xf32>
    %c135 = arith.constant 135 : index
    %632 = memref.load %arg0[%c135] : memref<256xf32, #tpu.memory_space<smem>>
    %633 = vector.broadcast %632 : f32 to vector<1x128xf32>
    %634 = arith.mulf %633, %518 : vector<1x128xf32>
    %635 = arith.addf %631, %634 : vector<1x128xf32>
    %c136 = arith.constant 136 : index
    %636 = memref.load %arg0[%c136] : memref<256xf32, #tpu.memory_space<smem>>
    %637 = vector.broadcast %636 : f32 to vector<1x128xf32>
    %638 = arith.mulf %637, %544 : vector<1x128xf32>
    %639 = arith.addf %635, %638 : vector<1x128xf32>
    %c149 = arith.constant 149 : index
    %640 = memref.load %arg0[%c149] : memref<256xf32, #tpu.memory_space<smem>>
    %641 = vector.broadcast %640 : f32 to vector<1x128xf32>
    %642 = arith.addf %639, %641 : vector<1x128xf32>
    %cst_54 = arith.constant 0.000000e+00 : f32
    %643 = vector.broadcast %cst_54 : f32 to vector<1x128xf32>
    %644 = arith.maximumf %642, %643 : vector<1x128xf32>
    %c137 = arith.constant 137 : index
    %645 = memref.load %arg0[%c137] : memref<256xf32, #tpu.memory_space<smem>>
    %646 = vector.broadcast %645 : f32 to vector<1x128xf32>
    %647 = arith.mulf %646, %466 : vector<1x128xf32>
    %c138 = arith.constant 138 : index
    %648 = memref.load %arg0[%c138] : memref<256xf32, #tpu.memory_space<smem>>
    %649 = vector.broadcast %648 : f32 to vector<1x128xf32>
    %650 = arith.mulf %649, %492 : vector<1x128xf32>
    %651 = arith.addf %647, %650 : vector<1x128xf32>
    %c139 = arith.constant 139 : index
    %652 = memref.load %arg0[%c139] : memref<256xf32, #tpu.memory_space<smem>>
    %653 = vector.broadcast %652 : f32 to vector<1x128xf32>
    %654 = arith.mulf %653, %518 : vector<1x128xf32>
    %655 = arith.addf %651, %654 : vector<1x128xf32>
    %c140 = arith.constant 140 : index
    %656 = memref.load %arg0[%c140] : memref<256xf32, #tpu.memory_space<smem>>
    %657 = vector.broadcast %656 : f32 to vector<1x128xf32>
    %658 = arith.mulf %657, %544 : vector<1x128xf32>
    %659 = arith.addf %655, %658 : vector<1x128xf32>
    %c150 = arith.constant 150 : index
    %660 = memref.load %arg0[%c150] : memref<256xf32, #tpu.memory_space<smem>>
    %661 = vector.broadcast %660 : f32 to vector<1x128xf32>
    %662 = arith.addf %659, %661 : vector<1x128xf32>
    %cst_55 = arith.constant 0.000000e+00 : f32
    %663 = vector.broadcast %cst_55 : f32 to vector<1x128xf32>
    %664 = arith.maximumf %662, %663 : vector<1x128xf32>
    %c141 = arith.constant 141 : index
    %665 = memref.load %arg0[%c141] : memref<256xf32, #tpu.memory_space<smem>>
    %666 = vector.broadcast %665 : f32 to vector<1x128xf32>
    %667 = arith.mulf %666, %466 : vector<1x128xf32>
    %c142 = arith.constant 142 : index
    %668 = memref.load %arg0[%c142] : memref<256xf32, #tpu.memory_space<smem>>
    %669 = vector.broadcast %668 : f32 to vector<1x128xf32>
    %670 = arith.mulf %669, %492 : vector<1x128xf32>
    %671 = arith.addf %667, %670 : vector<1x128xf32>
    %c143 = arith.constant 143 : index
    %672 = memref.load %arg0[%c143] : memref<256xf32, #tpu.memory_space<smem>>
    %673 = vector.broadcast %672 : f32 to vector<1x128xf32>
    %674 = arith.mulf %673, %518 : vector<1x128xf32>
    %675 = arith.addf %671, %674 : vector<1x128xf32>
    %c144 = arith.constant 144 : index
    %676 = memref.load %arg0[%c144] : memref<256xf32, #tpu.memory_space<smem>>
    %677 = vector.broadcast %676 : f32 to vector<1x128xf32>
    %678 = arith.mulf %677, %544 : vector<1x128xf32>
    %679 = arith.addf %675, %678 : vector<1x128xf32>
    %c151 = arith.constant 151 : index
    %680 = memref.load %arg0[%c151] : memref<256xf32, #tpu.memory_space<smem>>
    %681 = vector.broadcast %680 : f32 to vector<1x128xf32>
    %682 = arith.addf %679, %681 : vector<1x128xf32>
    %cst_56 = arith.constant 0.000000e+00 : f32
    %683 = vector.broadcast %cst_56 : f32 to vector<1x128xf32>
    %684 = arith.maximumf %682, %683 : vector<1x128xf32>
    %c152 = arith.constant 152 : index
    %685 = memref.load %arg0[%c152] : memref<256xf32, #tpu.memory_space<smem>>
    %686 = vector.broadcast %685 : f32 to vector<1x128xf32>
    %687 = arith.mulf %686, %564 : vector<1x128xf32>
    %c153 = arith.constant 153 : index
    %688 = memref.load %arg0[%c153] : memref<256xf32, #tpu.memory_space<smem>>
    %689 = vector.broadcast %688 : f32 to vector<1x128xf32>
    %690 = arith.mulf %689, %584 : vector<1x128xf32>
    %691 = arith.addf %687, %690 : vector<1x128xf32>
    %c154 = arith.constant 154 : index
    %692 = memref.load %arg0[%c154] : memref<256xf32, #tpu.memory_space<smem>>
    %693 = vector.broadcast %692 : f32 to vector<1x128xf32>
    %694 = arith.mulf %693, %604 : vector<1x128xf32>
    %695 = arith.addf %691, %694 : vector<1x128xf32>
    %c155 = arith.constant 155 : index
    %696 = memref.load %arg0[%c155] : memref<256xf32, #tpu.memory_space<smem>>
    %697 = vector.broadcast %696 : f32 to vector<1x128xf32>
    %698 = arith.mulf %697, %624 : vector<1x128xf32>
    %699 = arith.addf %695, %698 : vector<1x128xf32>
    %c156 = arith.constant 156 : index
    %700 = memref.load %arg0[%c156] : memref<256xf32, #tpu.memory_space<smem>>
    %701 = vector.broadcast %700 : f32 to vector<1x128xf32>
    %702 = arith.mulf %701, %644 : vector<1x128xf32>
    %703 = arith.addf %699, %702 : vector<1x128xf32>
    %c157 = arith.constant 157 : index
    %704 = memref.load %arg0[%c157] : memref<256xf32, #tpu.memory_space<smem>>
    %705 = vector.broadcast %704 : f32 to vector<1x128xf32>
    %706 = arith.mulf %705, %664 : vector<1x128xf32>
    %707 = arith.addf %703, %706 : vector<1x128xf32>
    %c158 = arith.constant 158 : index
    %708 = memref.load %arg0[%c158] : memref<256xf32, #tpu.memory_space<smem>>
    %709 = vector.broadcast %708 : f32 to vector<1x128xf32>
    %710 = arith.mulf %709, %684 : vector<1x128xf32>
    %711 = arith.addf %707, %710 : vector<1x128xf32>
    %c222 = arith.constant 222 : index
    %712 = memref.load %arg0[%c222] : memref<256xf32, #tpu.memory_space<smem>>
    %713 = vector.broadcast %712 : f32 to vector<1x128xf32>
    %714 = arith.addf %711, %713 : vector<1x128xf32>
    %c159 = arith.constant 159 : index
    %715 = memref.load %arg0[%c159] : memref<256xf32, #tpu.memory_space<smem>>
    %716 = vector.broadcast %715 : f32 to vector<1x128xf32>
    %717 = arith.mulf %716, %564 : vector<1x128xf32>
    %c160 = arith.constant 160 : index
    %718 = memref.load %arg0[%c160] : memref<256xf32, #tpu.memory_space<smem>>
    %719 = vector.broadcast %718 : f32 to vector<1x128xf32>
    %720 = arith.mulf %719, %584 : vector<1x128xf32>
    %721 = arith.addf %717, %720 : vector<1x128xf32>
    %c161 = arith.constant 161 : index
    %722 = memref.load %arg0[%c161] : memref<256xf32, #tpu.memory_space<smem>>
    %723 = vector.broadcast %722 : f32 to vector<1x128xf32>
    %724 = arith.mulf %723, %604 : vector<1x128xf32>
    %725 = arith.addf %721, %724 : vector<1x128xf32>
    %c162 = arith.constant 162 : index
    %726 = memref.load %arg0[%c162] : memref<256xf32, #tpu.memory_space<smem>>
    %727 = vector.broadcast %726 : f32 to vector<1x128xf32>
    %728 = arith.mulf %727, %624 : vector<1x128xf32>
    %729 = arith.addf %725, %728 : vector<1x128xf32>
    %c163 = arith.constant 163 : index
    %730 = memref.load %arg0[%c163] : memref<256xf32, #tpu.memory_space<smem>>
    %731 = vector.broadcast %730 : f32 to vector<1x128xf32>
    %732 = arith.mulf %731, %644 : vector<1x128xf32>
    %733 = arith.addf %729, %732 : vector<1x128xf32>
    %c164 = arith.constant 164 : index
    %734 = memref.load %arg0[%c164] : memref<256xf32, #tpu.memory_space<smem>>
    %735 = vector.broadcast %734 : f32 to vector<1x128xf32>
    %736 = arith.mulf %735, %664 : vector<1x128xf32>
    %737 = arith.addf %733, %736 : vector<1x128xf32>
    %c165 = arith.constant 165 : index
    %738 = memref.load %arg0[%c165] : memref<256xf32, #tpu.memory_space<smem>>
    %739 = vector.broadcast %738 : f32 to vector<1x128xf32>
    %740 = arith.mulf %739, %684 : vector<1x128xf32>
    %741 = arith.addf %737, %740 : vector<1x128xf32>
    %c223 = arith.constant 223 : index
    %742 = memref.load %arg0[%c223] : memref<256xf32, #tpu.memory_space<smem>>
    %743 = vector.broadcast %742 : f32 to vector<1x128xf32>
    %744 = arith.addf %741, %743 : vector<1x128xf32>
    %c166 = arith.constant 166 : index
    %745 = memref.load %arg0[%c166] : memref<256xf32, #tpu.memory_space<smem>>
    %746 = vector.broadcast %745 : f32 to vector<1x128xf32>
    %747 = arith.mulf %746, %564 : vector<1x128xf32>
    %c167 = arith.constant 167 : index
    %748 = memref.load %arg0[%c167] : memref<256xf32, #tpu.memory_space<smem>>
    %749 = vector.broadcast %748 : f32 to vector<1x128xf32>
    %750 = arith.mulf %749, %584 : vector<1x128xf32>
    %751 = arith.addf %747, %750 : vector<1x128xf32>
    %c168 = arith.constant 168 : index
    %752 = memref.load %arg0[%c168] : memref<256xf32, #tpu.memory_space<smem>>
    %753 = vector.broadcast %752 : f32 to vector<1x128xf32>
    %754 = arith.mulf %753, %604 : vector<1x128xf32>
    %755 = arith.addf %751, %754 : vector<1x128xf32>
    %c169 = arith.constant 169 : index
    %756 = memref.load %arg0[%c169] : memref<256xf32, #tpu.memory_space<smem>>
    %757 = vector.broadcast %756 : f32 to vector<1x128xf32>
    %758 = arith.mulf %757, %624 : vector<1x128xf32>
    %759 = arith.addf %755, %758 : vector<1x128xf32>
    %c170 = arith.constant 170 : index
    %760 = memref.load %arg0[%c170] : memref<256xf32, #tpu.memory_space<smem>>
    %761 = vector.broadcast %760 : f32 to vector<1x128xf32>
    %762 = arith.mulf %761, %644 : vector<1x128xf32>
    %763 = arith.addf %759, %762 : vector<1x128xf32>
    %c171 = arith.constant 171 : index
    %764 = memref.load %arg0[%c171] : memref<256xf32, #tpu.memory_space<smem>>
    %765 = vector.broadcast %764 : f32 to vector<1x128xf32>
    %766 = arith.mulf %765, %664 : vector<1x128xf32>
    %767 = arith.addf %763, %766 : vector<1x128xf32>
    %c172 = arith.constant 172 : index
    %768 = memref.load %arg0[%c172] : memref<256xf32, #tpu.memory_space<smem>>
    %769 = vector.broadcast %768 : f32 to vector<1x128xf32>
    %770 = arith.mulf %769, %684 : vector<1x128xf32>
    %771 = arith.addf %767, %770 : vector<1x128xf32>
    %c224 = arith.constant 224 : index
    %772 = memref.load %arg0[%c224] : memref<256xf32, #tpu.memory_space<smem>>
    %773 = vector.broadcast %772 : f32 to vector<1x128xf32>
    %774 = arith.addf %771, %773 : vector<1x128xf32>
    %c173 = arith.constant 173 : index
    %775 = memref.load %arg0[%c173] : memref<256xf32, #tpu.memory_space<smem>>
    %776 = vector.broadcast %775 : f32 to vector<1x128xf32>
    %777 = arith.mulf %776, %564 : vector<1x128xf32>
    %c174 = arith.constant 174 : index
    %778 = memref.load %arg0[%c174] : memref<256xf32, #tpu.memory_space<smem>>
    %779 = vector.broadcast %778 : f32 to vector<1x128xf32>
    %780 = arith.mulf %779, %584 : vector<1x128xf32>
    %781 = arith.addf %777, %780 : vector<1x128xf32>
    %c175 = arith.constant 175 : index
    %782 = memref.load %arg0[%c175] : memref<256xf32, #tpu.memory_space<smem>>
    %783 = vector.broadcast %782 : f32 to vector<1x128xf32>
    %784 = arith.mulf %783, %604 : vector<1x128xf32>
    %785 = arith.addf %781, %784 : vector<1x128xf32>
    %c176 = arith.constant 176 : index
    %786 = memref.load %arg0[%c176] : memref<256xf32, #tpu.memory_space<smem>>
    %787 = vector.broadcast %786 : f32 to vector<1x128xf32>
    %788 = arith.mulf %787, %624 : vector<1x128xf32>
    %789 = arith.addf %785, %788 : vector<1x128xf32>
    %c177 = arith.constant 177 : index
    %790 = memref.load %arg0[%c177] : memref<256xf32, #tpu.memory_space<smem>>
    %791 = vector.broadcast %790 : f32 to vector<1x128xf32>
    %792 = arith.mulf %791, %644 : vector<1x128xf32>
    %793 = arith.addf %789, %792 : vector<1x128xf32>
    %c178 = arith.constant 178 : index
    %794 = memref.load %arg0[%c178] : memref<256xf32, #tpu.memory_space<smem>>
    %795 = vector.broadcast %794 : f32 to vector<1x128xf32>
    %796 = arith.mulf %795, %664 : vector<1x128xf32>
    %797 = arith.addf %793, %796 : vector<1x128xf32>
    %c179 = arith.constant 179 : index
    %798 = memref.load %arg0[%c179] : memref<256xf32, #tpu.memory_space<smem>>
    %799 = vector.broadcast %798 : f32 to vector<1x128xf32>
    %800 = arith.mulf %799, %684 : vector<1x128xf32>
    %801 = arith.addf %797, %800 : vector<1x128xf32>
    %c225 = arith.constant 225 : index
    %802 = memref.load %arg0[%c225] : memref<256xf32, #tpu.memory_space<smem>>
    %803 = vector.broadcast %802 : f32 to vector<1x128xf32>
    %804 = arith.addf %801, %803 : vector<1x128xf32>
    %c180 = arith.constant 180 : index
    %805 = memref.load %arg0[%c180] : memref<256xf32, #tpu.memory_space<smem>>
    %806 = vector.broadcast %805 : f32 to vector<1x128xf32>
    %807 = arith.mulf %806, %564 : vector<1x128xf32>
    %c181 = arith.constant 181 : index
    %808 = memref.load %arg0[%c181] : memref<256xf32, #tpu.memory_space<smem>>
    %809 = vector.broadcast %808 : f32 to vector<1x128xf32>
    %810 = arith.mulf %809, %584 : vector<1x128xf32>
    %811 = arith.addf %807, %810 : vector<1x128xf32>
    %c182 = arith.constant 182 : index
    %812 = memref.load %arg0[%c182] : memref<256xf32, #tpu.memory_space<smem>>
    %813 = vector.broadcast %812 : f32 to vector<1x128xf32>
    %814 = arith.mulf %813, %604 : vector<1x128xf32>
    %815 = arith.addf %811, %814 : vector<1x128xf32>
    %c183 = arith.constant 183 : index
    %816 = memref.load %arg0[%c183] : memref<256xf32, #tpu.memory_space<smem>>
    %817 = vector.broadcast %816 : f32 to vector<1x128xf32>
    %818 = arith.mulf %817, %624 : vector<1x128xf32>
    %819 = arith.addf %815, %818 : vector<1x128xf32>
    %c184 = arith.constant 184 : index
    %820 = memref.load %arg0[%c184] : memref<256xf32, #tpu.memory_space<smem>>
    %821 = vector.broadcast %820 : f32 to vector<1x128xf32>
    %822 = arith.mulf %821, %644 : vector<1x128xf32>
    %823 = arith.addf %819, %822 : vector<1x128xf32>
    %c185 = arith.constant 185 : index
    %824 = memref.load %arg0[%c185] : memref<256xf32, #tpu.memory_space<smem>>
    %825 = vector.broadcast %824 : f32 to vector<1x128xf32>
    %826 = arith.mulf %825, %664 : vector<1x128xf32>
    %827 = arith.addf %823, %826 : vector<1x128xf32>
    %c186 = arith.constant 186 : index
    %828 = memref.load %arg0[%c186] : memref<256xf32, #tpu.memory_space<smem>>
    %829 = vector.broadcast %828 : f32 to vector<1x128xf32>
    %830 = arith.mulf %829, %684 : vector<1x128xf32>
    %831 = arith.addf %827, %830 : vector<1x128xf32>
    %c226 = arith.constant 226 : index
    %832 = memref.load %arg0[%c226] : memref<256xf32, #tpu.memory_space<smem>>
    %833 = vector.broadcast %832 : f32 to vector<1x128xf32>
    %834 = arith.addf %831, %833 : vector<1x128xf32>
    %c187 = arith.constant 187 : index
    %835 = memref.load %arg0[%c187] : memref<256xf32, #tpu.memory_space<smem>>
    %836 = vector.broadcast %835 : f32 to vector<1x128xf32>
    %837 = arith.mulf %836, %564 : vector<1x128xf32>
    %c188 = arith.constant 188 : index
    %838 = memref.load %arg0[%c188] : memref<256xf32, #tpu.memory_space<smem>>
    %839 = vector.broadcast %838 : f32 to vector<1x128xf32>
    %840 = arith.mulf %839, %584 : vector<1x128xf32>
    %841 = arith.addf %837, %840 : vector<1x128xf32>
    %c189 = arith.constant 189 : index
    %842 = memref.load %arg0[%c189] : memref<256xf32, #tpu.memory_space<smem>>
    %843 = vector.broadcast %842 : f32 to vector<1x128xf32>
    %844 = arith.mulf %843, %604 : vector<1x128xf32>
    %845 = arith.addf %841, %844 : vector<1x128xf32>
    %c190 = arith.constant 190 : index
    %846 = memref.load %arg0[%c190] : memref<256xf32, #tpu.memory_space<smem>>
    %847 = vector.broadcast %846 : f32 to vector<1x128xf32>
    %848 = arith.mulf %847, %624 : vector<1x128xf32>
    %849 = arith.addf %845, %848 : vector<1x128xf32>
    %c191 = arith.constant 191 : index
    %850 = memref.load %arg0[%c191] : memref<256xf32, #tpu.memory_space<smem>>
    %851 = vector.broadcast %850 : f32 to vector<1x128xf32>
    %852 = arith.mulf %851, %644 : vector<1x128xf32>
    %853 = arith.addf %849, %852 : vector<1x128xf32>
    %c192 = arith.constant 192 : index
    %854 = memref.load %arg0[%c192] : memref<256xf32, #tpu.memory_space<smem>>
    %855 = vector.broadcast %854 : f32 to vector<1x128xf32>
    %856 = arith.mulf %855, %664 : vector<1x128xf32>
    %857 = arith.addf %853, %856 : vector<1x128xf32>
    %c193 = arith.constant 193 : index
    %858 = memref.load %arg0[%c193] : memref<256xf32, #tpu.memory_space<smem>>
    %859 = vector.broadcast %858 : f32 to vector<1x128xf32>
    %860 = arith.mulf %859, %684 : vector<1x128xf32>
    %861 = arith.addf %857, %860 : vector<1x128xf32>
    %c227 = arith.constant 227 : index
    %862 = memref.load %arg0[%c227] : memref<256xf32, #tpu.memory_space<smem>>
    %863 = vector.broadcast %862 : f32 to vector<1x128xf32>
    %864 = arith.addf %861, %863 : vector<1x128xf32>
    %c194 = arith.constant 194 : index
    %865 = memref.load %arg0[%c194] : memref<256xf32, #tpu.memory_space<smem>>
    %866 = vector.broadcast %865 : f32 to vector<1x128xf32>
    %867 = arith.mulf %866, %564 : vector<1x128xf32>
    %c195 = arith.constant 195 : index
    %868 = memref.load %arg0[%c195] : memref<256xf32, #tpu.memory_space<smem>>
    %869 = vector.broadcast %868 : f32 to vector<1x128xf32>
    %870 = arith.mulf %869, %584 : vector<1x128xf32>
    %871 = arith.addf %867, %870 : vector<1x128xf32>
    %c196 = arith.constant 196 : index
    %872 = memref.load %arg0[%c196] : memref<256xf32, #tpu.memory_space<smem>>
    %873 = vector.broadcast %872 : f32 to vector<1x128xf32>
    %874 = arith.mulf %873, %604 : vector<1x128xf32>
    %875 = arith.addf %871, %874 : vector<1x128xf32>
    %c197 = arith.constant 197 : index
    %876 = memref.load %arg0[%c197] : memref<256xf32, #tpu.memory_space<smem>>
    %877 = vector.broadcast %876 : f32 to vector<1x128xf32>
    %878 = arith.mulf %877, %624 : vector<1x128xf32>
    %879 = arith.addf %875, %878 : vector<1x128xf32>
    %c198 = arith.constant 198 : index
    %880 = memref.load %arg0[%c198] : memref<256xf32, #tpu.memory_space<smem>>
    %881 = vector.broadcast %880 : f32 to vector<1x128xf32>
    %882 = arith.mulf %881, %644 : vector<1x128xf32>
    %883 = arith.addf %879, %882 : vector<1x128xf32>
    %c199 = arith.constant 199 : index
    %884 = memref.load %arg0[%c199] : memref<256xf32, #tpu.memory_space<smem>>
    %885 = vector.broadcast %884 : f32 to vector<1x128xf32>
    %886 = arith.mulf %885, %664 : vector<1x128xf32>
    %887 = arith.addf %883, %886 : vector<1x128xf32>
    %c200 = arith.constant 200 : index
    %888 = memref.load %arg0[%c200] : memref<256xf32, #tpu.memory_space<smem>>
    %889 = vector.broadcast %888 : f32 to vector<1x128xf32>
    %890 = arith.mulf %889, %684 : vector<1x128xf32>
    %891 = arith.addf %887, %890 : vector<1x128xf32>
    %c228 = arith.constant 228 : index
    %892 = memref.load %arg0[%c228] : memref<256xf32, #tpu.memory_space<smem>>
    %893 = vector.broadcast %892 : f32 to vector<1x128xf32>
    %894 = arith.addf %891, %893 : vector<1x128xf32>
    %c201 = arith.constant 201 : index
    %895 = memref.load %arg0[%c201] : memref<256xf32, #tpu.memory_space<smem>>
    %896 = vector.broadcast %895 : f32 to vector<1x128xf32>
    %897 = arith.mulf %896, %564 : vector<1x128xf32>
    %c202 = arith.constant 202 : index
    %898 = memref.load %arg0[%c202] : memref<256xf32, #tpu.memory_space<smem>>
    %899 = vector.broadcast %898 : f32 to vector<1x128xf32>
    %900 = arith.mulf %899, %584 : vector<1x128xf32>
    %901 = arith.addf %897, %900 : vector<1x128xf32>
    %c203 = arith.constant 203 : index
    %902 = memref.load %arg0[%c203] : memref<256xf32, #tpu.memory_space<smem>>
    %903 = vector.broadcast %902 : f32 to vector<1x128xf32>
    %904 = arith.mulf %903, %604 : vector<1x128xf32>
    %905 = arith.addf %901, %904 : vector<1x128xf32>
    %c204 = arith.constant 204 : index
    %906 = memref.load %arg0[%c204] : memref<256xf32, #tpu.memory_space<smem>>
    %907 = vector.broadcast %906 : f32 to vector<1x128xf32>
    %908 = arith.mulf %907, %624 : vector<1x128xf32>
    %909 = arith.addf %905, %908 : vector<1x128xf32>
    %c205 = arith.constant 205 : index
    %910 = memref.load %arg0[%c205] : memref<256xf32, #tpu.memory_space<smem>>
    %911 = vector.broadcast %910 : f32 to vector<1x128xf32>
    %912 = arith.mulf %911, %644 : vector<1x128xf32>
    %913 = arith.addf %909, %912 : vector<1x128xf32>
    %c206 = arith.constant 206 : index
    %914 = memref.load %arg0[%c206] : memref<256xf32, #tpu.memory_space<smem>>
    %915 = vector.broadcast %914 : f32 to vector<1x128xf32>
    %916 = arith.mulf %915, %664 : vector<1x128xf32>
    %917 = arith.addf %913, %916 : vector<1x128xf32>
    %c207 = arith.constant 207 : index
    %918 = memref.load %arg0[%c207] : memref<256xf32, #tpu.memory_space<smem>>
    %919 = vector.broadcast %918 : f32 to vector<1x128xf32>
    %920 = arith.mulf %919, %684 : vector<1x128xf32>
    %921 = arith.addf %917, %920 : vector<1x128xf32>
    %c229 = arith.constant 229 : index
    %922 = memref.load %arg0[%c229] : memref<256xf32, #tpu.memory_space<smem>>
    %923 = vector.broadcast %922 : f32 to vector<1x128xf32>
    %924 = arith.addf %921, %923 : vector<1x128xf32>
    %c208 = arith.constant 208 : index
    %925 = memref.load %arg0[%c208] : memref<256xf32, #tpu.memory_space<smem>>
    %926 = vector.broadcast %925 : f32 to vector<1x128xf32>
    %927 = arith.mulf %926, %564 : vector<1x128xf32>
    %c209 = arith.constant 209 : index
    %928 = memref.load %arg0[%c209] : memref<256xf32, #tpu.memory_space<smem>>
    %929 = vector.broadcast %928 : f32 to vector<1x128xf32>
    %930 = arith.mulf %929, %584 : vector<1x128xf32>
    %931 = arith.addf %927, %930 : vector<1x128xf32>
    %c210 = arith.constant 210 : index
    %932 = memref.load %arg0[%c210] : memref<256xf32, #tpu.memory_space<smem>>
    %933 = vector.broadcast %932 : f32 to vector<1x128xf32>
    %934 = arith.mulf %933, %604 : vector<1x128xf32>
    %935 = arith.addf %931, %934 : vector<1x128xf32>
    %c211 = arith.constant 211 : index
    %936 = memref.load %arg0[%c211] : memref<256xf32, #tpu.memory_space<smem>>
    %937 = vector.broadcast %936 : f32 to vector<1x128xf32>
    %938 = arith.mulf %937, %624 : vector<1x128xf32>
    %939 = arith.addf %935, %938 : vector<1x128xf32>
    %c212 = arith.constant 212 : index
    %940 = memref.load %arg0[%c212] : memref<256xf32, #tpu.memory_space<smem>>
    %941 = vector.broadcast %940 : f32 to vector<1x128xf32>
    %942 = arith.mulf %941, %644 : vector<1x128xf32>
    %943 = arith.addf %939, %942 : vector<1x128xf32>
    %c213 = arith.constant 213 : index
    %944 = memref.load %arg0[%c213] : memref<256xf32, #tpu.memory_space<smem>>
    %945 = vector.broadcast %944 : f32 to vector<1x128xf32>
    %946 = arith.mulf %945, %664 : vector<1x128xf32>
    %947 = arith.addf %943, %946 : vector<1x128xf32>
    %c214 = arith.constant 214 : index
    %948 = memref.load %arg0[%c214] : memref<256xf32, #tpu.memory_space<smem>>
    %949 = vector.broadcast %948 : f32 to vector<1x128xf32>
    %950 = arith.mulf %949, %684 : vector<1x128xf32>
    %951 = arith.addf %947, %950 : vector<1x128xf32>
    %c230 = arith.constant 230 : index
    %952 = memref.load %arg0[%c230] : memref<256xf32, #tpu.memory_space<smem>>
    %953 = vector.broadcast %952 : f32 to vector<1x128xf32>
    %954 = arith.addf %951, %953 : vector<1x128xf32>
    %c215 = arith.constant 215 : index
    %955 = memref.load %arg0[%c215] : memref<256xf32, #tpu.memory_space<smem>>
    %956 = vector.broadcast %955 : f32 to vector<1x128xf32>
    %957 = arith.mulf %956, %564 : vector<1x128xf32>
    %c216 = arith.constant 216 : index
    %958 = memref.load %arg0[%c216] : memref<256xf32, #tpu.memory_space<smem>>
    %959 = vector.broadcast %958 : f32 to vector<1x128xf32>
    %960 = arith.mulf %959, %584 : vector<1x128xf32>
    %961 = arith.addf %957, %960 : vector<1x128xf32>
    %c217 = arith.constant 217 : index
    %962 = memref.load %arg0[%c217] : memref<256xf32, #tpu.memory_space<smem>>
    %963 = vector.broadcast %962 : f32 to vector<1x128xf32>
    %964 = arith.mulf %963, %604 : vector<1x128xf32>
    %965 = arith.addf %961, %964 : vector<1x128xf32>
    %c218 = arith.constant 218 : index
    %966 = memref.load %arg0[%c218] : memref<256xf32, #tpu.memory_space<smem>>
    %967 = vector.broadcast %966 : f32 to vector<1x128xf32>
    %968 = arith.mulf %967, %624 : vector<1x128xf32>
    %969 = arith.addf %965, %968 : vector<1x128xf32>
    %c219 = arith.constant 219 : index
    %970 = memref.load %arg0[%c219] : memref<256xf32, #tpu.memory_space<smem>>
    %971 = vector.broadcast %970 : f32 to vector<1x128xf32>
    %972 = arith.mulf %971, %644 : vector<1x128xf32>
    %973 = arith.addf %969, %972 : vector<1x128xf32>
    %c220 = arith.constant 220 : index
    %974 = memref.load %arg0[%c220] : memref<256xf32, #tpu.memory_space<smem>>
    %975 = vector.broadcast %974 : f32 to vector<1x128xf32>
    %976 = arith.mulf %975, %664 : vector<1x128xf32>
    %977 = arith.addf %973, %976 : vector<1x128xf32>
    %c221 = arith.constant 221 : index
    %978 = memref.load %arg0[%c221] : memref<256xf32, #tpu.memory_space<smem>>
    %979 = vector.broadcast %978 : f32 to vector<1x128xf32>
    %980 = arith.mulf %979, %684 : vector<1x128xf32>
    %981 = arith.addf %977, %980 : vector<1x128xf32>
    %c231 = arith.constant 231 : index
    %982 = memref.load %arg0[%c231] : memref<256xf32, #tpu.memory_space<smem>>
    %983 = vector.broadcast %982 : f32 to vector<1x128xf32>
    %984 = arith.addf %981, %983 : vector<1x128xf32>
    %cst_57 = arith.constant 0.000000e+00 : f32
    %985 = vector.broadcast %cst_57 : f32 to vector<1x128xf32>
    %986 = arith.select %2, %714, %985 : vector<1x128xi1>, vector<1x128xf32>
    %cst_58 = arith.constant dense<0.000000e+00> : vector<1xf32>
    %987 = vector.multi_reduction <add>, %986, %cst_58 [1] : vector<1x128xf32> to vector<1xf32>
    %988 = vector.shape_cast %987 : vector<1xf32> to vector<1x1xf32>
    %cst_59 = arith.constant 1.250000e-01 : f32
    %989 = vector.broadcast %cst_59 : f32 to vector<1x1xf32>
    %990 = arith.mulf %988, %989 : vector<1x1xf32>
    %991 = arith.mulf %986, %986 : vector<1x128xf32>
    %cst_60 = arith.constant dense<0.000000e+00> : vector<1xf32>
    %992 = vector.multi_reduction <add>, %991, %cst_60 [1] : vector<1x128xf32> to vector<1xf32>
    %993 = vector.shape_cast %992 : vector<1xf32> to vector<1x1xf32>
    %cst_61 = arith.constant 1.250000e-01 : f32
    %994 = vector.broadcast %cst_61 : f32 to vector<1x1xf32>
    %995 = arith.mulf %993, %994 : vector<1x1xf32>
    %996 = arith.mulf %990, %990 : vector<1x1xf32>
    %997 = arith.subf %995, %996 : vector<1x1xf32>
    %cst_62 = arith.constant 9.99999974E-6 : f32
    %998 = vector.broadcast %cst_62 : f32 to vector<1x1xf32>
    %999 = arith.addf %997, %998 : vector<1x1xf32>
    %1000 = math.rsqrt %999 : vector<1x1xf32>
    %c232 = arith.constant 232 : index
    %1001 = memref.load %arg0[%c232] : memref<256xf32, #tpu.memory_space<smem>>
    %1002 = vector.broadcast %1001 : f32 to vector<1x1xf32>
    %1003 = arith.mulf %1000, %1002 : vector<1x1xf32>
    %1004 = vector.broadcast %990 : vector<1x1xf32> to vector<1x128xf32>
    %1005 = arith.subf %714, %1004 : vector<1x128xf32>
    %1006 = vector.broadcast %1003 : vector<1x1xf32> to vector<1x128xf32>
    %1007 = arith.mulf %1005, %1006 : vector<1x128xf32>
    %c242 = arith.constant 242 : index
    %1008 = memref.load %arg0[%c242] : memref<256xf32, #tpu.memory_space<smem>>
    %1009 = vector.broadcast %1008 : f32 to vector<1x128xf32>
    %1010 = arith.addf %1007, %1009 : vector<1x128xf32>
    %cst_63 = arith.constant 0.000000e+00 : f32
    %1011 = vector.broadcast %cst_63 : f32 to vector<1x128xf32>
    %1012 = arith.select %2, %744, %1011 : vector<1x128xi1>, vector<1x128xf32>
    %cst_64 = arith.constant dense<0.000000e+00> : vector<1xf32>
    %1013 = vector.multi_reduction <add>, %1012, %cst_64 [1] : vector<1x128xf32> to vector<1xf32>
    %1014 = vector.shape_cast %1013 : vector<1xf32> to vector<1x1xf32>
    %cst_65 = arith.constant 1.250000e-01 : f32
    %1015 = vector.broadcast %cst_65 : f32 to vector<1x1xf32>
    %1016 = arith.mulf %1014, %1015 : vector<1x1xf32>
    %1017 = arith.mulf %1012, %1012 : vector<1x128xf32>
    %cst_66 = arith.constant dense<0.000000e+00> : vector<1xf32>
    %1018 = vector.multi_reduction <add>, %1017, %cst_66 [1] : vector<1x128xf32> to vector<1xf32>
    %1019 = vector.shape_cast %1018 : vector<1xf32> to vector<1x1xf32>
    %cst_67 = arith.constant 1.250000e-01 : f32
    %1020 = vector.broadcast %cst_67 : f32 to vector<1x1xf32>
    %1021 = arith.mulf %1019, %1020 : vector<1x1xf32>
    %1022 = arith.mulf %1016, %1016 : vector<1x1xf32>
    %1023 = arith.subf %1021, %1022 : vector<1x1xf32>
    %cst_68 = arith.constant 9.99999974E-6 : f32
    %1024 = vector.broadcast %cst_68 : f32 to vector<1x1xf32>
    %1025 = arith.addf %1023, %1024 : vector<1x1xf32>
    %1026 = math.rsqrt %1025 : vector<1x1xf32>
    %c233 = arith.constant 233 : index
    %1027 = memref.load %arg0[%c233] : memref<256xf32, #tpu.memory_space<smem>>
    %1028 = vector.broadcast %1027 : f32 to vector<1x1xf32>
    %1029 = arith.mulf %1026, %1028 : vector<1x1xf32>
    %1030 = vector.broadcast %1016 : vector<1x1xf32> to vector<1x128xf32>
    %1031 = arith.subf %744, %1030 : vector<1x128xf32>
    %1032 = vector.broadcast %1029 : vector<1x1xf32> to vector<1x128xf32>
    %1033 = arith.mulf %1031, %1032 : vector<1x128xf32>
    %c243 = arith.constant 243 : index
    %1034 = memref.load %arg0[%c243] : memref<256xf32, #tpu.memory_space<smem>>
    %1035 = vector.broadcast %1034 : f32 to vector<1x128xf32>
    %1036 = arith.addf %1033, %1035 : vector<1x128xf32>
    %cst_69 = arith.constant 0.000000e+00 : f32
    %1037 = vector.broadcast %cst_69 : f32 to vector<1x128xf32>
    %1038 = arith.select %2, %774, %1037 : vector<1x128xi1>, vector<1x128xf32>
    %cst_70 = arith.constant dense<0.000000e+00> : vector<1xf32>
    %1039 = vector.multi_reduction <add>, %1038, %cst_70 [1] : vector<1x128xf32> to vector<1xf32>
    %1040 = vector.shape_cast %1039 : vector<1xf32> to vector<1x1xf32>
    %cst_71 = arith.constant 1.250000e-01 : f32
    %1041 = vector.broadcast %cst_71 : f32 to vector<1x1xf32>
    %1042 = arith.mulf %1040, %1041 : vector<1x1xf32>
    %1043 = arith.mulf %1038, %1038 : vector<1x128xf32>
    %cst_72 = arith.constant dense<0.000000e+00> : vector<1xf32>
    %1044 = vector.multi_reduction <add>, %1043, %cst_72 [1] : vector<1x128xf32> to vector<1xf32>
    %1045 = vector.shape_cast %1044 : vector<1xf32> to vector<1x1xf32>
    %cst_73 = arith.constant 1.250000e-01 : f32
    %1046 = vector.broadcast %cst_73 : f32 to vector<1x1xf32>
    %1047 = arith.mulf %1045, %1046 : vector<1x1xf32>
    %1048 = arith.mulf %1042, %1042 : vector<1x1xf32>
    %1049 = arith.subf %1047, %1048 : vector<1x1xf32>
    %cst_74 = arith.constant 9.99999974E-6 : f32
    %1050 = vector.broadcast %cst_74 : f32 to vector<1x1xf32>
    %1051 = arith.addf %1049, %1050 : vector<1x1xf32>
    %1052 = math.rsqrt %1051 : vector<1x1xf32>
    %c234 = arith.constant 234 : index
    %1053 = memref.load %arg0[%c234] : memref<256xf32, #tpu.memory_space<smem>>
    %1054 = vector.broadcast %1053 : f32 to vector<1x1xf32>
    %1055 = arith.mulf %1052, %1054 : vector<1x1xf32>
    %1056 = vector.broadcast %1042 : vector<1x1xf32> to vector<1x128xf32>
    %1057 = arith.subf %774, %1056 : vector<1x128xf32>
    %1058 = vector.broadcast %1055 : vector<1x1xf32> to vector<1x128xf32>
    %1059 = arith.mulf %1057, %1058 : vector<1x128xf32>
    %c244 = arith.constant 244 : index
    %1060 = memref.load %arg0[%c244] : memref<256xf32, #tpu.memory_space<smem>>
    %1061 = vector.broadcast %1060 : f32 to vector<1x128xf32>
    %1062 = arith.addf %1059, %1061 : vector<1x128xf32>
    %cst_75 = arith.constant 0.000000e+00 : f32
    %1063 = vector.broadcast %cst_75 : f32 to vector<1x128xf32>
    %1064 = arith.select %2, %804, %1063 : vector<1x128xi1>, vector<1x128xf32>
    %cst_76 = arith.constant dense<0.000000e+00> : vector<1xf32>
    %1065 = vector.multi_reduction <add>, %1064, %cst_76 [1] : vector<1x128xf32> to vector<1xf32>
    %1066 = vector.shape_cast %1065 : vector<1xf32> to vector<1x1xf32>
    %cst_77 = arith.constant 1.250000e-01 : f32
    %1067 = vector.broadcast %cst_77 : f32 to vector<1x1xf32>
    %1068 = arith.mulf %1066, %1067 : vector<1x1xf32>
    %1069 = arith.mulf %1064, %1064 : vector<1x128xf32>
    %cst_78 = arith.constant dense<0.000000e+00> : vector<1xf32>
    %1070 = vector.multi_reduction <add>, %1069, %cst_78 [1] : vector<1x128xf32> to vector<1xf32>
    %1071 = vector.shape_cast %1070 : vector<1xf32> to vector<1x1xf32>
    %cst_79 = arith.constant 1.250000e-01 : f32
    %1072 = vector.broadcast %cst_79 : f32 to vector<1x1xf32>
    %1073 = arith.mulf %1071, %1072 : vector<1x1xf32>
    %1074 = arith.mulf %1068, %1068 : vector<1x1xf32>
    %1075 = arith.subf %1073, %1074 : vector<1x1xf32>
    %cst_80 = arith.constant 9.99999974E-6 : f32
    %1076 = vector.broadcast %cst_80 : f32 to vector<1x1xf32>
    %1077 = arith.addf %1075, %1076 : vector<1x1xf32>
    %1078 = math.rsqrt %1077 : vector<1x1xf32>
    %c235 = arith.constant 235 : index
    %1079 = memref.load %arg0[%c235] : memref<256xf32, #tpu.memory_space<smem>>
    %1080 = vector.broadcast %1079 : f32 to vector<1x1xf32>
    %1081 = arith.mulf %1078, %1080 : vector<1x1xf32>
    %1082 = vector.broadcast %1068 : vector<1x1xf32> to vector<1x128xf32>
    %1083 = arith.subf %804, %1082 : vector<1x128xf32>
    %1084 = vector.broadcast %1081 : vector<1x1xf32> to vector<1x128xf32>
    %1085 = arith.mulf %1083, %1084 : vector<1x128xf32>
    %c245 = arith.constant 245 : index
    %1086 = memref.load %arg0[%c245] : memref<256xf32, #tpu.memory_space<smem>>
    %1087 = vector.broadcast %1086 : f32 to vector<1x128xf32>
    %1088 = arith.addf %1085, %1087 : vector<1x128xf32>
    %cst_81 = arith.constant 0.000000e+00 : f32
    %1089 = vector.broadcast %cst_81 : f32 to vector<1x128xf32>
    %1090 = arith.select %2, %834, %1089 : vector<1x128xi1>, vector<1x128xf32>
    %cst_82 = arith.constant dense<0.000000e+00> : vector<1xf32>
    %1091 = vector.multi_reduction <add>, %1090, %cst_82 [1] : vector<1x128xf32> to vector<1xf32>
    %1092 = vector.shape_cast %1091 : vector<1xf32> to vector<1x1xf32>
    %cst_83 = arith.constant 1.250000e-01 : f32
    %1093 = vector.broadcast %cst_83 : f32 to vector<1x1xf32>
    %1094 = arith.mulf %1092, %1093 : vector<1x1xf32>
    %1095 = arith.mulf %1090, %1090 : vector<1x128xf32>
    %cst_84 = arith.constant dense<0.000000e+00> : vector<1xf32>
    %1096 = vector.multi_reduction <add>, %1095, %cst_84 [1] : vector<1x128xf32> to vector<1xf32>
    %1097 = vector.shape_cast %1096 : vector<1xf32> to vector<1x1xf32>
    %cst_85 = arith.constant 1.250000e-01 : f32
    %1098 = vector.broadcast %cst_85 : f32 to vector<1x1xf32>
    %1099 = arith.mulf %1097, %1098 : vector<1x1xf32>
    %1100 = arith.mulf %1094, %1094 : vector<1x1xf32>
    %1101 = arith.subf %1099, %1100 : vector<1x1xf32>
    %cst_86 = arith.constant 9.99999974E-6 : f32
    %1102 = vector.broadcast %cst_86 : f32 to vector<1x1xf32>
    %1103 = arith.addf %1101, %1102 : vector<1x1xf32>
    %1104 = math.rsqrt %1103 : vector<1x1xf32>
    %c236 = arith.constant 236 : index
    %1105 = memref.load %arg0[%c236] : memref<256xf32, #tpu.memory_space<smem>>
    %1106 = vector.broadcast %1105 : f32 to vector<1x1xf32>
    %1107 = arith.mulf %1104, %1106 : vector<1x1xf32>
    %1108 = vector.broadcast %1094 : vector<1x1xf32> to vector<1x128xf32>
    %1109 = arith.subf %834, %1108 : vector<1x128xf32>
    %1110 = vector.broadcast %1107 : vector<1x1xf32> to vector<1x128xf32>
    %1111 = arith.mulf %1109, %1110 : vector<1x128xf32>
    %c246 = arith.constant 246 : index
    %1112 = memref.load %arg0[%c246] : memref<256xf32, #tpu.memory_space<smem>>
    %1113 = vector.broadcast %1112 : f32 to vector<1x128xf32>
    %1114 = arith.addf %1111, %1113 : vector<1x128xf32>
    %cst_87 = arith.constant 0.000000e+00 : f32
    %1115 = vector.broadcast %cst_87 : f32 to vector<1x128xf32>
    %1116 = arith.select %2, %864, %1115 : vector<1x128xi1>, vector<1x128xf32>
    %cst_88 = arith.constant dense<0.000000e+00> : vector<1xf32>
    %1117 = vector.multi_reduction <add>, %1116, %cst_88 [1] : vector<1x128xf32> to vector<1xf32>
    %1118 = vector.shape_cast %1117 : vector<1xf32> to vector<1x1xf32>
    %cst_89 = arith.constant 1.250000e-01 : f32
    %1119 = vector.broadcast %cst_89 : f32 to vector<1x1xf32>
    %1120 = arith.mulf %1118, %1119 : vector<1x1xf32>
    %1121 = arith.mulf %1116, %1116 : vector<1x128xf32>
    %cst_90 = arith.constant dense<0.000000e+00> : vector<1xf32>
    %1122 = vector.multi_reduction <add>, %1121, %cst_90 [1] : vector<1x128xf32> to vector<1xf32>
    %1123 = vector.shape_cast %1122 : vector<1xf32> to vector<1x1xf32>
    %cst_91 = arith.constant 1.250000e-01 : f32
    %1124 = vector.broadcast %cst_91 : f32 to vector<1x1xf32>
    %1125 = arith.mulf %1123, %1124 : vector<1x1xf32>
    %1126 = arith.mulf %1120, %1120 : vector<1x1xf32>
    %1127 = arith.subf %1125, %1126 : vector<1x1xf32>
    %cst_92 = arith.constant 9.99999974E-6 : f32
    %1128 = vector.broadcast %cst_92 : f32 to vector<1x1xf32>
    %1129 = arith.addf %1127, %1128 : vector<1x1xf32>
    %1130 = math.rsqrt %1129 : vector<1x1xf32>
    %c237 = arith.constant 237 : index
    %1131 = memref.load %arg0[%c237] : memref<256xf32, #tpu.memory_space<smem>>
    %1132 = vector.broadcast %1131 : f32 to vector<1x1xf32>
    %1133 = arith.mulf %1130, %1132 : vector<1x1xf32>
    %1134 = vector.broadcast %1120 : vector<1x1xf32> to vector<1x128xf32>
    %1135 = arith.subf %864, %1134 : vector<1x128xf32>
    %1136 = vector.broadcast %1133 : vector<1x1xf32> to vector<1x128xf32>
    %1137 = arith.mulf %1135, %1136 : vector<1x128xf32>
    %c247 = arith.constant 247 : index
    %1138 = memref.load %arg0[%c247] : memref<256xf32, #tpu.memory_space<smem>>
    %1139 = vector.broadcast %1138 : f32 to vector<1x128xf32>
    %1140 = arith.addf %1137, %1139 : vector<1x128xf32>
    %cst_93 = arith.constant 0.000000e+00 : f32
    %1141 = vector.broadcast %cst_93 : f32 to vector<1x128xf32>
    %1142 = arith.select %2, %894, %1141 : vector<1x128xi1>, vector<1x128xf32>
    %cst_94 = arith.constant dense<0.000000e+00> : vector<1xf32>
    %1143 = vector.multi_reduction <add>, %1142, %cst_94 [1] : vector<1x128xf32> to vector<1xf32>
    %1144 = vector.shape_cast %1143 : vector<1xf32> to vector<1x1xf32>
    %cst_95 = arith.constant 1.250000e-01 : f32
    %1145 = vector.broadcast %cst_95 : f32 to vector<1x1xf32>
    %1146 = arith.mulf %1144, %1145 : vector<1x1xf32>
    %1147 = arith.mulf %1142, %1142 : vector<1x128xf32>
    %cst_96 = arith.constant dense<0.000000e+00> : vector<1xf32>
    %1148 = vector.multi_reduction <add>, %1147, %cst_96 [1] : vector<1x128xf32> to vector<1xf32>
    %1149 = vector.shape_cast %1148 : vector<1xf32> to vector<1x1xf32>
    %cst_97 = arith.constant 1.250000e-01 : f32
    %1150 = vector.broadcast %cst_97 : f32 to vector<1x1xf32>
    %1151 = arith.mulf %1149, %1150 : vector<1x1xf32>
    %1152 = arith.mulf %1146, %1146 : vector<1x1xf32>
    %1153 = arith.subf %1151, %1152 : vector<1x1xf32>
    %cst_98 = arith.constant 9.99999974E-6 : f32
    %1154 = vector.broadcast %cst_98 : f32 to vector<1x1xf32>
    %1155 = arith.addf %1153, %1154 : vector<1x1xf32>
    %1156 = math.rsqrt %1155 : vector<1x1xf32>
    %c238 = arith.constant 238 : index
    %1157 = memref.load %arg0[%c238] : memref<256xf32, #tpu.memory_space<smem>>
    %1158 = vector.broadcast %1157 : f32 to vector<1x1xf32>
    %1159 = arith.mulf %1156, %1158 : vector<1x1xf32>
    %1160 = vector.broadcast %1146 : vector<1x1xf32> to vector<1x128xf32>
    %1161 = arith.subf %894, %1160 : vector<1x128xf32>
    %1162 = vector.broadcast %1159 : vector<1x1xf32> to vector<1x128xf32>
    %1163 = arith.mulf %1161, %1162 : vector<1x128xf32>
    %c248 = arith.constant 248 : index
    %1164 = memref.load %arg0[%c248] : memref<256xf32, #tpu.memory_space<smem>>
    %1165 = vector.broadcast %1164 : f32 to vector<1x128xf32>
    %1166 = arith.addf %1163, %1165 : vector<1x128xf32>
    %cst_99 = arith.constant 0.000000e+00 : f32
    %1167 = vector.broadcast %cst_99 : f32 to vector<1x128xf32>
    %1168 = arith.select %2, %924, %1167 : vector<1x128xi1>, vector<1x128xf32>
    %cst_100 = arith.constant dense<0.000000e+00> : vector<1xf32>
    %1169 = vector.multi_reduction <add>, %1168, %cst_100 [1] : vector<1x128xf32> to vector<1xf32>
    %1170 = vector.shape_cast %1169 : vector<1xf32> to vector<1x1xf32>
    %cst_101 = arith.constant 1.250000e-01 : f32
    %1171 = vector.broadcast %cst_101 : f32 to vector<1x1xf32>
    %1172 = arith.mulf %1170, %1171 : vector<1x1xf32>
    %1173 = arith.mulf %1168, %1168 : vector<1x128xf32>
    %cst_102 = arith.constant dense<0.000000e+00> : vector<1xf32>
    %1174 = vector.multi_reduction <add>, %1173, %cst_102 [1] : vector<1x128xf32> to vector<1xf32>
    %1175 = vector.shape_cast %1174 : vector<1xf32> to vector<1x1xf32>
    %cst_103 = arith.constant 1.250000e-01 : f32
    %1176 = vector.broadcast %cst_103 : f32 to vector<1x1xf32>
    %1177 = arith.mulf %1175, %1176 : vector<1x1xf32>
    %1178 = arith.mulf %1172, %1172 : vector<1x1xf32>
    %1179 = arith.subf %1177, %1178 : vector<1x1xf32>
    %cst_104 = arith.constant 9.99999974E-6 : f32
    %1180 = vector.broadcast %cst_104 : f32 to vector<1x1xf32>
    %1181 = arith.addf %1179, %1180 : vector<1x1xf32>
    %1182 = math.rsqrt %1181 : vector<1x1xf32>
    %c239 = arith.constant 239 : index
    %1183 = memref.load %arg0[%c239] : memref<256xf32, #tpu.memory_space<smem>>
    %1184 = vector.broadcast %1183 : f32 to vector<1x1xf32>
    %1185 = arith.mulf %1182, %1184 : vector<1x1xf32>
    %1186 = vector.broadcast %1172 : vector<1x1xf32> to vector<1x128xf32>
    %1187 = arith.subf %924, %1186 : vector<1x128xf32>
    %1188 = vector.broadcast %1185 : vector<1x1xf32> to vector<1x128xf32>
    %1189 = arith.mulf %1187, %1188 : vector<1x128xf32>
    %c249 = arith.constant 249 : index
    %1190 = memref.load %arg0[%c249] : memref<256xf32, #tpu.memory_space<smem>>
    %1191 = vector.broadcast %1190 : f32 to vector<1x128xf32>
    %1192 = arith.addf %1189, %1191 : vector<1x128xf32>
    %cst_105 = arith.constant 0.000000e+00 : f32
    %1193 = vector.broadcast %cst_105 : f32 to vector<1x128xf32>
    %1194 = arith.select %2, %954, %1193 : vector<1x128xi1>, vector<1x128xf32>
    %cst_106 = arith.constant dense<0.000000e+00> : vector<1xf32>
    %1195 = vector.multi_reduction <add>, %1194, %cst_106 [1] : vector<1x128xf32> to vector<1xf32>
    %1196 = vector.shape_cast %1195 : vector<1xf32> to vector<1x1xf32>
    %cst_107 = arith.constant 1.250000e-01 : f32
    %1197 = vector.broadcast %cst_107 : f32 to vector<1x1xf32>
    %1198 = arith.mulf %1196, %1197 : vector<1x1xf32>
    %1199 = arith.mulf %1194, %1194 : vector<1x128xf32>
    %cst_108 = arith.constant dense<0.000000e+00> : vector<1xf32>
    %1200 = vector.multi_reduction <add>, %1199, %cst_108 [1] : vector<1x128xf32> to vector<1xf32>
    %1201 = vector.shape_cast %1200 : vector<1xf32> to vector<1x1xf32>
    %cst_109 = arith.constant 1.250000e-01 : f32
    %1202 = vector.broadcast %cst_109 : f32 to vector<1x1xf32>
    %1203 = arith.mulf %1201, %1202 : vector<1x1xf32>
    %1204 = arith.mulf %1198, %1198 : vector<1x1xf32>
    %1205 = arith.subf %1203, %1204 : vector<1x1xf32>
    %cst_110 = arith.constant 9.99999974E-6 : f32
    %1206 = vector.broadcast %cst_110 : f32 to vector<1x1xf32>
    %1207 = arith.addf %1205, %1206 : vector<1x1xf32>
    %1208 = math.rsqrt %1207 : vector<1x1xf32>
    %c240 = arith.constant 240 : index
    %1209 = memref.load %arg0[%c240] : memref<256xf32, #tpu.memory_space<smem>>
    %1210 = vector.broadcast %1209 : f32 to vector<1x1xf32>
    %1211 = arith.mulf %1208, %1210 : vector<1x1xf32>
    %1212 = vector.broadcast %1198 : vector<1x1xf32> to vector<1x128xf32>
    %1213 = arith.subf %954, %1212 : vector<1x128xf32>
    %1214 = vector.broadcast %1211 : vector<1x1xf32> to vector<1x128xf32>
    %1215 = arith.mulf %1213, %1214 : vector<1x128xf32>
    %c250 = arith.constant 250 : index
    %1216 = memref.load %arg0[%c250] : memref<256xf32, #tpu.memory_space<smem>>
    %1217 = vector.broadcast %1216 : f32 to vector<1x128xf32>
    %1218 = arith.addf %1215, %1217 : vector<1x128xf32>
    %cst_111 = arith.constant 0.000000e+00 : f32
    %1219 = vector.broadcast %cst_111 : f32 to vector<1x128xf32>
    %1220 = arith.select %2, %984, %1219 : vector<1x128xi1>, vector<1x128xf32>
    %cst_112 = arith.constant dense<0.000000e+00> : vector<1xf32>
    %1221 = vector.multi_reduction <add>, %1220, %cst_112 [1] : vector<1x128xf32> to vector<1xf32>
    %1222 = vector.shape_cast %1221 : vector<1xf32> to vector<1x1xf32>
    %cst_113 = arith.constant 1.250000e-01 : f32
    %1223 = vector.broadcast %cst_113 : f32 to vector<1x1xf32>
    %1224 = arith.mulf %1222, %1223 : vector<1x1xf32>
    %1225 = arith.mulf %1220, %1220 : vector<1x128xf32>
    %cst_114 = arith.constant dense<0.000000e+00> : vector<1xf32>
    %1226 = vector.multi_reduction <add>, %1225, %cst_114 [1] : vector<1x128xf32> to vector<1xf32>
    %1227 = vector.shape_cast %1226 : vector<1xf32> to vector<1x1xf32>
    %cst_115 = arith.constant 1.250000e-01 : f32
    %1228 = vector.broadcast %cst_115 : f32 to vector<1x1xf32>
    %1229 = arith.mulf %1227, %1228 : vector<1x1xf32>
    %1230 = arith.mulf %1224, %1224 : vector<1x1xf32>
    %1231 = arith.subf %1229, %1230 : vector<1x1xf32>
    %cst_116 = arith.constant 9.99999974E-6 : f32
    %1232 = vector.broadcast %cst_116 : f32 to vector<1x1xf32>
    %1233 = arith.addf %1231, %1232 : vector<1x1xf32>
    %1234 = math.rsqrt %1233 : vector<1x1xf32>
    %c241 = arith.constant 241 : index
    %1235 = memref.load %arg0[%c241] : memref<256xf32, #tpu.memory_space<smem>>
    %1236 = vector.broadcast %1235 : f32 to vector<1x1xf32>
    %1237 = arith.mulf %1234, %1236 : vector<1x1xf32>
    %1238 = vector.broadcast %1224 : vector<1x1xf32> to vector<1x128xf32>
    %1239 = arith.subf %984, %1238 : vector<1x128xf32>
    %1240 = vector.broadcast %1237 : vector<1x1xf32> to vector<1x128xf32>
    %1241 = arith.mulf %1239, %1240 : vector<1x128xf32>
    %c251 = arith.constant 251 : index
    %1242 = memref.load %arg0[%c251] : memref<256xf32, #tpu.memory_space<smem>>
    %1243 = vector.broadcast %1242 : f32 to vector<1x128xf32>
    %1244 = arith.addf %1241, %1243 : vector<1x128xf32>
    %1245 = tpu.concatenate %466, %492, %518, %544 in 0 : vector<1x128xf32>, vector<1x128xf32>, vector<1x128xf32>, vector<1x128xf32> -> vector<4x128xf32>
    %c0_117 = arith.constant 0 : index
    %c0_118 = arith.constant 0 : index
    %1246 = vector.load %arg2[%c0_117, %c0_118] : memref<4x128xf32, #tpu.memory_space<vmem>>, vector<4x128xf32>
    tpu.vector_store %arg2[%c0_117, %c0_118], %1245 {strides = array<i32>} : memref<4x128xf32, #tpu.memory_space<vmem>>, vector<4x128xf32>,
    %1247 = tpu.concatenate %1010, %1036, %1062, %1088, %1114, %1140, %1166, %1192, %1218, %1244 in 0 : vector<1x128xf32>, vector<1x128xf32>, vector<1x128xf32>, vector<1x128xf32>, vector<1x128xf32>, vector<1x128xf32>, vector<1x128xf32>, vector<1x128xf32>, vector<1x128xf32>, vector<1x128xf32> -> vector<10x128xf32>
    %c0_119 = arith.constant 0 : index
    %c0_120 = arith.constant 0 : index
    %1248 = vector.load %arg3[%c0_119, %c0_120] : memref<10x128xf32, #tpu.memory_space<vmem>>, vector<10x128xf32>
    tpu.vector_store %arg3[%c0_119, %c0_120], %1247 {strides = array<i32>} : memref<10x128xf32, #tpu.memory_space<vmem>>, vector<10x128xf32>,
    return
  }
}

</mosaic_0001>

<bundles_post_ra>
// kernel: tpu_custom_call.1
= control target key start
LH: loop header
LB: loop body
LE: loop exit
PB: predicated region body
PF: predicated region fallthrough
CT: control target
= control target key end

     0   :  { %s3160_s0 = inlined_call_operand.hbm [shape: f32[256], index: 0, kind: input, shape index: {}]   ;;  %s3161_s1 = inlined_call_operand.hbm [shape: f32[10,128], index: 1, kind: input, shape index: {}]   ;;  %s3162_s2 = inlined_call_operand.hbm [shape: f32[4,128], index: 2, kind: output, shape index: {0}]   ;;  %s3163_s3 = inlined_call_operand.hbm [shape: f32[10,128], index: 3, kind: output, shape index: {1}]  }
   0x1   :  { %3270 = sst [smem:[#allocation111_spill]] %s3162_s2 }
   0x2   :  { %3271 = sst [smem:[#allocation112_spill]] %s3163_s3 }
   0x3   :  { %9 = vsyncpa [#allocation5], 0 }
   0x4   :  { %10 = vsyncpa [#allocation3], 0 }
   0x5   :  { %11 = vsyncpa [#allocation4], 0 }
   0x6   :  { %12 = vsyncpa [#allocation9], 0  ;;  %s1586_s14 = scalar_lea.hbm %s3160_s0, 32 }
   0x7   :  { %p1587_p0 = scmp.ne.s32.totalorder %s3160_s0, %s1586_s14  ;;  %p1590_p1 = scmp.lt.u32.totalorder %s1586_s14, %s3160_s0 }
   0x9   :  { %p1592_p2 = pnand %p1590_p1, %p1587_p0 }
   0xb   :  { %1595 = shalt.err (!%p1592_p2)
}
   0xc   :  { %s1670_s19 = smov [#allocation2]   ;;  %s1671_s22 = smov [#allocation6]  }
   0xd   :  { %20 = dma.hbm_to_smem %s3160_s0, 32, %s1670_s19, [#allocation5]  }
   0xe   :  { %s26_s23 = sshll.u32 %s1671_s22, 4  ;;  %s1596_s26 = scalar_lea.hbm %s3161_s1, 256  ;;  %s27_s23 = int_to_ptr.vmem [resolvable:$true] %s26_s23 }
   0xf   :  { %p1597_p3 = scmp.ne.s32.totalorder %s3161_s1, %s1596_s26  ;;  %p1600_p4 = scmp.lt.u32.totalorder %s1596_s26, %s3161_s1 }
  0x11   :  { %p1602_p5 = pnand %p1600_p4, %p1597_p3 }
  0x13   :  { %1605 = shalt.err (!%p1602_p5)
}
  0x14   :  { %s1606_s4 = scalar_lea.vmem %s27_s23, 256  ;;  %p1611_p7 = scmp.lt.s32.totalorder %s27_s23, %s27_s23 }
  0x15   :  { %p1607_p6 = scmp.ne.s32.totalorder %s27_s23, %s1606_s4  ;;  %p1612_p8 = scmp.lt.s32.totalorder %s1606_s4, %s1606_s4 }
  0x17   :  { %p1613_p9 = por %p1612_p8, %p1611_p7 }
  0x19   :  { %p1614_p10 = pnand %p1613_p9, %p1607_p6 }
  0x1b   :  { %1617 = shalt.err (!%p1614_p10)
}
  0x1c   :  { %s3164_s0 = smov 128   ;;  %s3165_s5 = smov 8  }
  0x1d   :  { %32 = dma.hbm_to_vmem [thread:$0]  %s3161_s1, 256, %s27_s23, [#allocation3], %s3164_s0, %s3164_s0, %s3165_s5  }
  0x1e   :  { %1662 = dma.done.wait [#allocation5], 32  }
  0x1f   :  { %1663 = vsyncadd [#allocation5], 4294967264 }
  0x20   :  { %1664 = dma.done.wait [#allocation3], 256  }
  0x21   :  { %1665 = vsyncadd [#allocation3], 4294967040 }
  0x22   :  { %39 = sfence }
  0x23   :  { %s53_s8 = sld [smem:[#allocation2]]  ;;  %s1301_s9 = sld [smem:[#allocation2 + $0x1]]  ;;  %v1723_v0 = vld [vmem:[#allocation6] sm:$0x1]  ;;  %v1729_v1 = vld [vmem:[#allocation6 + $0x1] sm:$0x1]  ;;  %v40_v3 = vlaneseq }
  0x24   :  { %s1302_s10 = sld [smem:[#allocation2 + $0x2]]  ;;  %s1725_s11 = sld [smem:[#allocation2 + $0x3]]  ;;  %v1735_v2 = vld [vmem:[#allocation6 + $0x2] sm:$0x1]  ;;  %v1741_v4 = vld [vmem:[#allocation6 + $0x3] sm:$0x1] }
  0x25   :  { %s1727_s12 = sld [smem:[#allocation2 + $0x4]]  ;;  %s1731_s13 = sld [smem:[#allocation2 + $0x5]]  ;;  %v1743_v5 = vld [vmem:[#allocation6 + $0x4] sm:$0x1]  ;;  %v1749_v6 = vld [vmem:[#allocation6 + $0x5] sm:$0x1] }
  0x26   :  { %s1733_s14 = sld [smem:[#allocation2 + $0x6]]  ;;  %s1737_s1 = sld [smem:[#allocation2 + $0x7]]  ;;  %v1755_v8 = vld [vmem:[#allocation6 + $0x6] sm:$0x1]  ;;  %v1762_v12 = vld [vmem:[#allocation6 + $0x7] sm:$0x1] }
  0x27   :  { %s1739_s15 = sld [smem:[#allocation2 + $0x8]]  ;;  %s1745_s16 = sld [smem:[#allocation2 + $0x9]]  ;;  %v1772_v17 = vand.u32 127, %v40_v3  ;;  %v1787_v24 = vld [vmem:[#allocation6 + $0x8] sm:$0x1]  ;;  %vm475_vm0 = vcmask 1040384  }
  0x28   :  { %s1747_s17 = sld [smem:[#allocation2 + $0x46]]  ;;  %s1751_s18 = sld [smem:[#allocation2 + $0xa]]  ;;  %v1802_v33 = vld [vmem:[#allocation6 + $0x9] sm:$0x1]  ;;  %vm1226_vm2 = vcmask 1041408   ;;  %vm1228_vm3 = vcmask 1042432  }
  0x29   :  { %v54_v7 = vstv %s53_s8  ;;  %s1753_s19 = sld [smem:[#allocation2 + $0xb]]  ;;  %v57_v10 = vstv %s1301_s9  ;;  %s1758_s20 = sld [smem:[#allocation2 + $0xc]]  ;;  %vm42_vm1 = vcmp.lt.s32.totalorder %v1772_v17, 8 }
  0x2a   :  { %v55_v9 = vmul.f32 %v54_v7, %v1723_v0  ;;  %v61_v11 = vstv %s1302_s10  ;;  %s1760_s21 = sld [smem:[#allocation2 + $0xd]]  ;;  %v58_v13 = vmul.f32 %v57_v10, %v1729_v1  ;;  %v65_v15 = vstv %s1725_s11  ;;  %s1768_s22 = sld [smem:[#allocation2 + $0xe]] }
  0x2b   :  { %v62_v14 = vmul.f32 %v61_v11, %v1735_v2  ;;  %v69_v16 = vstv %s1727_s12  ;;  %s1770_s23 = sld [smem:[#allocation2 + $0xf]]  ;;  %v73_v18 = vstv %s1731_s13  ;;  %s1776_s24 = sld [smem:[#allocation2 + $0x10]]  ;;  %v66_v21 = vmul.f32 %v65_v15, %v1741_v4 }
  0x2c   :  { %v77_v19 = vstv %s1733_s14  ;;  %s1778_s25 = sld [smem:[#allocation2 + $0x11]]  ;;  %v59_v20 = vadd.f32 %v58_v13, %v55_v9  ;;  %v70_v22 = vmul.f32 %v69_v16, %v1743_v5  ;;  %v81_v23 = vstv %s1737_s1  ;;  %s1783_s26 = sld [smem:[#allocation2 + $0x12]] }
  0x2d   :  { %s1785_s27 = sld [smem:[#allocation2 + $0x13]]  ;;  %v74_v25 = vmul.f32 %v73_v18, %v1749_v6  ;;  %v78_v26 = vmul.f32 %v77_v19, %v1755_v8  ;;  %v82_v27 = vmul.f32 %v81_v23, %v1762_v12  ;;  %v85_v28 = vstv %s1739_s15  ;;  %s1793_s28 = sld [smem:[#allocation2 + $0x14]] }
  0x2e   :  { %v63_v29 = vadd.f32 %v62_v14, %v59_v20  ;;  %v89_v30 = vstv %s1745_s16  ;;  %v93_v31 = vstv %s1747_s17  ;;  %v97_v32 = vstv %s1751_s18  ;;  %s1798_s29 = sld [smem:[#allocation2 + $0x15]]  ;;  %s1800_s30 = sld [smem:[#allocation2 + $0x16]] }
  0x2f   :  { %v98_v34 = vmul.f32 %v97_v32, %v1723_v0  ;;  %v100_v35 = vstv %s1753_s19  ;;  %v104_v36 = vstv %s1758_s20  ;;  %s1808_s4 = sld [smem:[#allocation2 + $0x17]]  ;;  %s1810_s6 = sld [smem:[#allocation2 + $0x18]]  ;;  %v86_v39 = vmul.f32 %v85_v28, %v1787_v24 }
  0x30   :  { %v108_v37 = vstv %s1760_s21  ;;  %v67_v38 = vadd.f32 %v66_v21, %v63_v29  ;;  %v101_v40 = vmul.f32 %v100_v35, %v1729_v1  ;;  %v105_v41 = vmul.f32 %v104_v36, %v1735_v2  ;;  %s1815_s7 = sld [smem:[#allocation2 + $0x47]]  ;;  %s1817_s8 = sld [smem:[#allocation2 + $0x19]] }
  0x31   :  { %v112_v42 = vstv %s1768_s22  ;;  %v116_v43 = vstv %s1770_s23  ;;  %v120_v44 = vstv %s1776_s24  ;;  %s1823_s9 = sld [smem:[#allocation2 + $0x1a]]  ;;  %s1825_s10 = sld [smem:[#allocation2 + $0x1b]]  ;;  %v90_v47 = vmul.f32 %v89_v30, %v1802_v33 }
  0x32   :  { %v124_v45 = vstv %s1778_s25  ;;  %v71_v46 = vadd.f32 %v70_v22, %v67_v38  ;;  %v102_v48 = vadd.f32 %v101_v40, %v98_v34  ;;  %v109_v49 = vmul.f32 %v108_v37, %v1741_v4  ;;  %s1833_s11 = sld [smem:[#allocation2 + $0x1c]]  ;;  %s1835_s12 = sld [smem:[#allocation2 + $0x1d]] }
  0x33   :  { %v113_v50 = vmul.f32 %v112_v42, %v1743_v5  ;;  %v117_v51 = vmul.f32 %v116_v43, %v1749_v6  ;;  %v121_v52 = vmul.f32 %v120_v44, %v1755_v8  ;;  %v128_v53 = vstv %s1783_s26  ;;  %s1839_s13 = sld [smem:[#allocation2 + $0x48]]  ;;  %s1841_s14 = sld [smem:[#allocation2 + $0x1e]] }
  0x34   :  { %v75_v54 = vadd.f32 %v74_v25, %v71_v46  ;;  %v106_v55 = vadd.f32 %v105_v41, %v102_v48  ;;  %v125_v56 = vmul.f32 %v124_v45, %v1762_v12  ;;  %v132_v57 = vstv %s1785_s27  ;;  %s1847_s1 = sld [smem:[#allocation2 + $0x1f]]  ;;  %s1849_s15 = sld [smem:[#allocation2 + $0x20]] }
  0x35   :  { %v129_v58 = vmul.f32 %v128_v53, %v1787_v24  ;;  %v140_v59 = vstv %s1793_s28  ;;  %v143_v60 = vstv %s1798_s29  ;;  %v147_v61 = vstv %s1800_s30  ;;  %s1857_s16 = sld [smem:[#allocation2 + $0x21]]  ;;  %s1859_s18 = sld [smem:[#allocation2 + $0x22]] }
  0x36   :  { %v79_v62 = vadd.f32 %v78_v26, %v75_v54  ;;  %v110_v63 = vadd.f32 %v109_v49, %v106_v55  ;;  %v141_v3 = vmul.f32 %v140_v59, %v1723_v0  ;;  %v144_v7 = vmul.f32 %v143_v60, %v1729_v1  ;;  %s1866_s19 = sld [smem:[#allocation2 + $0x23]]  ;;  %s1868_s20 = sld [smem:[#allocation2 + $0x24]] }
  0x37   :  { %v148_v9 = vmul.f32 %v147_v61, %v1735_v2  ;;  %v151_v10 = vstv %s1808_s4  ;;  %v155_v11 = vstv %s1810_s6  ;;  %v159_v13 = vstv %s1817_s8  ;;  %s1871_s21 = sld [smem:[#allocation2 + $0x25]]  ;;  %s1877_s22 = sld [smem:[#allocation2 + $0x26]] }
  0x38   :  { %v83_v14 = vadd.f32 %v82_v27, %v79_v62  ;;  %v114_v15 = vadd.f32 %v113_v50, %v110_v63  ;;  %v145_v16 = vadd.f32 %v144_v7, %v141_v3  ;;  %v152_v18 = vmul.f32 %v151_v10, %v1741_v4  ;;  %s1879_s23 = sld [smem:[#allocation2 + $0x27]]  ;;  %s1886_s24 = sld [smem:[#allocation2 + $0x28]] }
  0x39   :  { %v133_v19 = vmul.f32 %v132_v57, %v1802_v33  ;;  %v136_v20 = vstv %s1815_s7  ;;  %v163_v21 = vstv %s1823_s9  ;;  %v167_v22 = vstv %s1825_s10  ;;  %s1891_s25 = sld [smem:[#allocation2 + $0x29]]  ;;  %s1897_s26 = sld [smem:[#allocation2 + $0x2a]] }
  0x3a   :  { %v87_v23 = vadd.f32 %v86_v39, %v83_v14  ;;  %v118_v25 = vadd.f32 %v117_v51, %v114_v15  ;;  %v149_v26 = vadd.f32 %v148_v9, %v145_v16  ;;  %v156_v27 = vmul.f32 %v155_v11, %v1743_v5  ;;  %s1899_s27 = sld [smem:[#allocation2 + $0x2b]]  ;;  %s1903_s17 = sld [smem:[#allocation2 + $0x49]] }
  0x3b   :  { %v160_v28 = vmul.f32 %v159_v13, %v1749_v6  ;;  %v164_v29 = vmul.f32 %v163_v21, %v1755_v8  ;;  %v168_v30 = vmul.f32 %v167_v22, %v1762_v12  ;;  %v171_v32 = vstv %s1833_s11  ;;  %s1905_s28 = sld [smem:[#allocation2 + $0x2c]]  ;;  %s1910_s29 = sld [smem:[#allocation2 + $0x2d]] }
  0x3c   :  { %v91_v34 = vadd.f32 %v90_v47, %v87_v23  ;;  %v122_v35 = vadd.f32 %v121_v52, %v118_v25  ;;  %v153_v36 = vadd.f32 %v152_v18, %v149_v26  ;;  %v175_v37 = vstv %s1835_s12  ;;  %s1915_s30 = sld [smem:[#allocation2 + $0x2e]]  ;;  %s1917_s4 = sld [smem:[#allocation2 + $0x2f]] }
  0x3d   :  { %v179_v38 = vstv %s1839_s13  ;;  %v183_v39 = vstv %s1841_s14  ;;  %v186_v40 = vstv %s1847_s1  ;;  %v190_v41 = vstv %s1849_s15  ;;  %s1922_s6 = sld [smem:[#allocation2 + $0x30]]  ;;  %s1926_s7 = sld [smem:[#allocation2 + $0x31]] }
  0x3e   :  { %v94_v42 = vadd.f32 %v93_v31, %v91_v34  ;;  %v126_v43 = vadd.f32 %v125_v56, %v122_v35  ;;  %v157_v44 = vadd.f32 %v156_v27, %v153_v36  ;;  %v184_v45 = vmul.f32 %v183_v39, %v1723_v0  ;;  %s1928_s8 = sld [smem:[#allocation2 + $0x4a]]  ;;  %s1935_s10 = sld [smem:[#allocation2 + $0x33]] }
  0x3f   :  { %v187_v46 = vmul.f32 %v186_v40, %v1729_v1  ;;  %v191_v47 = vmul.f32 %v190_v41, %v1735_v2  ;;  %v194_v48 = vstv %s1857_s16  ;;  %v198_v49 = vstv %s1859_s18  ;;  %s1933_s9 = sld [smem:[#allocation2 + $0x32]]  ;;  %s1940_s11 = sld [smem:[#allocation2 + $0x34]] }
  0x40   :  { %v130_v50 = vadd.f32 %v129_v58, %v126_v43  ;;  %v161_v31 = vadd.f32 %v160_v28, %v157_v44  ;;  %v172_v51 = vmul.f32 %v171_v32, %v1787_v24  ;;  %v176_v52 = vmul.f32 %v175_v37, %v1802_v33  ;;  %s1942_s12 = sld [smem:[#allocation2 + $0x35]]  ;;  %s1950_s14 = sld [smem:[#allocation2 + $0x36]] }
  0x41   :  { %v188_v53 = vadd.f32 %v187_v46, %v184_v45  ;;  %v195_v54 = vmul.f32 %v194_v48, %v1741_v4  ;;  %v202_v55 = vstv %s1866_s19  ;;  %v206_v56 = vstv %s1868_s20  ;;  %s1952_s1 = sld [smem:[#allocation2 + $0x37]]  ;;  %s1956_s15 = sld [smem:[#allocation2 + $0x38]] }
  0x42   :  { %v1912_v57 = vmax.f32 %v94_v42, 0.0  ;;  %v134_v58 = vadd.f32 %v133_v19, %v130_v50  ;;  %v165_v59 = vadd.f32 %v164_v29, %v161_v31  ;;  %v199_v60 = vmul.f32 %v198_v49, %v1743_v5  ;;  %s1964_s16 = sld [smem:[#allocation2 + $0x39]]  ;;  %s1966_s18 = sld [smem:[#allocation2 + $0x3a]] }
  0x43   :  { %v192_v61 = vadd.f32 %v191_v47, %v188_v53  ;;  %v210_v62 = vstv %s1871_s21  ;;  %v214_v63 = vstv %s1877_s22  ;;  %v218_v3 = vstv %s1879_s23  ;;  %s1975_s13 = sld [smem:[#allocation2 + $0x3b]]  ;;  %s1981_s20 = sld [smem:[#allocation2 + $0x3c]] }
  0x44   :  { %v137_v7 = vadd.f32 %v136_v20, %v134_v58  ;;  %v169_v9 = vadd.f32 %v168_v30, %v165_v59  ;;  %v203_v10 = vmul.f32 %v202_v55, %v1749_v6  ;;  %v207_v11 = vmul.f32 %v206_v56, %v1755_v8  ;;  %s1977_s19 = sld [smem:[#allocation2 + $0x4b]]  ;;  %s1983_s21 = sld [smem:[#allocation2 + $0x3d]] }
  0x45   :  { %v196_v13 = vadd.f32 %v195_v54, %v192_v61  ;;  %v211_v14 = vmul.f32 %v210_v62, %v1762_v12  ;;  %v215_v15 = vmul.f32 %v214_v63, %v1787_v24  ;;  %v226_v16 = vstv %s1886_s24  ;;  %s1989_s22 = sld [smem:[#allocation2 + $0x3e]]  ;;  %s1991_s23 = sld [smem:[#allocation2 + $0x3f]] }
  0x46   :  { %v173_v18 = vadd.f32 %v172_v51, %v169_v9  ;;  %v219_v19 = vmul.f32 %v218_v3, %v1802_v33  ;;  %v227_v20 = vmul.f32 %v226_v16, %v1723_v0  ;;  %v229_v21 = vstv %s1891_s25  ;;  %s1999_s24 = sld [smem:[#allocation2 + $0x40]]  ;;  %s2002_s25 = sld [smem:[#allocation2 + $0x41]] }
  0x47   :  { %v200_v22 = vadd.f32 %v199_v60, %v196_v13  ;;  %v230_v23 = vmul.f32 %v229_v21, %v1729_v1  ;;  %v233_v25 = vstv %s1897_s26  ;;  %v237_v26 = vstv %s1899_s27  ;;  %s2004_s26 = sld [smem:[#allocation2 + $0x42]]  ;;  %s2010_s27 = sld [smem:[#allocation2 + $0x43]] }
  0x48   :  { %v177_v27 = vadd.f32 %v176_v52, %v173_v18  ;;  %v222_v28 = vstv %s1903_s17  ;;  %v234_v29 = vmul.f32 %v233_v25, %v1735_v2  ;;  %v241_v30 = vstv %s1905_s28  ;;  %s2012_s28 = sld [smem:[#allocation2 + $0x44]]  ;;  %s2033_s17 = sld [smem:[#allocation2 + $0x4f]] }
  0x49   :  { %v204_v32 = vadd.f32 %v203_v10, %v200_v22  ;;  %v231_v34 = vadd.f32 %v230_v23, %v227_v20  ;;  %v238_v35 = vmul.f32 %v237_v26, %v1741_v4  ;;  %v245_v36 = vstv %s1910_s29  ;;  %s2021_s29 = sld [smem:[#allocation2 + $0x45]]  ;;  %s2259_s0 = sld [smem:[#allocation2 + $0x8f]] }
  0x4a   :  { %v1958_v37 = vmax.f32 %v137_v7, 0.0  ;;  %v180_v39 = vadd.f32 %v179_v38, %v177_v27  ;;  %v249_v40 = vstv %s1915_s30  ;;  %v253_v41 = vstv %s1917_s4  ;;  %s2025_s30 = sld [smem:[#allocation2 + $0x4d]]  ;;  %s2027_s4 = sld [smem:[#allocation2 + $0x4e]] }
  0x4b   :  { %v208_v42 = vadd.f32 %v207_v11, %v204_v32  ;;  %v235_v43 = vadd.f32 %v234_v29, %v231_v34  ;;  %v242_v44 = vmul.f32 %v241_v30, %v1743_v5  ;;  %v246_v45 = vmul.f32 %v245_v36, %v1749_v6  ;;  %s2261_s5 = sld [smem:[#allocation2 + $0x74]]  ;;  %s2263_s3 = sld [smem:[#allocation2 + $0x78]] }
  0x4c   :  { %v1970_v46 = vmax.f32 %v180_v39, 0.0  ;;  %v250_v38 = vmul.f32 %v249_v40, %v1755_v8  ;;  %v254_v47 = vmul.f32 %v253_v41, %v1762_v12  ;;  %v257_v48 = vstv %s1922_s6  ;;  %s2035_s6 = sld [smem:[#allocation2 + $0x50]]  ;;  %s2265_s2 = sld [smem:[#allocation2 + $0x7c]] }
  0x4d   :  { %v212_v49 = vadd.f32 %v211_v14, %v208_v42  ;;  %v239_v50 = vadd.f32 %v238_v35, %v235_v43  ;;  %v261_v31 = vstv %s1926_s7  ;;  %v265_v51 = vstv %s1928_s8  ;;  %s2044_s7 = sld [smem:[#allocation2 + $0x4c]]  ;;  %s2068_s8 = sld [smem:[#allocation2 + $0x57]] }
  0x4e   :  { %v269_v52 = vstv %s1933_s9  ;;  %v272_v53 = vstv %s1935_s10  ;;  %v276_v54 = vstv %s1940_s11  ;;  %v280_v55 = vstv %s1942_s12  ;;  %s2046_s9 = sld [smem:[#allocation2 + $0x51]]  ;;  %s2049_s10 = sld [smem:[#allocation2 + $0x52]] }
  0x4f   :  { %v216_v56 = vadd.f32 %v215_v15, %v212_v49  ;;  %v243_v58 = vadd.f32 %v242_v44, %v239_v50  ;;  %v270_v59 = vmul.f32 %v269_v52, %v1723_v0  ;;  %v273_v60 = vmul.f32 %v272_v53, %v1729_v1  ;;  %s2055_s11 = sld [smem:[#allocation2 + $0x54]]  ;;  %s2057_s12 = sld [smem:[#allocation2 + $0x55]] }
  0x50   :  { %v258_v61 = vmul.f32 %v257_v48, %v1787_v24  ;;  %v277_v62 = vmul.f32 %v276_v54, %v1735_v2  ;;  %v284_v63 = vstv %s1950_s14  ;;  %v288_v3 = vstv %s1952_s1  ;;  %s2062_s14 = sld [smem:[#allocation2 + $0x56]]  ;;  %s2070_s1 = sld [smem:[#allocation2 + $0x58]] }
  0x51   :  { %v220_v7 = vadd.f32 %v219_v19, %v216_v56  ;;  %v247_v9 = vadd.f32 %v246_v45, %v243_v58  ;;  %v274_v10 = vadd.f32 %v273_v60, %v270_v59  ;;  %v281_v11 = vmul.f32 %v280_v55, %v1741_v4  ;;  %3299 = sst [smem:[#allocation41_spill]] %s2259_s0 }
  0x52   :  { %v262_v13 = vmul.f32 %v261_v31, %v1802_v33  ;;  %v292_v14 = vstv %s1956_s15  ;;  %v296_v15 = vstv %s1964_s16  ;;  %v300_v16 = vstv %s1966_s18  ;;  %s2079_s15 = sld [smem:[#allocation2 + $0x53]]  ;;  %s2081_s16 = sld [smem:[#allocation2 + $0x59]] }
  0x53   :  { %v251_v18 = vadd.f32 %v250_v38, %v247_v9  ;;  %v278_v19 = vadd.f32 %v277_v62, %v274_v10  ;;  %v285_v20 = vmul.f32 %v284_v63, %v1743_v5  ;;  %v289_v21 = vmul.f32 %v288_v3, %v1749_v6  ;;  %s2085_s18 = sld [smem:[#allocation2 + $0x69]]  ;;  %3300 = sst [smem:[#allocation42_spill]] %s2261_s5 }
  0x54   :  { %v223_v22 = vadd.f32 %v222_v28, %v220_v7  ;;  %v293_v23 = vmul.f32 %v292_v14, %v1755_v8  ;;  %v297_v25 = vmul.f32 %v296_v15, %v1762_v12  ;;  %v301_v26 = vmul.f32 %v300_v16, %v1787_v24  ;;  %3301 = sst [smem:[#allocation43_spill]] %s2263_s3  ;;  %s2281_s0 = sld [smem:[#allocation2 + $0x93]] }
  0x55   :  { %v255_v27 = vadd.f32 %v254_v47, %v251_v18  ;;  %v282_v29 = vadd.f32 %v281_v11, %v278_v19  ;;  %v304_v30 = vstv %s1975_s13  ;;  %v308_v32 = vstv %s1977_s19  ;;  %s2091_s13 = sld [smem:[#allocation2 + $0x5b]]  ;;  %s2125_s19 = sld [smem:[#allocation2 + $0x62]] }
  0x56   :  { %v312_v34 = vstv %s1981_s20  ;;  %v315_v35 = vstv %s1983_s21  ;;  %v319_v28 = vstv %s1989_s22  ;;  %v323_v36 = vstv %s1991_s23  ;;  %s2094_s20 = sld [smem:[#allocation2 + $0x5a]]  ;;  %s2096_s21 = sld [smem:[#allocation2 + $0x5c]] }
  0x57   :  { %v259_v39 = vadd.f32 %v258_v61, %v255_v27  ;;  %v286_v40 = vadd.f32 %v285_v20, %v282_v29  ;;  %v313_v41 = vmul.f32 %v312_v34, %v1723_v0  ;;  %v316_v42 = vmul.f32 %v315_v35, %v1729_v1  ;;  %s2102_s22 = sld [smem:[#allocation2 + $0x5d]]  ;;  %s2104_s23 = sld [smem:[#allocation2 + $0x5e]] }
  0x58   :  { %v2039_v43 = vmax.f32 %v223_v22, 0.0  ;;  %v320_v44 = vmul.f32 %v319_v28, %v1735_v2  ;;  %v324_v45 = vmul.f32 %v323_v36, %v1741_v4  ;;  %v327_v38 = vstv %s1999_s24  ;;  %s2109_s24 = sld [smem:[#allocation2 + $0x6a]]  ;;  %3302 = sst [smem:[#allocation44_spill]] %s2265_s2 }
  0x59   :  { %v263_v47 = vadd.f32 %v262_v13, %v259_v39  ;;  %v290_v48 = vadd.f32 %v289_v21, %v286_v40  ;;  %v317_v49 = vadd.f32 %v316_v42, %v313_v41  ;;  %v331_v50 = vstv %s2002_s25  ;;  %s2111_s25 = sld [smem:[#allocation2 + $0x5f]]  ;;  %s2283_s5 = sld [smem:[#allocation2 + $0x94]] }
  0x5a   :  { %v305_v0 = vmul.f32 %v304_v30, %v1802_v33  ;;  %v335_v1 = vstv %s2004_s26  ;;  %v339_v31 = vstv %s2010_s27  ;;  %v343_v52 = vstv %s2012_s28  ;;  %s2117_s26 = sld [smem:[#allocation2 + $0x60]]  ;;  %s2127_s27 = sld [smem:[#allocation2 + $0x63]] }
  0x5b   :  { %v266_v2 = vadd.f32 %v265_v51, %v263_v47  ;;  %v294_v4 = vadd.f32 %v293_v23, %v290_v48  ;;  %v321_v53 = vadd.f32 %v320_v44, %v317_v49  ;;  %v328_v54 = vmul.f32 %v327_v38, %v1743_v5  ;;  %s2131_s28 = sld [smem:[#allocation2 + $0x61]]  ;;  %3310 = sst [smem:[#allocation52_spill]] %s2281_s0 }
  0x5c   :  { %v332_v55 = vmul.f32 %v331_v50, %v1749_v6  ;;  %v336_v56 = vmul.f32 %v335_v1, %v1755_v8  ;;  %v340_v58 = vmul.f32 %v339_v31, %v1762_v12  ;;  %v344_v59 = vmul.f32 %v343_v52, %v1787_v24  ;;  %s2285_s3 = sld [smem:[#allocation2 + $0x95]]  ;;  %s2309_s0 = sld [smem:[#allocation2 + $0xa1]] }
  0x5d   :  { %v2072_v51 = vmax.f32 %v266_v2, 0.0  ;;  %v298_v60 = vadd.f32 %v297_v25, %v294_v4  ;;  %v325_v61 = vadd.f32 %v324_v45, %v321_v53  ;;  %v347_v5 = vstv %s2021_s29  ;;  %s2136_s29 = sld [smem:[#allocation2 + $0x64]] }
  0x5e   :  { %v355_v62 = vstv %s2025_s30  ;;  %v358_v63 = vstv %s2027_s4  ;;  %v362_v6 = vstv %s2033_s17  ;;  %v366_v3 = vstv %s2035_s6  ;;  %s2138_s30 = sld [smem:[#allocation2 + $0x65]]  ;;  %s2146_s4 = sld [smem:[#allocation2 + $0x66]] }
  0x5f   :  { %v302_v8 = vadd.f32 %v301_v26, %v298_v60  ;;  %v329_v12 = vadd.f32 %v328_v54, %v325_v61  ;;  %v356_v24 = vmul.f32 %v355_v62, %v1912_v57  ;;  %v359_v7 = vmul.f32 %v358_v63, %v1958_v37  ;;  %s2153_s17 = sld [smem:[#allocation2 + $0x67]]  ;;  %s2157_s6 = sld [smem:[#allocation2 + $0x6b]] }
  0x60   :  { %v348_v9 = vmul.f32 %v347_v5, %v1802_v33  ;;  %v351_v10 = vstv %s2044_s7  ;;  %v363_v11 = vmul.f32 %v362_v6, %v1970_v46  ;;  %v370_v13 = vstv %s2046_s9  ;;  %s2161_s7 = sld [smem:[#allocation2 + $0x68]]  ;;  %s1408_s9 = sld [smem:[#allocation2 + $0x6c]] }
  0x61   :  { %v306_v14 = vadd.f32 %v305_v0, %v302_v8  ;;  %v333_v15 = vadd.f32 %v332_v55, %v329_v12  ;;  %v360_v16 = vadd.f32 %v359_v7, %v356_v24  ;;  %v367_v18 = vmul.f32 %v366_v3, %v2039_v43  ;;  %3311 = sst [smem:[#allocation53_spill]] %s2283_s5  ;;  %s2299_s5 = sld [smem:[#allocation2 + $0xaa]] }
  0x62   :  { %v371_v33 = vmul.f32 %v370_v13, %v2072_v51  ;;  %v374_v19 = vstv %s2049_s10  ;;  %v385_v20 = vstv %s2055_s11  ;;  %v388_v21 = vstv %s2057_s12  ;;  %s2205_s10 = sld [smem:[#allocation2 + $0x6d]]  ;;  %s2207_s11 = sld [smem:[#allocation2 + $0x71]] }
  0x63   :  { %v309_v22 = vadd.f32 %v308_v32, %v306_v14  ;;  %v337_v23 = vadd.f32 %v336_v56, %v333_v15  ;;  %v364_v25 = vadd.f32 %v363_v11, %v360_v16  ;;  %v386_v26 = vmul.f32 %v385_v20, %v1912_v57  ;;  %s2209_s12 = sld [smem:[#allocation2 + $0x75]]  ;;  %3312 = sst [smem:[#allocation54_spill]] %s2285_s3 }
  0x64   :  { %v389_v27 = vmul.f32 %v388_v21, %v1958_v37  ;;  %v392_v29 = vstv %s2062_s14  ;;  %v396_v30 = vstv %s2068_s8  ;;  %v400_v34 = vstv %s2070_s1  ;;  %s2211_s14 = sld [smem:[#allocation2 + $0x79]]  ;;  %s2213_s8 = sld [smem:[#allocation2 + $0x7d]] }
  0x65   :  { %v2119_v35 = vmax.f32 %v309_v22, 0.0  ;;  %v341_v32 = vadd.f32 %v340_v58, %v337_v23  ;;  %v368_v28 = vadd.f32 %v367_v18, %v364_v25  ;;  %v393_v36 = vmul.f32 %v392_v29, %v1970_v46  ;;  %s2215_s1 = sld [smem:[#allocation2 + $0x81]]  ;;  %s2301_s3 = sld [smem:[#allocation2 + $0xab]] }
  0x66   :  { %v378_v39 = vstv %s2079_s15  ;;  %v390_v40 = vadd.f32 %v389_v27, %v386_v26  ;;  %v397_v41 = vmul.f32 %v396_v30, %v2039_v43  ;;  %v404_v42 = vstv %s2081_s16  ;;  %s2217_s15 = sld [smem:[#allocation2 + $0x85]]  ;;  %s2219_s16 = sld [smem:[#allocation2 + $0x89]] }
  0x67   :  { %v345_v44 = vadd.f32 %v344_v59, %v341_v32  ;;  %v372_v45 = vadd.f32 %v371_v33, %v368_v28  ;;  %v382_v38 = vstv %s2085_s18  ;;  %v401_v47 = vmul.f32 %v400_v34, %v2072_v51  ;;  %s2221_s18 = sld [smem:[#allocation2 + $0x8d]]  ;;  %3319 = sst [smem:[#allocation61_spill]] %s2299_s5 }
  0x68   :  { %v375_v48 = vmul.f32 %v374_v19, %v2119_v35  ;;  %v394_v49 = vadd.f32 %v393_v36, %v390_v40  ;;  %v405_v50 = vmul.f32 %v404_v42, %v2119_v35  ;;  %v415_v0 = vstv %s2091_s13  ;;  %3272 = sst [smem:[#allocation14_spill]] %s2205_s10  ;;  %s2223_s13 = sld [smem:[#allocation2 + $0x6e]] }
  0x69   :  { %v349_v1 = vadd.f32 %v348_v9, %v345_v44  ;;  %v408_v31 = vstv %s2094_s20  ;;  %v416_v52 = vmul.f32 %v415_v0, %v1912_v57  ;;  %v418_v2 = vstv %s2096_s21  ;;  %3273 = sst [smem:[#allocation15_spill]] %s2207_s11  ;;  %s2225_s20 = sld [smem:[#allocation2 + $0x72]] }
  0x6a   :  { %v398_v4 = vadd.f32 %v397_v41, %v394_v49  ;;  %v419_v53 = vmul.f32 %v418_v2, %v1958_v37  ;;  %v422_v54 = vstv %s2102_s22  ;;  %v426_v55 = vstv %s2104_s23  ;;  %3274 = sst [smem:[#allocation16_spill]] %s2209_s12  ;;  %s2227_s21 = sld [smem:[#allocation2 + $0x6f]] }
  0x6b   :  { %v352_v56 = vadd.f32 %v351_v10, %v349_v1  ;;  %v412_v58 = vstv %s2109_s24  ;;  %v423_v59 = vmul.f32 %v422_v54, %v1970_v46  ;;  %v430_v60 = vstv %s2111_s25  ;;  %3275 = sst [smem:[#allocation17_spill]] %s2211_s14  ;;  %s2229_s22 = sld [smem:[#allocation2 + $0x76]] }
  0x6c   :  { %v402_v61 = vadd.f32 %v401_v47, %v398_v4  ;;  %v420_v5 = vadd.f32 %v419_v53, %v416_v52  ;;  %v427_v62 = vmul.f32 %v426_v55, %v2039_v43  ;;  %v434_v63 = vstv %s2117_s26  ;;  %3276 = sst [smem:[#allocation18_spill]] %s2213_s8  ;;  %s2231_s23 = sld [smem:[#allocation2 + $0x7a]] }
  0x6d   :  { %v353_v6 = vmax.f32 %v352_v56, 0.0  ;;  %v376_v3 = vadd.f32 %v375_v48, %v372_v45  ;;  %v431_v8 = vmul.f32 %v430_v60, %v2072_v51  ;;  %v435_v12 = vmul.f32 %v434_v63, %v2119_v35  ;;  %3277 = sst [smem:[#allocation19_spill]] %s2215_s1  ;;  %s2233_s24 = sld [smem:[#allocation2 + $0x7e]] }
  0x6e   :  { %v406_v24 = vadd.f32 %v405_v50, %v402_v61  ;;  %v424_v7 = vadd.f32 %v423_v59, %v420_v5  ;;  %v445_v9 = vstv %s2125_s19  ;;  %v448_v10 = vstv %s2127_s27  ;;  %3278 = sst [smem:[#allocation20_spill]] %s2217_s15  ;;  %s2235_s25 = sld [smem:[#allocation2 + $0x82]] }
  0x6f   :  { %v379_v11 = vmul.f32 %v378_v39, %v353_v6  ;;  %v409_v13 = vmul.f32 %v408_v31, %v353_v6  ;;  %v438_v14 = vstv %s2131_s28  ;;  %v446_v15 = vmul.f32 %v445_v9, %v1912_v57  ;;  %3279 = sst [smem:[#allocation21_spill]] %s2219_s16  ;;  %s2237_s26 = sld [smem:[#allocation2 + $0x86]] }
  0x70   :  { %v428_v16 = vadd.f32 %v427_v62, %v424_v7  ;;  %v449_v18 = vmul.f32 %v448_v10, %v1958_v37  ;;  %v452_v33 = vstv %s2136_s29  ;;  %v456_v19 = vstv %s2138_s30  ;;  %3280 = sst [smem:[#allocation22_spill]] %s2221_s18  ;;  %s2239_s19 = sld [smem:[#allocation2 + $0x8a]] }
  0x71   :  { %v380_v20 = vadd.f32 %v379_v11, %v376_v3  ;;  %v410_v21 = vadd.f32 %v409_v13, %v406_v24  ;;  %v453_v22 = vmul.f32 %v452_v33, %v1970_v46  ;;  %v460_v26 = vstv %s2146_s4  ;;  %3281 = sst [smem:[#allocation23_spill]] %s2223_s13  ;;  %s2241_s27 = sld [smem:[#allocation2 + $0x8e]] }
  0x72   :  { %v432_v23 = vadd.f32 %v431_v8, %v428_v16  ;;  %v450_v25 = vadd.f32 %v449_v18, %v446_v15  ;;  %v439_v37 = vmul.f32 %v438_v14, %v353_v6  ;;  %v457_v29 = vmul.f32 %v456_v19, %v2039_v43  ;;  %3282 = sst [smem:[#allocation24_spill]] %s2225_s20  ;;  %s2243_s28 = sld [smem:[#allocation2 + $0x73]] }
  0x73   :  { %v2171_v27 = vadd.f32 %v382_v38, %v380_v20  ;;  %v2173_v57 = vadd.f32 %v412_v58, %v410_v21  ;;  %v464_v32 = vstv %s2153_s17  ;;  %v442_v36 = vstv %s2157_s6  ;;  %3283 = sst [smem:[#allocation25_spill]] %s2227_s21  ;;  %s2245_s29 = sld [smem:[#allocation2 + $0x77]] }
  0x74   :  { %v436_v30 = vadd.f32 %v435_v12, %v432_v23  ;;  %v454_v34 = vadd.f32 %v453_v22, %v450_v25  ;;  %v461_v39 = vmul.f32 %v460_v26, %v2072_v51  ;;  %v468_v43 = vstv %s2161_s7  ;;  %3284 = sst [smem:[#allocation26_spill]] %s2229_s22  ;;  %s2247_s30 = sld [smem:[#allocation2 + $0x70]] }
  0x75   :  { %v474_v46 = vsel %vm42_vm1, %v2171_v27, 0.0  ;;  %v497_v28 = vsel %vm42_vm1, %v2173_v57, 0.0  ;;  %v465_v38 = vmul.f32 %v464_v32, %v2119_v35  ;;  %v469_v0 = vmul.f32 %v468_v43, %v353_v6  ;;  %3285 = sst [smem:[#allocation27_spill]] %s2231_s23  ;;  %s2249_s4 = sld [smem:[#allocation2 + $0x7b]] }
  0x76   :  { %v476_v40 = vsel %vm475_vm0, %v474_v46, 0.0  ;;  %v480_v41 = vmul.f32 %v474_v46, %v474_v46  ;;  %v502_v42 = vmul.f32 %v497_v28, %v497_v28  ;;  %v440_v44 = vadd.f32 %v439_v37, %v436_v30  ;;  %3286 = sst [smem:[#allocation28_spill]] %s2233_s24  ;;  %s2251_s17 = sld [smem:[#allocation2 + $0x7f]] }
  0x77   :  { %477 = vadd.xlane.f32.xlu0 %v476_v40  ;;  %v458_v45 = vadd.f32 %v457_v29, %v454_v34  ;;  %v498_v48 = vsel %vm475_vm0, %v497_v28, 0.0  ;;  %v472_v2 = vstv %s1408_s9  ;;  %3287 = sst [smem:[#allocation29_spill]] %s2235_s25  ;;  %s2253_s6 = sld [smem:[#allocation2 + $0x83]]  ;;  %v490_v60 = vstv %s2205_s10 }
  0x78   :  { %v481_v47 = vsel %vm475_vm0, %v480_v41, 0.0  ;;  %v2190_v49 = vadd.f32 %v442_v36, %v440_v44  ;;  %v503_v51 = vsel %vm475_vm0, %v502_v42, 0.0  ;;  %3288 = sst [smem:[#allocation30_spill]] %s2237_s26  ;;  %s2255_s7 = sld [smem:[#allocation2 + $0x87]]  ;;  %v495_v61 = vstv %s2207_s11 }
  0x79   :  { %482 = vadd.xlane.f32.xlu1 %v481_v47  ;;  %v462_v50 = vadd.f32 %v461_v39, %v458_v45  ;;  %3289 = sst [smem:[#allocation31_spill]] %s2239_s19  ;;  %s2257_s9 = sld [smem:[#allocation2 + $0x8b]]  ;;  %v564_v5 = vstv %s2209_s12  ;;  %v583_v62 = vstv %s2211_s14  ;;  %v602_v63 = vstv %s2213_s8 }
  0x7a   :  { %v519_v1 = vsel %vm42_vm1, %v2190_v49, 0.0  ;;  %3290 = sst [smem:[#allocation32_spill]] %s2241_s27  ;;  %s2315_s5 = sld [smem:[#allocation2 + $0xa4]]  ;;  %v621_v6 = vstv %s2215_s1  ;;  %v640_v3 = vstv %s2217_s15  ;;  %v659_v8 = vstv %s2219_s16 }
  0x7b   :  { %499 = vadd.xlane.f32.xlu0 %v498_v48  ;;  %v466_v31 = vadd.f32 %v465_v38, %v462_v50  ;;  %v520_v52 = vsel %vm475_vm0, %v519_v1, 0.0  ;;  %v524_v35 = vmul.f32 %v519_v1, %v519_v1  ;;  %3291 = sst [smem:[#allocation33_spill]] %s2243_s28  ;;  %s2331_s11 = sld [smem:[#allocation2 + $0xbd]]  ;;  %v678_v12 = vstv %s2221_s18 }
  0x7c   :  { %3292 = sst [smem:[#allocation34_spill]] %s2245_s29  ;;  %s2267_s29 = sld [smem:[#allocation2 + $0x80]]  ;;  %v512_v24 = vstv %s2223_s13  ;;  %v517_v7 = vstv %s2225_s20  ;;  %v534_v9 = vstv %s2227_s21  ;;  %v567_v10 = vstv %s2229_s22 }
  0x7d   :  { %504 = vadd.xlane.f32.xlu1 %v503_v51  ;;  %v470_v4 = vadd.f32 %v469_v0, %v466_v31  ;;  %v525_v53 = vsel %vm475_vm0, %v524_v35, 0.0  ;;  %3293 = sst [smem:[#allocation35_spill]] %s2247_s30  ;;  %s2269_s30 = sld [smem:[#allocation2 + $0x84]]  ;;  %v586_v11 = vstv %s2231_s23  ;;  %v605_v13 = vstv %s2233_s24 }
  0x7e   :  { %3294 = sst [smem:[#allocation36_spill]] %s2249_s4  ;;  %s2271_s4 = sld [smem:[#allocation2 + $0x88]]  ;;  %v624_v14 = vstv %s2235_s25  ;;  %v643_v15 = vstv %s2237_s26  ;;  %v662_v16 = vstv %s2239_s19  ;;  %v681_v18 = vstv %s2241_s27 }
  0x7f   :  { %521 = vadd.xlane.f32.xlu0 %v520_v52  ;;  %v2198_v54 = vadd.f32 %v472_v2, %v470_v4  ;;  %3295 = sst [smem:[#allocation37_spill]] %s2251_s17  ;;  %s2273_s17 = sld [smem:[#allocation2 + $0x8c]]  ;;  %v539_v33 = vstv %s2243_s28  ;;  %v594_v28 = vstv %s2265_s2 }
  0x80   :  { %3296 = sst [smem:[#allocation38_spill]] %s2253_s6  ;;  %s3332_s14 = sld [smem:[#allocation34_spill]] }
  0x81   :  { %526 = vadd.xlane.f32.xlu1 %v525_v53  ;;  %v541_v55 = vsel %vm42_vm1, %v2198_v54, 0.0  ;;  %3297 = sst [smem:[#allocation39_spill]] %s2255_s7  ;;  %s2275_s6 = sld [smem:[#allocation2 + $0x90]] }
  0x82   :  { %v542_v56 = vsel %vm475_vm0, %v541_v55, 0.0  ;;  %v546_v58 = vmul.f32 %v541_v55, %v541_v55  ;;  %3298 = sst [smem:[#allocation40_spill]] %s2257_s9  ;;  %s2277_s7 = sld [smem:[#allocation2 + $0x91]] }
  0x83   :  { %543 = vadd.xlane.f32.xlu0 %v542_v56  ;;  %3303 = sst [smem:[#allocation45_spill]] %s2267_s29  ;;  %s2279_s9 = sld [smem:[#allocation2 + $0x92]] }
  0x84   :  { %v547_v59 = vsel %vm475_vm0, %v546_v58, 0.0  ;;  %3304 = sst [smem:[#allocation46_spill]] %s2269_s30  ;;  %s2287_s29 = sld [smem:[#allocation2 + $0x96]] }
  0x85   :  { %548 = vadd.xlane.f32.xlu1 %v547_v59  ;;  %3305 = sst [smem:[#allocation47_spill]] %s2271_s4  ;;  %s2289_s30 = sld [smem:[#allocation2 + $0x97]] }
  0x86   :  { %3306 = sst [smem:[#allocation48_spill]] %s2273_s17  ;;  %s2291_s17 = sld [smem:[#allocation2 + $0xa6]]  ;;  %v571_v20 = vstv %s3332_s14 }
  0x87   :  { %3307 = sst [smem:[#allocation49_spill]] %s2275_s6  ;;  %s2293_s6 = sld [smem:[#allocation2 + $0xa7]] }
  0x88   :  { %3308 = sst [smem:[#allocation50_spill]] %s2277_s7  ;;  %s2295_s4 = sld [smem:[#allocation2 + $0xa8]]  ;;  %v579_v43 = vstv %s2277_s7 }
  0x89   :  { %3309 = sst [smem:[#allocation51_spill]] %s2279_s9  ;;  %s2297_s9 = sld [smem:[#allocation2 + $0xa9]] }
  0x8a   :  { %3313 = sst [smem:[#allocation55_spill]] %s2287_s29  ;;  %s2303_s29 = sld [smem:[#allocation2 + $0xac]] }
  0x8b   :  { %3314 = sst [smem:[#allocation56_spill]] %s2289_s30  ;;  %s2305_s30 = sld [smem:[#allocation2 + $0x9f]] }
  0x8c   :  { %3315 = sst [smem:[#allocation57_spill]] %s2291_s17  ;;  %s2307_s17 = sld [smem:[#allocation2 + $0xa0]] }
  0x8d   :  { %3316 = sst [smem:[#allocation58_spill]] %s2293_s6  ;;  %s2337_s12 = sld [smem:[#allocation2 + $0xbe]] }
  0x8e   :  { %3317 = sst [smem:[#allocation59_spill]] %s2295_s4  ;;  %s2311_s4 = sld [smem:[#allocation2 + $0xa2]] }
  0x8f   :  { %3318 = sst [smem:[#allocation60_spill]] %s2297_s9  ;;  %s2313_s9 = sld [smem:[#allocation2 + $0xa3]] }
  0x90   :  { %3320 = sst [smem:[#allocation62_spill]] %s2301_s3  ;;  %s3334_s10 = sld [smem:[#allocation36_spill]] }
  0x91   :  { %3321 = sst [smem:[#allocation63_spill]] %s2303_s29  ;;  %s2339_s8 = sld [smem:[#allocation2 + $0xbf]] }
  0x92   :  { %3322 = sst [smem:[#allocation64_spill]] %s2305_s30  ;;  %s2321_s30 = sld [smem:[#allocation2 + $0xa5]] }
  0x93   :  { %3323 = sst [smem:[#allocation65_spill]] %s2307_s17  ;;  %s3336_s15 = sld [smem:[#allocation37_spill]] }
  0x94   :  { %3324 = sst [smem:[#allocation66_spill]] %s2309_s0  ;;  %s2323_s0 = sld [smem:[#allocation2 + $0xbb]] }
  0x95   :  { %3325 = sst [smem:[#allocation67_spill]] %s2311_s4  ;;  %s2345_s1 = sld [smem:[#allocation2 + $0xc0]] }
  0x96   :  { %3326 = sst [smem:[#allocation68_spill]] %s2313_s9  ;;  %s3337_s16 = sld [smem:[#allocation35_spill]]  ;;  %v590_v21 = vstv %s3334_s10 }
  0x97   :  { %3327 = sst [smem:[#allocation69_spill]] %s2315_s5  ;;  %s2329_s5 = sld [smem:[#allocation2 + $0xbc]] }
  0x98   :  { %3328 = sst [smem:[#allocation70_spill]] %s2321_s30  ;;  %s3341_s18 = sld [smem:[#allocation39_spill]] }
  0x99   :  { %3331 = sst [smem:[#allocation73_spill]] %s2331_s11  ;;  %s3339_s11 = sld [smem:[#allocation38_spill]]  ;;  %v609_v22 = vstv %s3336_s15 }
  0x9a   :  { %3329 = sst [smem:[#allocation71_spill]] %s2323_s0  ;;  %s3342_s20 = sld [smem:[#allocation40_spill]] }
  0x9b   :  { %3333 = sst [smem:[#allocation74_spill]] %s2337_s12  ;;  %s2353_s21 = sld [smem:[#allocation2 + $0x98]] }
  0x9c   :  { %3335 = sst [smem:[#allocation75_spill]] %s2339_s8  ;;  %s3343_s13 = sld [smem:[#allocation41_spill]]  ;;  %v556_v23 = vstv %s3337_s16 }
  0x9d   :  { %3330 = sst [smem:[#allocation72_spill]] %s2329_s5  ;;  %s2347_s5 = sld [smem:[#allocation2 + $0xc1]] }
  0x9e   :  { %3338 = sst [smem:[#allocation76_spill]] %s2345_s1  ;;  %s2355_s8 = sld [smem:[#allocation2 + $0x99]]  ;;  %v647_v37 = vstv %s3341_s18 }
  0x9f   :  { %s3345_s22 = sld [smem:[#allocation42_spill]]  ;;  %s3346_s24 = sld [smem:[#allocation43_spill]]  ;;  %v628_v26 = vstv %s3339_s11 }
  0xa0   :  { %s2361_s25 = sld [smem:[#allocation2 + $0x9a]]  ;;  %s2363_s26 = sld [smem:[#allocation2 + $0x9b]]  ;;  %v666_v29 = vstv %s3342_s20 }
  0xa1   :  { %s3349_s19 = sld [smem:[#allocation45_spill]]  ;;  %s3350_s27 = sld [smem:[#allocation46_spill]] }
  0xa2   :  { %s2370_s28 = sld [smem:[#allocation2 + $0x9c]]  ;;  %s2372_s23 = sld [smem:[#allocation2 + $0x9d]]  ;;  %v685_v34 = vstv %s3343_s13 }
  0xa3   :  { %3340 = sst [smem:[#allocation77_spill]] %s2347_s5  ;;  %s3352_s14 = sld [smem:[#allocation47_spill]] }
  0xa4   :  { %3344 = sst [smem:[#allocation78_spill]] %s2355_s8  ;;  %s3353_s15 = sld [smem:[#allocation48_spill]] }
  0xa5   :  { %s3354_s16 = sld [smem:[#allocation49_spill]]  ;;  %v561_v32 = vstv %s3345_s22  ;;  %v575_v46 = vstv %s3346_s24  ;;  %s2378_s10 = sld [smem:[#allocation2 + $0xe0]] }
  0xa6   :  { %3347 = sst [smem:[#allocation79_spill]] %s2361_s25  ;;  %s3357_s20 = sld [smem:[#allocation51_spill]] }
  0xa7   :  { %3348 = sst [smem:[#allocation80_spill]] %s2363_s26  ;;  %s2380_s26 = sld [smem:[#allocation2 + $0x9e]]  ;;  %v613_v40 = vstv %s3349_s19  ;;  %v632_v41 = vstv %s3350_s27 }
  0xa8   :  { %3351 = sst [smem:[#allocation81_spill]] %s2372_s23  ;;  %s3358_s18 = sld [smem:[#allocation52_spill]] }
  0xa9   :  { %s2386_s11 = sld [smem:[#allocation2 + $0xc2]]  ;;  %s3360_s23 = sld [smem:[#allocation53_spill]]  ;;  %v651_v44 = vstv %s3352_s14 }
  0xaa   :  { %s2388_s13 = sld [smem:[#allocation2 + $0xc3]]  ;;  %s3362_s22 = sld [smem:[#allocation54_spill]]  ;;  %v670_v45 = vstv %s3353_s15 }
  0xab   :  { %3355 = sst [smem:[#allocation82_spill]] %s2378_s10  ;;  %s3363_s2 = sld [smem:[#allocation55_spill]]  ;;  %v689_v38 = vstv %s3354_s16 }
  0xac   :  { %s3364_s24 = sld [smem:[#allocation56_spill]]  ;;  %s2396_s10 = sld [smem:[#allocation2 + $0xc4]]  ;;  %v598_v50 = vstv %s3357_s20 }
  0xad   :  { %3356 = sst [smem:[#allocation83_spill]] %s2380_s26  ;;  %s2394_s26 = sld [smem:[#allocation2 + $0xdf]] }
  0xae   :  { %s3367_s19 = sld [smem:[#allocation57_spill]]  ;;  %v617_v0 = vstv %s3358_s18  ;;  %s2402_s27 = sld [smem:[#allocation2 + $0xc5]] }
  0xaf   :  { %3359 = sst [smem:[#allocation84_spill]] %s2386_s11  ;;  %v636_v1 = vstv %s3360_s23  ;;  %s2410_s16 = sld [smem:[#allocation2 + $0xe3]] }
  0xb0   :  { %3361 = sst [smem:[#allocation85_spill]] %s2388_s13  ;;  %s2404_s11 = sld [smem:[#allocation2 + $0xc6]]  ;;  %v655_v31 = vstv %s3362_s22 }
  0xb1   :  { %v674_v52 = vstv %s3363_s2  ;;  %s2412_s14 = sld [smem:[#allocation2 + $0xc7]]  ;;  %s2417_s18 = sld [smem:[#allocation2 + $0xc8]] }
  0xb2   :  { %3366 = sst [smem:[#allocation87_spill]] %s2396_s10  ;;  %v693_v35 = vstv %s3364_s24  ;;  %s2423_s24 = sld [smem:[#allocation2 + $0xad]] }
  0xb3   :  { %3365 = sst [smem:[#allocation86_spill]] %s2394_s26  ;;  %s2425_s22 = sld [smem:[#allocation2 + $0xae]] }
  0xb4   :  { %3368 = sst [smem:[#allocation88_spill]] %s2402_s27  ;;  %v757_v55 = vstv %s3367_s19  ;;  %s2430_s19 = sld [smem:[#allocation2 + $0xaf]] }
  0xb5   :  { %3373 = sst [smem:[#allocation90_spill]] %s2410_s16  ;;  %s2438_s15 = sld [smem:[#allocation2 + $0xb1]] }
  0xb6   :  { %3370 = sst [smem:[#allocation89_spill]] %s2404_s11  ;;  %s2440_s7 = sld [smem:[#allocation2 + $0xb2]] }
  0xb7   :  { %3374 = sst [smem:[#allocation91_spill]] %s2412_s14  ;;  %s2445_s6 = sld [smem:[#allocation2 + $0xde]] }
  0xb8   :  { %3375 = sst [smem:[#allocation92_spill]] %s2417_s18  ;;  %s2432_s18 = sld [smem:[#allocation2 + $0xb0]] }
  0xb9   :  { %3378 = sst [smem:[#allocation93_spill]] %s2425_s22  ;;  %s2451_s2 = sld [smem:[#allocation2 + $0xb3]] }
  0xba   :  { %s2453_s17 = sld [smem:[#allocation2 + $0xc9]]  ;;  %s2458_s4 = sld [smem:[#allocation2 + $0xca]] }
  0xbb   :  { %3380 = sst [smem:[#allocation94_spill]] %s2438_s15  ;;  %s2460_s9 = sld [smem:[#allocation2 + $0xcb]] }
  0xbc   :  { %3381 = sst [smem:[#allocation95_spill]] %s2440_s7  ;;  %s2466_s30 = sld [smem:[#allocation2 + $0xcc]] }
  0xbd   :  { %s2468_s20 = sld [smem:[#allocation2 + $0xcd]]  ;;  %s2479_s1 = sld [smem:[#allocation2 + $0xe4]] }
  0xbe   :  { %s2481_s29 = sld [smem:[#allocation2 + $0xcf]]  ;;  %s2485_s3 = sld [smem:[#allocation2 + $0xb4]] }
  0xbf   :  { %3385 = sst [smem:[#allocation96_spill]] %s2451_s2  ;;  %s2493_s23 = sld [smem:[#allocation2 + $0xb6]] }
  0xc0   :  { %3386 = sst [smem:[#allocation97_spill]] %s2453_s17  ;;  %s2473_s17 = sld [smem:[#allocation2 + $0xce]] }
  0xc1   :  { %3387 = sst [smem:[#allocation98_spill]] %s2458_s4  ;;  %s2495_s8 = sld [smem:[#allocation2 + $0xb7]] }
  0xc2   :  { %3388 = sst [smem:[#allocation99_spill]] %s2460_s9  ;;  %s2500_s0 = sld [smem:[#allocation2 + $0xb8]] }
  0xc3   :  { %3390 = sst [smem:[#allocation100_spill]] %s2466_s30  ;;  %s2502_s13 = sld [smem:[#allocation2 + $0xb9]] }
  0xc4   :  { %3392 = sst [smem:[#allocation101_spill]] %s2468_s20  ;;  %s2509_s4 = sld [smem:[#allocation2 + $0xba]] }
  0xc5   :  { %3398 = sst [smem:[#allocation103_spill]] %s2479_s1  ;;  %s2511_s12 = sld [smem:[#allocation2 + $0xd0]] }
  0xc6   :  { %3396 = sst [smem:[#allocation102_spill]] %s2473_s17  ;;  %s2487_s17 = sld [smem:[#allocation2 + $0xb5]] }
  0xc7   :  { %3399 = sst [smem:[#allocation104_spill]] %s2481_s29  ;;  %s3410_s27 = sld [smem:[#allocation97_spill]] }
  0xc8   :  { %3401 = sst [smem:[#allocation14_spill]] %s2485_s3  ;;  %s3411_s5 = sld [smem:[#allocation98_spill]] }
  0xc9   :  { %3403 = sst [smem:[#allocation106_spill]] %s2493_s23  ;;  %s2518_s10 = sld [smem:[#allocation2 + $0xd1]] }
  0xca   :  { %3405 = sst [smem:[#allocation107_spill]] %s2495_s8  ;;  %s2520_s11 = sld [smem:[#allocation2 + $0xd2]] }
  0xcb   :  { %3406 = sst [smem:[#allocation108_spill]] %s2500_s0  ;;  %s3412_s16 = sld [smem:[#allocation99_spill]] }
  0xcc   :  { %3402 = sst [smem:[#allocation105_spill]] %s2487_s17  ;;  %s2526_s9 = sld [smem:[#allocation2 + $0xe1]] }
  0xcd   :  { %3407 = sst [smem:[#allocation109_spill]] %s2502_s13  ;;  %s2528_s25 = sld [smem:[#allocation2 + $0xd3]]  ;;  %v907_v59 = vstv %s3410_s27 }
  0xce   :  { %3408 = sst [smem:[#allocation110_spill]] %s2509_s4  ;;  %s2617_s7 = sld [smem:[#allocation2 + $0xd5]] }
  0xcf   :  { %s2630_s29 = sld [smem:[#allocation2 + $0xd7]]  ;;  %s3461_s13 = sld [smem:[#allocation59_spill]] }
  0xd0   :  { %3413 = sst [smem:[#allocation23_spill]] %s2520_s11  ;;  %s3463_s4 = sld [smem:[#allocation61_spill]] }
  0xd1   :  { %s3464_s22 = sld [smem:[#allocation64_spill]]  ;;  %s3465_s15 = sld [smem:[#allocation62_spill]] }
  0xd2   :  { %s3466_s26 = sld [smem:[#allocation63_spill]]  ;;  %s3467_s14 = sld [smem:[#allocation65_spill]] }
  0xd3   :  { %3415 = sst [smem:[#allocation97_spill]] %s2528_s25  ;;  %s3462_s25 = sld [smem:[#allocation60_spill]] }
  0xd4   :  { %3451 = sst [smem:[#allocation99_spill]] %s2617_s7  ;;  %s3468_s20 = sld [smem:[#allocation66_spill]] }
  0xd5   :  { %s3469_s17 = sld [smem:[#allocation67_spill]]  ;;  %s3470_s2 = sld [smem:[#allocation68_spill]] }
  0xd6   :  { %s3471_s3 = sld [smem:[#allocation71_spill]]  ;;  %s3475_s11 = sld [smem:[#allocation72_spill]] }
  0xd7   :  { %s3481_s8 = sld [smem:[#allocation74_spill]]  ;;  %s3549_s27 = sld [smem:[#allocation101_spill]] }
 0x104   :  { %v478_v19 = vpop.xlane.xlu0 %477 }
 0x105   :  { %v2365_v25 = vmul.f32 0.125, %v478_v19 }
 0x106   :  { %v483_v30 = vpop.xlane.xlu1 %482 }
 0x107   :  { %v485_v36 = vmul.f32 %v2365_v25, %v2365_v25  ;;  %v484_v39 = vmul.f32 0.125, %v483_v30 }
 0x108   :  { %v500_v42 = vpop.xlane.xlu0 %499 }
 0x109   :  { %v486_v47 = vsub.f32 %v484_v39, %v485_v36  ;;  %v2398_v48 = vmul.f32 0.125, %v500_v42 }
 0x10a   :  { %v505_v51 = vpop.xlane.xlu1 %504 }
 0x10b   :  { %v487_v2 = vadd.f32 1e-05, %v486_v47  ;;  %v507_v4 = vmul.f32 %v2398_v48, %v2398_v48  ;;  %v506_v53 = vmul.f32 0.125, %v505_v51  ;;  %v697_v51 = vstv %s2353_s21  ;;  %s3511_s21 = sld [smem:[#allocation88_spill]] }
 0x10c   :  { %v522_v56 = vpop.xlane.xlu0 %521 }
 0x10d   :  { %1558 = vrsqrt.f32 %v487_v2  ;;  %v508_v36 = vsub.f32 %v506_v53, %v507_v4  ;;  %v2427_v39 = vmul.f32 0.125, %v522_v56 }
 0x10e   :  { %v527_v47 = vpop.xlane.xlu1 %526 }
 0x10f   :  { %v509_v2 = vadd.f32 1e-05, %v508_v36  ;;  %v529_v4 = vmul.f32 %v2427_v39, %v2427_v39  ;;  %v528_v53 = vmul.f32 0.125, %v527_v47 }
 0x110   :  { %v544_v42 = vpop.xlane.xlu0 %543 }
 0x111   :  { %1560 = vrsqrt.f32 %v509_v2  ;;  %v530_v36 = vsub.f32 %v528_v53, %v529_v4  ;;  %v2455_v47 = vmul.f32 0.125, %v544_v42  ;;  %v918_v53 = vstv %s2466_s30  ;;  %s2628_s30 = sld [smem:[#allocation2 + $0xd6]] }
 0x112   :  { %v549_v19 = vpop.xlane.xlu1 %548 }
 0x113   :  { %v531_v42 = vadd.f32 1e-05, %v530_v36  ;;  %v551_v2 = vmul.f32 %v2455_v47, %v2455_v47  ;;  %v550_v4 = vmul.f32 0.125, %v549_v19  ;;  %v514_v19 = vsub.f32 %v2173_v57, %v2398_v48 }
 0x114   :  { %v824_v57 = vstv %s2493_s23  ;;  %v814_v48 = vstv %s2526_s9  ;;  %s2612_s23 = sld [smem:[#allocation2 + $0xd4]]  ;;  %s3563_s9 = sld [smem:[#allocation109_spill]] }
 0x115   :  { %1562 = vrsqrt.f32 %v531_v42  ;;  %v552_v36 = vsub.f32 %v550_v4, %v551_v2 }
 0x117   :  { %v1559_v42 = vpop.eup %1558  ;;  %v553_v2 = vadd.f32 1e-05, %v552_v36  ;;  %v492_v36 = vsub.f32 %v2171_v27, %v2365_v25 }
 0x118   :  { %v491_v30 = vmul.f32 %v1559_v42, %v490_v60  ;;  %v832_v60 = vstv %s2500_s0  ;;  %s3477_s0 = sld [smem:[#allocation70_spill]] }
 0x119   :  { %1564 = vrsqrt.f32 %v553_v2  ;;  %v536_v2 = vsub.f32 %v2190_v49, %v2427_v39 }
 0x11a   :  { %v493_v25 = vmul.f32 %v492_v36, %v491_v30  ;;  %v904_v36 = vstv %s2479_s1  ;;  %3447 = sst [smem:[#allocation98_spill]] %s2612_s23 }
 0x11b   :  { %v1561_v27 = vpop.eup %1560  ;;  %s3460_s1 = sld [smem:[#allocation58_spill]] }
 0x11c   :  { %v513_v42 = vmul.f32 %v1561_v27, %v512_v24  ;;  %v496_v56 = vadd.f32 %v495_v61, %v493_v25 }
 0x11e   :  { %v515_v58 = vmul.f32 %v514_v19, %v513_v42  ;;  %v937_v19 = vstv %s2511_s12  ;;  %v940_v42 = vstv %s2518_s10  ;;  %v565_v39 = vmul.f32 %v564_v5, %v496_v56  ;;  %s3562_s12 = sld [smem:[#allocation97_spill]]  ;;  %s2922_s10 = sld [smem:[#allocation2 + $0xdd]] }
 0x11f   :  { %v1563_v4 = vpop.eup %1562 }
 0x120   :  { %v535_v30 = vmul.f32 %v1563_v4, %v534_v9  ;;  %v518_v24 = vadd.f32 %v517_v7, %v515_v58  ;;  %v558_v4 = vsub.f32 %v2198_v54, %v2455_v47  ;;  %v660_v54 = vmul.f32 %v659_v8, %v496_v56 }
 0x122   :  { %v537_v25 = vmul.f32 %v536_v2, %v535_v30  ;;  %v568_v7 = vmul.f32 %v567_v10, %v518_v24  ;;  %v587_v58 = vmul.f32 %v586_v11, %v518_v24  ;;  %v584_v30 = vmul.f32 %v583_v62, %v496_v56 }
 0x123   :  { %v603_v2 = vmul.f32 %v602_v63, %v496_v56  ;;  %v606_v61 = vmul.f32 %v605_v13, %v518_v24  ;;  %v1565_v5 = vpop.eup %1564  ;;  %v622_v10 = vmul.f32 %v621_v6, %v496_v56  ;;  %v641_v11 = vmul.f32 %v640_v3, %v496_v56 }
 0x124   :  { %v540_v27 = vadd.f32 %v539_v33, %v537_v25  ;;  %v625_v62 = vmul.f32 %v624_v14, %v518_v24  ;;  %v679_v63 = vmul.f32 %v678_v12, %v496_v56  ;;  %v644_v13 = vmul.f32 %v643_v15, %v518_v24 }
 0x125   :  { %v663_v33 = vmul.f32 %v662_v16, %v518_v24  ;;  %v682_v47 = vmul.f32 %v681_v18, %v518_v24  ;;  %v569_v6 = vadd.f32 %v568_v7, %v565_v39  ;;  %v588_v25 = vadd.f32 %v587_v58, %v584_v30 }
 0x126   :  { %v572_v3 = vmul.f32 %v571_v20, %v540_v27  ;;  %v591_v8 = vmul.f32 %v590_v21, %v540_v27  ;;  %v607_v9 = vadd.f32 %v606_v61, %v603_v2  ;;  %v610_v14 = vmul.f32 %v609_v22, %v540_v27 }
 0x127   :  { %v629_v49 = vmul.f32 %v628_v26, %v540_v27  ;;  %v557_v12 = vmul.f32 %v1565_v5, %v556_v23  ;;  %v626_v15 = vadd.f32 %v625_v62, %v622_v10  ;;  %v648_v16 = vmul.f32 %v647_v37, %v540_v27 }
 0x128   :  { %v667_v18 = vmul.f32 %v666_v29, %v540_v27  ;;  %v686_v39 = vmul.f32 %v685_v34, %v540_v27  ;;  %v645_v7 = vadd.f32 %v644_v13, %v641_v11  ;;  %v664_v58 = vadd.f32 %v663_v33, %v660_v54 }
 0x129   :  { %v559_v20 = vmul.f32 %v558_v4, %v557_v12  ;;  %v1217_v21 = vrot.slane %v518_v24, 7  ;;  %v683_v61 = vadd.f32 %v682_v47, %v679_v63  ;;  %v573_v22 = vadd.f32 %v572_v3, %v569_v6 }
 0x12a   :  { %v592_v26 = vadd.f32 %v591_v8, %v588_v25  ;;  %v1220_v23 = vrot.slane %v540_v27, 6  ;;  %v611_v37 = vadd.f32 %v610_v14, %v607_v9  ;;  %v630_v29 = vadd.f32 %v629_v49, %v626_v15 }
 0x12b   :  { %v562_v34 = vadd.f32 %v561_v32, %v559_v20  ;;  %v1225_v4 = vsel %vm475_vm0, %v496_v56, %v1217_v21  ;;  %v649_v30 = vadd.f32 %v648_v16, %v645_v7  ;;  %v668_v24 = vadd.f32 %v667_v18, %v664_v58 }
 0x12c   :  { %v687_v2 = vadd.f32 %v686_v39, %v683_v61  ;;  %v1227_v5 = vsel %vm1226_vm2, %v1225_v4, %v1220_v23  ;;  %v952_v3 = vstv %s2612_s23  ;;  %v956_v14 = vstv %s2617_s7  ;;  %s3473_s23 = sld [smem:[#allocation69_spill]]  ;;  %s3479_s7 = sld [smem:[#allocation73_spill]] }
 0x12d   :  { %v576_v10 = vmul.f32 %v575_v46, %v562_v34  ;;  %v595_v27 = vmul.f32 %v594_v28, %v562_v34  ;;  %v614_v9 = vmul.f32 %v613_v40, %v562_v34  ;;  %v633_v49 = vmul.f32 %v632_v41, %v562_v34 }
 0x12e   :  { %v652_v32 = vmul.f32 %v651_v44, %v562_v34  ;;  %v671_v56 = vmul.f32 %v670_v45, %v562_v34  ;;  %v690_v46 = vmul.f32 %v689_v38, %v562_v34  ;;  %v1223_v28 = vrot.slane %v562_v34, 5 }
 0x12f   :  { %v577_v40 = vadd.f32 %v576_v10, %v573_v22  ;;  %v596_v41 = vadd.f32 %v595_v27, %v592_v26  ;;  %v615_v11 = vadd.f32 %v614_v9, %v611_v37  ;;  %v634_v54 = vadd.f32 %v633_v49, %v630_v29 }
 0x130   :  { %v653_v62 = vadd.f32 %v652_v32, %v649_v30  ;;  %v672_v63 = vadd.f32 %v671_v56, %v668_v24  ;;  %v691_v13 = vadd.f32 %v690_v46, %v687_v2  ;;  %v1229_v33 = vsel %vm1228_vm3, %v1227_v5, %v1223_v28 }
 0x131   :  { %v580_v44 = vadd.f32 %v579_v43, %v577_v40  ;;  %v599_v45 = vadd.f32 %v598_v50, %v596_v41  ;;  %v618_v38 = vadd.f32 %v617_v0, %v615_v11  ;;  %v637_v47 = vadd.f32 %v636_v1, %v634_v54  ;;  %1230 = vst [vmem:[#allocation7] sm:$0xf] %v1229_v33 }
 0x132   :  { %v656_v6 = vadd.f32 %v655_v31, %v653_v62  ;;  %v675_v25 = vadd.f32 %v674_v52, %v672_v63  ;;  %v694_v43 = vadd.f32 %v693_v35, %v691_v13  ;;  %v3472_v15 = vstv %s3460_s1  ;;  %s3482_s1 = sld [smem:[#allocation75_spill]] }
 0x133   :  { %v2654_v50 = vmax.f32 %v580_v44, 0.0  ;;  %v2656_v0 = vmax.f32 %v599_v45, 0.0  ;;  %v2658_v1 = vmax.f32 %v618_v38, 0.0  ;;  %v2660_v8 = vmax.f32 %v637_v47, 0.0 }
 0x134   :  { %v2662_v31 = vmax.f32 %v656_v6, 0.0  ;;  %v2664_v52 = vmax.f32 %v675_v25, 0.0  ;;  %v2666_v35 = vmax.f32 %v694_v43, 0.0  ;;  %v960_v18 = vstv %s2628_s30  ;;  %s1674_s30 = smov [#allocation7]  }
 0x135   :  { %v758_v12 = vmul.f32 %v757_v55, %v2654_v50  ;;  %v761_v16 = vmul.f32 %v3472_v15, %v2656_v0  ;;  %v967_v39 = vstv %s2630_s29  ;;  %v3474_v7 = vstv %s3461_s13  ;;  %s3488_s13 = sld [smem:[#allocation76_spill]]  ;;  %s2945_s29 = sld [smem:[#allocation2 + $0xe7]] }
 0x136   :  { %v765_v58 = vmul.f32 %v3474_v7, %v2658_v1  ;;  %v3476_v20 = vstv %s3462_s25  ;;  %v3478_v61 = vstv %s3463_s4  ;;  %v3480_v55 = vstv %s3464_s22  ;;  %s3490_s25 = sld [smem:[#allocation77_spill]]  ;;  %s3492_s4 = sld [smem:[#allocation78_spill]] }
 0x137   :  { %v769_v21 = vmul.f32 %v3476_v20, %v2660_v8  ;;  %v773_v22 = vmul.f32 %v3478_v61, %v2662_v31  ;;  %v728_v26 = vmul.f32 %v3480_v55, %v2654_v50  ;;  %v762_v23 = vadd.f32 %v761_v16, %v758_v12  ;;  %s3493_s22 = sld [smem:[#allocation79_spill]] }
 0x138   :  { %v3483_v37 = vstv %s3465_s15  ;;  %v3484_v34 = vstv %s3466_s26  ;;  %v3485_v30 = vstv %s3467_s14  ;;  %v3486_v2 = vstv %s3468_s20  ;;  %s3497_s15 = sld [smem:[#allocation80_spill]]  ;;  %s3501_s26 = sld [smem:[#allocation84_spill]] }
 0x139   :  { %v777_v29 = vmul.f32 %v3483_v37, %v2664_v52  ;;  %v781_v4 = vmul.f32 %v3484_v34, %v2666_v35  ;;  %v731_v24 = vmul.f32 %v3485_v30, %v2656_v0  ;;  %v735_v5 = vmul.f32 %v3486_v2, %v2658_v1  ;;  %s3515_s14 = sld [smem:[#allocation89_spill]]  ;;  %s3516_s20 = sld [smem:[#allocation82_spill]] }
 0x13a   :  { %v3487_v10 = vstv %s3469_s17  ;;  %v3489_v9 = vstv %s3470_s2  ;;  %v3491_v32 = vstv %s3471_s3  ;;  %v766_v46 = vadd.f32 %v765_v58, %v762_v23  ;;  %s3521_s17 = sld [smem:[#allocation91_spill]]  ;;  %s3523_s2 = sld [smem:[#allocation86_spill]] }
 0x13b   :  { %v739_v27 = vmul.f32 %v3487_v10, %v2660_v8  ;;  %v743_v49 = vmul.f32 %v3489_v9, %v2662_v31  ;;  %v848_v56 = vmul.f32 %v3491_v32, %v2654_v50  ;;  %v732_v28 = vadd.f32 %v731_v24, %v728_v26  ;;  %s2773_s3 = sld [smem:[#allocation2 + $0xd8]] }
 0x13c   :  { %v3494_v40 = vstv %s3473_s23  ;;  %v3495_v11 = vstv %s3475_s11  ;;  %v3496_v62 = vstv %s3477_s0  ;;  %v3498_v13 = vstv %s3479_s7  ;;  %s3502_s23 = sld [smem:[#allocation85_spill]]  ;;  %s3504_s0 = sld [smem:[#allocation81_spill]] }
 0x13d   :  { %v747_v41 = vmul.f32 %v3494_v40, %v2664_v52  ;;  %v851_v54 = vmul.f32 %v3495_v11, %v2656_v0  ;;  %v751_v63 = vmul.f32 %v3496_v62, %v2666_v35  ;;  %v855_v33 = vmul.f32 %v3498_v13, %v2658_v1  ;;  %s3507_s11 = sld [smem:[#allocation83_spill]]  ;;  %s3509_s7 = sld [smem:[#allocation87_spill]] }
 0x13e   :  { %v3499_v44 = vstv %s3481_s8  ;;  %v3500_v38 = vstv %s3482_s1  ;;  %v770_v6 = vadd.f32 %v769_v21, %v766_v46  ;;  %v736_v25 = vadd.f32 %v735_v5, %v732_v28  ;;  %s3527_s8 = sld [smem:[#allocation92_spill]]  ;;  %s3529_s1 = sld [smem:[#allocation90_spill]] }
 0x13f   :  { %v859_v45 = vmul.f32 %v3499_v44, %v2660_v8  ;;  %v863_v47 = vmul.f32 %v3500_v38, %v2662_v31  ;;  %v852_v43 = vadd.f32 %v851_v54, %v848_v56  ;;  %v698_v12 = vmul.f32 %v697_v51, %v2654_v50 }
 0x140   :  { %v3503_v15 = vstv %s3488_s13  ;;  %v3505_v7 = vstv %s3490_s25  ;;  %v3506_v20 = vstv %s3492_s4  ;;  %v3508_v55 = vstv %s3493_s22  ;;  %s2804_s13 = sld [smem:[#allocation2 + $0xd9]]  ;;  %s2823_s4 = sld [smem:[#allocation2 + $0xda]] }
 0x141   :  { %v867_v16 = vmul.f32 %v3503_v15, %v2664_v52  ;;  %v871_v58 = vmul.f32 %v3505_v7, %v2666_v35  ;;  %v701_v61 = vmul.f32 %v3506_v20, %v2656_v0  ;;  %v705_v26 = vmul.f32 %v3508_v55, %v2658_v1  ;;  %s3537_s25 = sld [smem:[#allocation95_spill]] }
 0x142   :  { %v774_v21 = vadd.f32 %v773_v22, %v770_v6  ;;  %v740_v23 = vadd.f32 %v739_v27, %v736_v25  ;;  %v856_v37 = vadd.f32 %v855_v33, %v852_v43  ;;  %v3510_v51 = vstv %s3497_s15  ;;  %s3540_s15 = sld [smem:[#allocation96_spill]] }
 0x143   :  { %v709_v34 = vmul.f32 %v3510_v51, %v2660_v8  ;;  %v702_v30 = vadd.f32 %v701_v61, %v698_v12  ;;  %v3512_v24 = vstv %s2370_s28  ;;  %v3513_v5 = vstv %s3501_s26  ;;  %s3519_s28 = sld [smem:[#allocation93_spill]]  ;;  %s3544_s26 = sld [smem:[#allocation14_spill]] }
 0x144   :  { %v713_v2 = vmul.f32 %v3512_v24, %v2662_v31  ;;  %v878_v10 = vmul.f32 %v3513_v5, %v2654_v50  ;;  %v3514_v9 = vstv %s3502_s23  ;;  %v778_v56 = vadd.f32 %v777_v29, %v774_v21  ;;  %s3546_s23 = sld [smem:[#allocation105_spill]] }
 0x145   :  { %v881_v32 = vmul.f32 %v3514_v9, %v2656_v0  ;;  %v744_v22 = vadd.f32 %v743_v49, %v740_v23  ;;  %v860_v27 = vadd.f32 %v859_v45, %v856_v37  ;;  %v3517_v46 = vstv %s3504_s0  ;;  %s3554_s0 = sld [smem:[#allocation104_spill]] }
 0x146   :  { %v717_v28 = vmul.f32 %v3517_v46, %v2664_v52  ;;  %v706_v40 = vadd.f32 %v705_v26, %v702_v30  ;;  %v3518_v11 = vstv %s3507_s11  ;;  %v3520_v13 = vstv %s3509_s7  ;;  %s3555_s11 = sld [smem:[#allocation107_spill]] }
 0x147   :  { %v721_v54 = vmul.f32 %v3518_v11, %v2666_v35  ;;  %v882_v62 = vadd.f32 %v881_v32, %v878_v10  ;;  %v885_v33 = vmul.f32 %v3520_v13, %v2658_v1  ;;  %v782_v44 = vadd.f32 %v781_v4, %v778_v56 }
 0x148   :  { %v748_v38 = vadd.f32 %v747_v41, %v744_v22  ;;  %v864_v29 = vadd.f32 %v863_v47, %v860_v27  ;;  %v3522_v49 = vstv %s3511_s21  ;;  %v710_v6 = vadd.f32 %v709_v34, %v706_v40  ;;  %s2886_s21 = sld [smem:[#allocation2 + $0xdc]] }
 0x149   :  { %v889_v45 = vmul.f32 %v3522_v49, %v2660_v8  ;;  %v886_v25 = vadd.f32 %v885_v33, %v882_v62  ;;  %v3524_v43 = vstv %s3515_s14  ;;  %v3525_v15 = vstv %s2423_s24  ;;  %s3533_s24 = sld [smem:[#allocation94_spill]]  ;;  %s3558_s14 = sld [smem:[#allocation23_spill]] }
 0x14a   :  { %v893_v12 = vmul.f32 %v3524_v43, %v2662_v31  ;;  %v788_v7 = vmul.f32 %v3525_v15, %v2654_v50  ;;  %v3526_v20 = vstv %s3516_s20  ;;  %v752_v41 = vadd.f32 %v751_v63, %v748_v38  ;;  %s2902_s20 = sld [smem:[#allocation2 + $0xe2]] }
 0x14b   :  { %v2777_v4 = vadd.f32 %v3526_v20, %v782_v44  ;;  %v868_v47 = vadd.f32 %v867_v16, %v864_v29  ;;  %v3528_v61 = vstv %s3519_s28  ;;  %v714_v26 = vadd.f32 %v713_v2, %v710_v6 }
 0x14c   :  { %v791_v55 = vmul.f32 %v3528_v61, %v2656_v0  ;;  %v890_v21 = vadd.f32 %v889_v45, %v886_v25  ;;  %v3530_v23 = vstv %s3521_s17  ;;  %v3531_v51 = vstv %s2430_s19  ;;  %s2802_s19 = sld [smem:[#allocation2 + $0xe5]]  ;;  %s2925_s17 = sld [smem:[#allocation2 + $0xe6]] }
 0x14d   :  { %v897_v37 = vmul.f32 %v3530_v23, %v2664_v52  ;;  %v795_v34 = vmul.f32 %v3531_v51, %v2658_v1  ;;  %v2791_v30 = vsel %vm42_vm1, %v2777_v4, 0.0  ;;  %v3532_v63 = vstv %s3523_s2  ;;  %s3566_s2 = sld [smem:[#allocation110_spill]] }
 0x14e   :  { %v2795_v16 = vadd.f32 %v3532_v63, %v752_v41  ;;  %v872_v24 = vadd.f32 %v871_v58, %v868_v47  ;;  %v792_v2 = vadd.f32 %v791_v55, %v788_v7  ;;  %v1041_v5 = vsel %vm475_vm0, %v2791_v30, 0.0 }
 0x14f   :  { %v718_v10 = vadd.f32 %v717_v28, %v714_v26  ;;  %v894_v9 = vadd.f32 %v893_v12, %v890_v21  ;;  %v3534_v32 = vstv %s3527_s8  ;;  %1042 = vadd.xlane.f32.xlu1 %v1041_v5  ;;  %v3535_v22 = vstv %s3529_s1  ;;  %s1275_s8 = sshll.u32 %s1674_s30, 4  ;;  %s1276_s8 = int_to_ptr.vmem [resolvable:$true] %s1275_s8 }
 0x150   :  { %v901_v56 = vmul.f32 %v3534_v32, %v2666_v35  ;;  %v2809_v58 = vsel %vm42_vm1, %v2795_v16, 0.0  ;;  %v2813_v27 = vadd.f32 %v3535_v22, %v872_v24  ;;  %v796_v46 = vadd.f32 %v795_v34, %v792_v2  ;;  %s1618_s1 = scalar_lea.vmem %s1276_s8, 64  ;;  %p1623_p12 = scmp.lt.s32.totalorder %s1276_s8, %s1276_s8 }
 0x151   :  { %v3536_v28 = vstv %s2432_s18  ;;  %v1019_v11 = vsel %vm475_vm0, %v2809_v58, 0.0  ;;  %v722_v62 = vadd.f32 %v721_v54, %v718_v10  ;;  %v898_v13 = vadd.f32 %v897_v37, %v894_v9  ;;  %p1619_p11 = scmp.ne.s32.totalorder %s1276_s8, %s1618_s1  ;;  %p1624_p13 = scmp.lt.s32.totalorder %s1618_s1, %s1618_s1 }
 0x152   :  { %v799_v40 = vmul.f32 %v3536_v28, %v2660_v8  ;;  %v3538_v33 = vstv %s3533_s24  ;;  %1020 = vadd.xlane.f32.xlu0 %v1019_v11  ;;  %v2828_v38 = vsel %vm42_vm1, %v2813_v27, 0.0  ;;  %v908_v54 = vmul.f32 %v907_v59, %v2654_v50 }
 0x153   :  { %v803_v44 = vmul.f32 %v3538_v33, %v2662_v31  ;;  %v3542_v49 = vstv %s3411_s5  ;;  %v1107_v6 = vsel %vm475_vm0, %v2828_v38, 0.0  ;;  %v3543_v25 = vstv %s2445_s6  ;;  %s2869_s6 = sld [smem:[#allocation2 + $0xdb]]  ;;  %s3552_s5 = sld [smem:[#allocation102_spill]] }
 0x154   :  { %v800_v29 = vadd.f32 %v799_v40, %v796_v46  ;;  %v911_v45 = vmul.f32 %v3542_v49, %v2656_v0  ;;  %v2840_v43 = vadd.f32 %v3543_v25, %v722_v62  ;;  %v902_v12 = vadd.f32 %v901_v56, %v898_v13  ;;  %1108 = vadd.xlane.f32.xlu1 %v1107_v6  ;;  %p1625_p0 = por %p1624_p13, %p1623_p12 }
 0x155   :  { %v970_v15 = vstv %s2773_s3  ;;  %v3545_v20 = vstv %s3537_s25  ;;  %v3547_v47 = vstv %s3412_s16  ;;  %v3548_v21 = vstv %s3540_s15 }
 0x156   :  { %v804_v7 = vadd.f32 %v803_v44, %v800_v29  ;;  %v807_v41 = vmul.f32 %v3545_v20, %v2664_v52  ;;  %v912_v59 = vadd.f32 %v911_v45, %v908_v54  ;;  %v915_v61 = vmul.f32 %v3547_v47, %v2658_v1  ;;  %p1626_p1 = pnand %p1625_p0, %p1619_p11 }
 0x157   :  { %v2852_v55 = vsel %vm42_vm1, %v2840_v43, 0.0  ;;  %v2856_v26 = vadd.f32 %v904_v36, %v902_v12  ;;  %v811_v23 = vmul.f32 %v3548_v21, %v2666_v35  ;;  %v919_v37 = vmul.f32 %v918_v53, %v2660_v8 }
 0x158   :  { %v997_v51 = vsel %vm475_vm0, %v2852_v55, 0.0  ;;  %v808_v34 = vadd.f32 %v807_v41, %v804_v7  ;;  %v916_v63 = vadd.f32 %v915_v61, %v912_v59  ;;  %v3551_v24 = vstv %s3544_s26 }
 0x159   :  { %v818_v2 = vmul.f32 %v3551_v24, %v2654_v50  ;;  %998 = vadd.xlane.f32.xlu0 %v997_v51  ;;  %v2874_v36 = vsel %vm42_vm1, %v2856_v26, 0.0  ;;  %v934_v53 = vstv %s2802_s19  ;;  %v3553_v5 = vstv %s3546_s23 }
 0x15a   :  { %v821_v10 = vmul.f32 %v3553_v5, %v2656_v0  ;;  %v974_v9 = vstv %s2804_s13  ;;  %v1129_v32 = vsel %vm475_vm0, %v2874_v36, 0.0  ;;  %v812_v56 = vadd.f32 %v811_v23, %v808_v34 }
 0x15b   :  { %v920_v22 = vadd.f32 %v919_v37, %v916_v63  ;;  %v3556_v46 = vstv %s3549_s27  ;;  %1130 = vadd.xlane.f32.xlu1 %v1129_v32  ;;  %v825_v11 = vmul.f32 %v824_v57, %v2658_v1  ;;  %v938_v62 = vmul.f32 %v937_v19, %v2654_v50 }
 0x15c   :  { %v923_v28 = vmul.f32 %v3556_v46, %v2662_v31  ;;  %v822_v40 = vadd.f32 %v821_v10, %v818_v2  ;;  %v978_v13 = vstv %s2823_s4  ;;  %v2897_v33 = vadd.f32 %v814_v48, %v812_v56 }
 0x15d   :  { %v3559_v29 = vstv %s3552_s5  ;;  %v941_v49 = vmul.f32 %v940_v42, %v2656_v0  ;;  %v3560_v45 = vstv %s3554_s0  ;;  %v3561_v19 = vstv %s3555_s11 }
 0x15e   :  { %v924_v44 = vadd.f32 %v923_v28, %v920_v22  ;;  %v927_v54 = vmul.f32 %v3559_v29, %v2664_v52  ;;  %v931_v57 = vmul.f32 %v3560_v45, %v2666_v35  ;;  %v826_v6 = vadd.f32 %v825_v11, %v822_v40 }
 0x15f   :  { %v829_v25 = vmul.f32 %v3561_v19, %v2660_v8  ;;  %v833_v48 = vmul.f32 %v832_v60, %v2662_v31  ;;  %v1062_v12 = vsel %vm42_vm1, %v2897_v33, 0.0  ;;  %v942_v20 = vadd.f32 %v941_v49, %v938_v62 }
 0x160   :  { %v928_v7 = vadd.f32 %v927_v54, %v924_v44  ;;  %v3564_v42 = vstv %s3558_s14  ;;  %v1063_v59 = vsel %vm475_vm0, %v1062_v12, 0.0  ;;  %v968_v60 = vmul.f32 %v967_v39, %v2654_v50 }
 0x161   :  { %v945_v41 = vmul.f32 %v3564_v42, %v2658_v1  ;;  %v830_v47 = vadd.f32 %v829_v25, %v826_v6  ;;  %v971_v61 = vmul.f32 %v970_v15, %v2656_v0  ;;  %1064 = vadd.xlane.f32.xlu0 %v1063_v59  ;;  %v3567_v37 = vstv %s3562_s12 }
 0x162   :  { %v932_v21 = vadd.f32 %v931_v57, %v928_v7  ;;  %v949_v51 = vmul.f32 %v3567_v37, %v2660_v8  ;;  %v982_v34 = vstv %s2869_s6  ;;  %v3568_v24 = vstv %s3563_s9 }
 0x163   :  { %v946_v23 = vadd.f32 %v945_v41, %v942_v20  ;;  %v834_v63 = vadd.f32 %v833_v48, %v830_v47  ;;  %v837_v2 = vmul.f32 %v3568_v24, %v2664_v52  ;;  %v972_v5 = vadd.f32 %v971_v61, %v968_v60 }
 0x164   :  { %v975_v10 = vmul.f32 %v974_v9, %v2658_v1  ;;  %v2939_v50 = vadd.f32 %v934_v53, %v932_v21  ;;  %v953_v39 = vmul.f32 %v952_v3, %v2662_v31  ;;  %v986_v15 = vstv %s2886_s21 }
 0x165   :  { %v950_v0 = vadd.f32 %v949_v51, %v946_v23  ;;  %v838_v32 = vadd.f32 %v837_v2, %v834_v63  ;;  %v3570_v56 = vstv %s3566_s2  ;;  %v979_v28 = vmul.f32 %v978_v13, %v2660_v8 }
 0x166   :  { %v841_v22 = vmul.f32 %v3570_v56, %v2666_v35  ;;  %v976_v46 = vadd.f32 %v975_v10, %v972_v5  ;;  %v1150_v1 = vsel %vm42_vm1, %v2939_v50, 0.0  ;;  %v844_v53 = vstv %s2902_s20 }
 0x167   :  { %v954_v9 = vadd.f32 %v953_v39, %v950_v0  ;;  %v957_v3 = vmul.f32 %v956_v14, %v2664_v52  ;;  %v1151_v40 = vsel %vm475_vm0, %v1150_v1, 0.0  ;;  %v983_v44 = vmul.f32 %v982_v34, %v2662_v31 }
 0x168   :  { %v842_v11 = vadd.f32 %v841_v22, %v838_v32  ;;  %v980_v62 = vadd.f32 %v979_v28, %v976_v46  ;;  %1152 = vadd.xlane.f32.xlu1 %v1151_v40  ;;  %v961_v8 = vmul.f32 %v960_v18, %v2666_v35  ;;  %v990_v13 = vstv %s2922_s10 }
 0x169   :  { %v958_v29 = vadd.f32 %v957_v3, %v954_v9  ;;  %v964_v49 = vstv %s2925_s17  ;;  %v987_v57 = vmul.f32 %v986_v15, %v2664_v52  ;;  %v991_v31 = vmul.f32 %v990_v13, %v2666_v35 }
 0x16a   :  { %v2964_v54 = vadd.f32 %v844_v53, %v842_v11  ;;  %v984_v45 = vadd.f32 %v983_v44, %v980_v62  ;;  %v994_v18 = vstv %s2945_s29  ;;  %v1023_v41 = vmul.f32 %v2809_v58, %v2809_v58 }
 0x16b   :  { %v962_v14 = vadd.f32 %v961_v8, %v958_v29  ;;  %v1067_v47 = vmul.f32 %v1062_v12, %v1062_v12  ;;  %v1045_v61 = vmul.f32 %v2791_v30, %v2791_v30  ;;  %v1001_v17 = vmul.f32 %v2852_v55, %v2852_v55 }
 0x16c   :  { %v1084_v6 = vsel %vm42_vm1, %v2964_v54, 0.0  ;;  %v988_v19 = vadd.f32 %v987_v57, %v984_v45  ;;  %v1024_v60 = vsel %vm475_vm0, %v1023_v41, 0.0  ;;  %v1111_v12 = vmul.f32 %v2828_v38, %v2828_v38 }
 0x16d   :  { %v1085_v25 = vsel %vm475_vm0, %v1084_v6, 0.0  ;;  %v2973_v48 = vadd.f32 %v964_v49, %v962_v14  ;;  %v1068_v21 = vsel %vm475_vm0, %v1067_v47, 0.0  ;;  %v1089_v23 = vmul.f32 %v1084_v6, %v1084_v6 }
 0x16e   :  { %1086 = vadd.xlane.f32.xlu0 %v1085_v25  ;;  %v992_v7 = vadd.f32 %v991_v31, %v988_v19  ;;  %v1046_v58 = vsel %vm475_vm0, %v1045_v61, 0.0  ;;  %v1002_v51 = vsel %vm475_vm0, %v1001_v17, 0.0  ;;  %v1133_v30 = vmul.f32 %v2874_v36, %v2874_v36 }
 0x16f   :  { %v1172_v20 = vsel %vm42_vm1, %v2973_v48, 0.0  ;;  %v1090_v37 = vsel %vm475_vm0, %v1089_v23, 0.0  ;;  %v1112_v34 = vsel %vm475_vm0, %v1111_v12, 0.0  ;;  %v1155_v63 = vmul.f32 %v1150_v1, %v1150_v1 }
 0x170   :  { %v1173_v52 = vsel %vm475_vm0, %v1172_v20, 0.0  ;;  %v2980_v42 = vadd.f32 %v994_v18, %v992_v7  ;;  %v1134_v24 = vsel %vm475_vm0, %v1133_v30, 0.0  ;;  %v1177_v55 = vmul.f32 %v1172_v20, %v1172_v20 }
 0x171   :  { %1174 = vadd.xlane.f32.xlu1 %v1173_v52  ;;  %v1156_v2 = vsel %vm475_vm0, %v1155_v63, 0.0 }
 0x172   :  { %v1194_v35 = vsel %vm42_vm1, %v2980_v42, 0.0  ;;  %v1178_v38 = vsel %vm475_vm0, %v1177_v55, 0.0 }
 0x173   :  { %v1195_v59 = vsel %vm475_vm0, %v1194_v35, 0.0  ;;  %v1199_v5 = vmul.f32 %v1194_v35, %v1194_v35 }
 0x174   :  { %1196 = vadd.xlane.f32.xlu0 %v1195_v59 }
 0x175   :  { %1025 = vadd.xlane.f32.xlu1 %v1024_v60  ;;  %v1200_v10 = vsel %vm475_vm0, %v1199_v5, 0.0 }
 0x178   :  { %1069 = vadd.xlane.f32.xlu0 %v1068_v21 }
 0x179   :  { %1047 = vadd.xlane.f32.xlu1 %v1046_v58 }
 0x17c   :  { %1091 = vadd.xlane.f32.xlu0 %v1090_v37 }
 0x17d   :  { %1003 = vadd.xlane.f32.xlu1 %v1002_v51 }
 0x180   :  { %1113 = vadd.xlane.f32.xlu0 %v1112_v34 }
 0x181   :  { %1135 = vadd.xlane.f32.xlu1 %v1134_v24 }
 0x184   :  { %1157 = vadd.xlane.f32.xlu0 %v1156_v2 }
 0x185   :  { %1179 = vadd.xlane.f32.xlu1 %v1178_v38 }
 0x188   :  { %1201 = vadd.xlane.f32.xlu0 %v1200_v10 }
 0x189   :  { %1629 = shalt.err (!%p1626_p1)
}
 0x18a   :  { %s3571_s13 = sld [smem:[#allocation111_spill]] }
 0x190   :  { %s1630_s25 = scalar_lea.hbm %s3571_s13, 64 }
 0x191   :  { %p1631_p2 = scmp.ne.s32.totalorder %s3571_s13, %s1630_s25  ;;  %p1634_p3 = scmp.lt.u32.totalorder %s1630_s25, %s3571_s13 }
 0x193   :  { %p1636_p4 = pnand %p1634_p3, %p1631_p2 }
 0x195   :  { %1639 = shalt.err (!%p1636_p4)
}
 0x196   :  { %1278 = dma.vmem_to_hbm [thread:$0]  %s1276_s8, 64, %s3571_s13, [#allocation4]   ;;  %vm1258_vm4 = vcmask 1043456   ;;  %vm1260_vm5 = vcmask 1044480   ;;  %vm1262_vm6 = vcmask 1045504   ;;  %vm1264_vm7 = vcmask 1046528  }
 0x197   :  { %s3034_s27 = sld [smem:[#allocation2 + $0xe9]]  ;;  %s3044_s16 = sld [smem:[#allocation2 + $0xea]] }
 0x198   :  { %s3046_s6 = sld [smem:[#allocation2 + $0xeb]]  ;;  %s3048_s5 = sld [smem:[#allocation2 + $0xec]] }
 0x199   :  { %s3050_s0 = sld [smem:[#allocation2 + $0xe8]]  ;;  %s3060_s11 = sld [smem:[#allocation2 + $0xed]] }
 0x19a   :  { %s3062_s7 = sld [smem:[#allocation2 + $0xf2]]  ;;  %s3065_s21 = sld [smem:[#allocation2 + $0xf3]] }
 0x19b   :  { %s3067_s14 = sld [smem:[#allocation2 + $0xf4]]  ;;  %s3073_s20 = sld [smem:[#allocation2 + $0xf5]] }
 0x19c   :  { %s3078_s12 = sld [smem:[#allocation2 + $0xf6]]  ;;  %s3083_s9 = sld [smem:[#allocation2 + $0xf7]] }
 0x19d   :  { %v1033_v5 = vstv %s3034_s27  ;;  %s3085_s10 = sld [smem:[#allocation2 + $0xee]]  ;;  %s3091_s28 = sld [smem:[#allocation2 + $0xf8]] }
 0x19e   :  { %s3097_s17 = sld [smem:[#allocation2 + $0xef]]  ;;  %s3102_s2 = sld [smem:[#allocation2 + $0xf0]] }
 0x19f   :  { %s3111_s3 = sld [smem:[#allocation2 + $0xf9]]  ;;  %s3123_s30 = sld [smem:[#allocation2 + $0xfb]] }
 0x1a0   :  { %s3113_s29 = sld [smem:[#allocation2 + $0xf1]]  ;;  %s3129_s8 = sld [smem:[#allocation2 + $0xfa]] }
 0x1a1   :  { %s1675_s1 = smov [#allocation8]  }
 0x1a2   :  { %s1284_s24 = sshll.u32 %s1675_s1, 4  ;;  %s1285_s24 = int_to_ptr.vmem [resolvable:$true] %s1284_s24 }
 0x1a3   :  { %s1640_s19 = scalar_lea.vmem %s1285_s24, 256  ;;  %p1645_p6 = scmp.lt.s32.totalorder %s1285_s24, %s1285_s24 }
 0x1a4   :  { %p1641_p5 = scmp.ne.s32.totalorder %s1285_s24, %s1640_s19  ;;  %p1646_p7 = scmp.lt.s32.totalorder %s1640_s19, %s1640_s19 }
 0x1a6   :  { %p1647_p8 = por %p1646_p7, %p1645_p6 }
 0x1a8   :  { %p1648_p9 = pnand %p1647_p8, %p1641_p5 }
 0x1dc   :  { %v1043_v36 = vpop.xlane.xlu1 %1042 }
 0x1dd   :  { %v3022_v40 = vmul.f32 0.125, %v1043_v36 }
 0x1df   :  { %v1021_v0 = vpop.xlane.xlu0 %1020  ;;  %v1050_v57 = vmul.f32 %v3022_v40, %v3022_v40 }
 0x1e0   :  { %v3018_v1 = vmul.f32 0.125, %v1021_v0 }
 0x1e1   :  { %v1109_v39 = vpop.xlane.xlu1 %1108 }
 0x1e2   :  { %v1028_v11 = vmul.f32 %v3018_v1, %v3018_v1  ;;  %v3036_v7 = vmul.f32 0.125, %v1109_v39 }
 0x1e4   :  { %v1116_v17 = vmul.f32 %v3036_v7, %v3036_v7 }
 0x1e6   :  { %v999_v15 = vpop.xlane.xlu0 %998 }
 0x1e7   :  { %v3032_v14 = vmul.f32 0.125, %v999_v15 }
 0x1e8   :  { %v1131_v32 = vpop.xlane.xlu1 %1130 }
 0x1e9   :  { %v1006_v59 = vmul.f32 %v3032_v14, %v3032_v14  ;;  %v3042_v47 = vmul.f32 0.125, %v1131_v32 }
 0x1eb   :  { %v1138_v34 = vmul.f32 %v3042_v47, %v3042_v47 }
 0x1ee   :  { %v1065_v56 = vpop.xlane.xlu0 %1064 }
 0x1ef   :  { %v3020_v9 = vmul.f32 0.125, %v1065_v56 }
 0x1f1   :  { %v1072_v8 = vmul.f32 %v3020_v9, %v3020_v9 }
 0x1f5   :  { %v1153_v22 = vpop.xlane.xlu1 %1152 }
 0x1f6   :  { %v3054_v37 = vmul.f32 0.125, %v1153_v22 }
 0x1f8   :  { %v1160_v36 = vmul.f32 %v3054_v37, %v3054_v37 }
 0x1fb   :  { %v1087_v46 = vpop.xlane.xlu0 %1086 }
 0x1fc   :  { %v3028_v13 = vmul.f32 0.125, %v1087_v46  ;;  %v1055_v46 = vstv %s3044_s16 }
 0x1fe   :  { %v1175_v28 = vpop.xlane.xlu1 %1174  ;;  %v1094_v20 = vmul.f32 %v3028_v13, %v3028_v13 }
 0x1ff   :  { %v3058_v63 = vmul.f32 0.125, %v1175_v28 }
 0x201   :  { %v1197_v53 = vpop.xlane.xlu0 %1196  ;;  %v1182_v22 = vmul.f32 %v3058_v63, %v3058_v63 }
 0x202   :  { %v1026_v3 = vpop.xlane.xlu1 %1025  ;;  %v3071_v0 = vmul.f32 0.125, %v1197_v53  ;;  %v1077_v53 = vstv %s3046_s6 }
 0x203   :  { %v1027_v62 = vmul.f32 0.125, %v1026_v3 }
 0x205   :  { %v1029_v44 = vsub.f32 %v1027_v62, %v1028_v11  ;;  %v1070_v29 = vpop.xlane.xlu0 %1069 }
 0x206   :  { %v1071_v49 = vmul.f32 0.125, %v1070_v29  ;;  %v1048_v45 = vpop.xlane.xlu1 %1047  ;;  %v1011_v29 = vstv %s3050_s0 }
 0x207   :  { %v1030_v6 = vadd.f32 1e-05, %v1029_v44  ;;  %v1049_v19 = vmul.f32 0.125, %v1048_v45  ;;  %v1099_v44 = vstv %s3048_s5 }
 0x208   :  { %v1073_v31 = vsub.f32 %v1071_v49, %v1072_v8 }
 0x209   :  { %1566 = vrsqrt.f32 %v1030_v6  ;;  %v1051_v25 = vsub.f32 %v1049_v19, %v1050_v57  ;;  %v1092_v18 = vpop.xlane.xlu0 %1091  ;;  %v1035_v57 = vsub.f32 %v2795_v16, %v3018_v1  ;;  %v1204_v6 = vmul.f32 %v3071_v0, %v3071_v0 }
 0x20a   :  { %v1074_v52 = vadd.f32 1e-05, %v1073_v31  ;;  %v1093_v41 = vmul.f32 0.125, %v1092_v18  ;;  %v1004_v35 = vpop.xlane.xlu1 %1003  ;;  %v1057_v18 = vsub.f32 %v2777_v4, %v3022_v40 }
 0x20b   :  { %v1052_v60 = vadd.f32 1e-05, %v1051_v25  ;;  %v1005_v61 = vmul.f32 0.125, %v1004_v35 }
 0x20c   :  { %1568 = vrsqrt.f32 %v1074_v52  ;;  %v1095_v21 = vsub.f32 %v1093_v41, %v1094_v20  ;;  %v1079_v20 = vsub.f32 %v2897_v33, %v3020_v9  ;;  %v1060_v9 = vstv %s3067_s14 }
 0x20d   :  { %1570 = vrsqrt.f32 %v1052_v60  ;;  %v1007_v23 = vsub.f32 %v1005_v61, %v1006_v59  ;;  %v1114_v58 = vpop.xlane.xlu0 %1113  ;;  %v1121_v59 = vstv %s3060_s11  ;;  %v1016_v60 = vstv %s3062_s7 }
 0x20e   :  { %v1096_v12 = vadd.f32 1e-05, %v1095_v21  ;;  %v1115_v51 = vmul.f32 0.125, %v1114_v58  ;;  %v1136_v30 = vpop.xlane.xlu1 %1135  ;;  %v1038_v61 = vstv %s3065_s21  ;;  %v1101_v58 = vsub.f32 %v2964_v54, %v3028_v13 }
 0x20f   :  { %v1008_v24 = vadd.f32 1e-05, %v1007_v23  ;;  %v1137_v55 = vmul.f32 0.125, %v1136_v30  ;;  %v1013_v30 = vsub.f32 %v2840_v43, %v3032_v14  ;;  %v1123_v43 = vsub.f32 %v2813_v27, %v3036_v7 }
 0x210   :  { %1572 = vrsqrt.f32 %v1096_v12  ;;  %v1117_v2 = vsub.f32 %v1115_v51, %v1116_v17  ;;  %v1082_v12 = vstv %s3073_s20  ;;  %v1104_v51 = vstv %s3078_s12 }
 0x211   :  { %1574 = vrsqrt.f32 %v1008_v24  ;;  %v1139_v38 = vsub.f32 %v1137_v55, %v1138_v34  ;;  %v1158_v10 = vpop.xlane.xlu0 %1157  ;;  %v1167_v27 = vsub.f32 %v2939_v50, %v3054_v37 }
 0x212   :  { %v1118_v39 = vadd.f32 1e-05, %v1117_v2  ;;  %v1159_v15 = vmul.f32 0.125, %v1158_v10  ;;  %v1180_v32 = vpop.xlane.xlu1 %1179 }
 0x213   :  { %v1567_v56 = vpop.eup %1566  ;;  %v1140_v28 = vadd.f32 1e-05, %v1139_v38  ;;  %v1181_v3 = vmul.f32 0.125, %v1180_v32  ;;  %v1143_v38 = vstv %s3085_s10  ;;  %v1165_v32 = vstv %s3097_s17 }
 0x214   :  { %v1034_v11 = vmul.f32 %v1567_v56, %v1033_v5  ;;  %1576 = vrsqrt.f32 %v1118_v39  ;;  %v1161_v62 = vsub.f32 %v1159_v15, %v1160_v36  ;;  %v1126_v5 = vstv %s3083_s9 }
 0x215   :  { %1578 = vrsqrt.f32 %v1140_v28  ;;  %v1183_v8 = vsub.f32 %v1181_v3, %v1182_v22  ;;  %v1202_v49 = vpop.xlane.xlu0 %1201  ;;  %v1148_v36 = vstv %s3091_s28  ;;  %v1145_v56 = vsub.f32 %v2856_v26, %v3042_v47 }
 0x216   :  { %v1569_v45 = vpop.eup %1568  ;;  %v1162_v19 = vadd.f32 1e-05, %v1161_v62  ;;  %v1203_v31 = vmul.f32 0.125, %v1202_v49  ;;  %v1036_v16 = vmul.f32 %v1035_v57, %v1034_v11  ;;  %v1187_v62 = vstv %s3102_s2 }
 0x217   :  { %v1571_v25 = vpop.eup %1570  ;;  %v1184_v52 = vadd.f32 1e-05, %v1183_v8  ;;  %v1078_v41 = vmul.f32 %v1569_v45, %v1077_v53 }
 0x218   :  { %v1056_v1 = vmul.f32 %v1571_v25, %v1055_v46  ;;  %1580 = vrsqrt.f32 %v1162_v19  ;;  %v1205_v35 = vsub.f32 %v1203_v31, %v1204_v6  ;;  %v1039_v24 = vadd.f32 %v1038_v61, %v1036_v16 }
 0x219   :  { %1582 = vrsqrt.f32 %v1184_v52  ;;  %v1080_v21 = vmul.f32 %v1079_v20, %v1078_v41  ;;  %v1170_v19 = vstv %s3111_s3  ;;  %v1209_v31 = vstv %s3113_s29 }
 0x21a   :  { %v1573_v4 = vpop.eup %1572  ;;  %v1206_v40 = vadd.f32 1e-05, %v1205_v35  ;;  %v1058_v33 = vmul.f32 %v1057_v18, %v1056_v1  ;;  %v1232_v46 = vrot.slane %v1039_v24, 7  ;;  %v1189_v52 = vsub.f32 %v2973_v48, %v3058_v63 }
 0x21b   :  { %v1575_v23 = vpop.eup %1574  ;;  %v1100_v17 = vmul.f32 %v1573_v4, %v1099_v44  ;;  %v1083_v10 = vadd.f32 %v1082_v12, %v1080_v21  ;;  %v1211_v16 = vsub.f32 %v2980_v42, %v3071_v0 }
 0x21c   :  { %v1012_v34 = vmul.f32 %v1575_v23, %v1011_v29  ;;  %1584 = vrsqrt.f32 %v1206_v40  ;;  %v1061_v55 = vadd.f32 %v1060_v9, %v1058_v33  ;;  %v1192_v9 = vstv %s3129_s8 }
 0x21d   :  { %v1102_v2 = vmul.f32 %v1101_v58, %v1100_v17  ;;  %v1238_v7 = vrot.slane %v1083_v10, 5 }
 0x21e   :  { %v1577_v54 = vpop.eup %1576  ;;  %v1014_v13 = vmul.f32 %v1013_v30, %v1012_v34  ;;  %v1235_v3 = vrot.slane %v1061_v55, 6 }
 0x21f   :  { %v1579_v39 = vpop.eup %1578  ;;  %v1122_v14 = vmul.f32 %v1577_v54, %v1121_v59  ;;  %v1105_v15 = vadd.f32 %v1104_v51, %v1102_v2 }
 0x220   :  { %v1017_v22 = vadd.f32 %v1016_v60, %v1014_v13  ;;  %v1144_v28 = vmul.f32 %v1579_v39, %v1143_v38  ;;  %v1214_v60 = vstv %s3123_s30 }
 0x221   :  { %v1124_v11 = vmul.f32 %v1123_v43, %v1122_v14  ;;  %v1241_v47 = vrot.slane %v1105_v15, 4 }
 0x222   :  { %v1581_v53 = vpop.eup %1580  ;;  %v1255_v44 = vsel %vm475_vm0, %v1017_v22, %v1232_v46  ;;  %v1146_v29 = vmul.f32 %v1145_v56, %v1144_v28 }
 0x223   :  { %v1583_v26 = vpop.eup %1582  ;;  %v1256_v8 = vsel %vm1226_vm2, %v1255_v44, %v1235_v3  ;;  %v1127_v49 = vadd.f32 %v1126_v5, %v1124_v11  ;;  %v1166_v45 = vmul.f32 %v1581_v53, %v1165_v32 }
 0x224   :  { %v1257_v57 = vsel %vm1228_vm3, %v1256_v8, %v1238_v7  ;;  %v1149_v6 = vadd.f32 %v1148_v36, %v1146_v29  ;;  %v1188_v25 = vmul.f32 %v1583_v26, %v1187_v62 }
 0x225   :  { %v1259_v50 = vsel %vm1258_vm4, %v1257_v57, %v1241_v47  ;;  %v1168_v37 = vmul.f32 %v1167_v27, %v1166_v45  ;;  %v1244_v18 = vrot.slane %v1127_v49, 3 }
 0x226   :  { %v1585_v20 = vpop.eup %1584  ;;  %v1247_v41 = vrot.slane %v1149_v6, 2  ;;  %v1190_v4 = vmul.f32 %v1189_v52, %v1188_v25 }
 0x227   :  { %v1171_v1 = vadd.f32 %v1170_v19, %v1168_v37  ;;  %v1210_v35 = vmul.f32 %v1585_v20, %v1209_v31  ;;  %v1261_v59 = vsel %vm1260_vm5, %v1259_v50, %v1244_v18 }
 0x228   :  { %v1263_v61 = vsel %vm1262_vm6, %v1261_v59, %v1247_v41  ;;  %v1193_v48 = vadd.f32 %v1192_v9, %v1190_v4 }
 0x229   :  { %v1212_v40 = vmul.f32 %v1211_v16, %v1210_v35  ;;  %v1250_v33 = vrot.slane %v1171_v1, 1 }
 0x22b   :  { %v1215_v21 = vadd.f32 %v1214_v60, %v1212_v40  ;;  %v1265_v23 = vsel %vm1264_vm7, %v1263_v61, %v1250_v33 }
 0x22c   :  { %1267 = vst [vmem:[#allocation8] sm:$0xff] %v1265_v23 }
 0x22d   :  { %v1253_v63 = vrot.slane %v1215_v21, 7 }
 0x22f   :  { %v1266_v42 = vsel %vm475_vm0, %v1193_v48, %v1253_v63 }
 0x230   :  { %1268 = vst [vmem:[#allocation8 + $0x8] sm:$0x3] %v1266_v42 }
 0x231   :  { %1651 = shalt.err (!%p1648_p9)
}
 0x232   :  { %s3572_s4 = sld [smem:[#allocation112_spill]] }
 0x238   :  { %s1652_s22 = scalar_lea.hbm %s3572_s4, 256 }
 0x239   :  { %p1653_p10 = scmp.ne.s32.totalorder %s3572_s4, %s1652_s22  ;;  %p1656_p11 = scmp.lt.u32.totalorder %s1652_s22, %s3572_s4 }
 0x23b   :  { %p1658_p12 = pnand %p1656_p11, %p1653_p10 }
 0x23d   :  { %1661 = shalt.err (!%p1658_p12)
}
 0x23e   :  { %s3573_s27 = smov 8   ;;  %s3574_s16 = smov 128  }
 0x23f   :  { %1290 = dma.vmem_to_hbm [thread:$0]  %s1285_s24, 256, %s3572_s4, [#allocation9], %s3574_s16, %s3574_s16, %s3573_s27  }
 0x240   :  { %1666 = dma.done.wait [#allocation4], 64  }
 0x241   :  { %1667 = vsyncadd [#allocation4], 4294967232 }
 0x242   :  { %1668 = dma.done.wait [#allocation9], 256  }
 0x243   :  { %1669 = vsyncadd [#allocation9], 4294967040 }
 0x244   :  { %1297 = vsyncpa [#allocation3], 1 }
 0x245   :  { %1298 = vsyncpa [#allocation4], 1 }
 0x246   :  { %1299 = vsyncpa [#allocation9], 1 }
 0x247   :  { %1300 = vsyncpa [#allocation5], 1 }

</bundles_post_ra>
